<compile_context>
chip_gen: v5e
topology: v5e:2x2
jax: 0.10.0
libtpu: 0.0.40
codegen_flags: <defaults>
</compile_context>

<pallas_src>
import functools

import jax
import jax.numpy as jnp
from jax import lax
from jax.experimental import pallas as pl
from jax.experimental.pallas import tpu as pltpu

EPS = 1e-5
LANE = 128


def _round_up(x, m):
    return (x + m - 1) // m * m


def _tpu_vmem_capacity_bytes():
    """Physical per-core VMEM capacity, with a conservative fallback."""
    try:
        info = pltpu.get_tpu_info()
        cap = int(getattr(info, "vmem_capacity_bytes", 0))
        if cap > 0:
            return cap
    except Exception:
        pass
    return 128 << 20  # v5e/v6e-style default


def _vmem_limit_bytes(HW, NTH, Cp, unfused_taps, vmem_cap):
    bf16, f32 = 2, 4
    # Double-buffered pipeline blocks: x in (bf16), out (bf16), 2 weight tensors (bf16).
    blocks = (2 * HW * Cp * bf16
              + 2 * HW * Cp * bf16
              + 2 * 2 * (9 * Cp * Cp * bf16))
    # Live in-kernel intermediates at the conv peak.
    taps = NTH * Cp * (3 * bf16 + 3 * f32)       # th/left/right bf16 + thf/r_m1/r_p1 f32
    if not unfused_taps:
        taps += NTH * 3 * Cp * bf16              # lane-concat "big"
    interm = taps + 3 * HW * Cp * f32 + 2 * NTH * Cp * f32   # acc, y, z + mask slack
    est = blocks + interm + (8 << 20)
    # Generation-aware cap: leave headroom for compiler scratch on 64-MiB cores.
    hard_cap = (46 << 20) if vmem_cap <= (64 << 20) else (100 << 20)
    return int(max(32 << 20, min(est, hard_cap)))


# ---------------------------------------------------------------------------
# Pallas kernel
# ---------------------------------------------------------------------------
def _resnet_block_kernel(x_ref, w1_ref, w2_ref, o_ref, *, H, W, unfused_taps):
    # x_ref : (1, H*W, Cp)   bf16   -- flattened NHWC, channel-padded
    # w*_ref: (3, 3*Cp, Cp)  bf16   -- [kh][kw*Cp + ci, co]
    # o_ref : (1, H*W, Cp)   bf16
    _, HW, Cp = x_ref.shape
    NTH = (H + 2) * W  # rows of the H-reflect-padded image (flattened)

    # Static column-position masks on the flattened row index i = h*W + w.
    # Avoid the integer-modulo (multi-op divide sequence) when the
    # (H+2, W, Cp) -> (NTH, Cp) reshape is layout-free (W % 8 == 0).
    if W % 8 == 0:
        wcol = lax.broadcasted_iota(jnp.int32, (H + 2, W, Cp), 1).reshape(NTH, Cp)
    else:
        wcol = lax.broadcasted_iota(jnp.int32, (NTH, Cp), 0) % W
    is_w_first = wcol == 0
    is_w_last = wcol == W - 1

    def conv3x3_reflect(t, w_ref):
        # t: (H*W, Cp) bf16 -> reflect_pad(1) + 3x3 conv -> (H*W, Cp) f32.
        # H-direction reflection pad: prepend input row 1, append input row H-2.
        # Aligned sublane row ranges (offsets are multiples of W).
        th = jnp.concatenate(
            [t[W:2 * W], t, t[(H - 2) * W:(H - 1) * W]], axis=0)   # (NTH, Cp) bf16

        # W-direction taps via XLU sublane rotation (f32 for lowering safety and
        # v5e's non-bf16 VPU). Wrap-around rows land only on the columns that the
        # reflection fix below overwrites.
        thf = th.astype(jnp.float32)
        r_m1 = pltpu.roll(thf, 1, axis=0)        # value at (h, w-1)
        r_p1 = pltpu.roll(thf, NTH - 1, axis=0)  # value at (h, w+1)
        left = jnp.where(is_w_first, r_p1, r_m1).astype(jnp.bfloat16)   # col -1 -> col 1
        right = jnp.where(is_w_last, r_m1, r_p1).astype(jnp.bfloat16)   # col W  -> col W-2

        if unfused_taps:
            # v7x-class: MRB accumulates matmuls in place, so 9 K=Cp matmuls are
            # cheap and the NTH x 3Cp concat buffer disappears (VMEM is binding).
            taps = (left, th, right)   # kw = 0, 1, 2
            acc = None
            for dh in range(3):        # kh
                w_kh = w_ref[dh]       # (3*Cp, Cp)
                rows = taps
                for kw in range(3):
                    part = lax.dot_general(
                        rows[kw][dh * W:dh * W + HW],
                        w_kh[kw * Cp:(kw + 1) * Cp],
                        dimension_numbers=(((1,), (0,)), ((), ())),
                        preferred_element_type=jnp.float32)
                    acc = part if acc is None else acc + part
            return acc  # (H*W, Cp) f32

        # v5e/v6e: fold the 3 kw taps into the contraction (K = 3*Cp; the lane
        # concat is 128-aligned) -> 3 matmuls per conv instead of 9.
        big = jnp.concatenate([left, th, right], axis=-1)    # (NTH, 3*Cp) bf16
        acc = lax.dot_general(
            big[0:HW], w_ref[0],
            dimension_numbers=(((1,), (0,)), ((), ())),
            preferred_element_type=jnp.float32)
        for dh in (1, 2):
            acc = acc + lax.dot_general(
                big[dh * W:dh * W + HW], w_ref[dh],
                dimension_numbers=(((1,), (0,)), ((), ())),
                preferred_element_type=jnp.float32)
        return acc  # (H*W, Cp) f32

    def instance_norm(y):
        # Two-pass per-channel stats over the H*W spatial rows (f32); y - mean is
        # needed for the output anyway, so this costs the same as the one-pass
        # form but avoids E[y^2] - mean^2 cancellation. Zero-padded channels stay 0.
        inv_n = jnp.float32(1.0 / HW)
        mean = jnp.sum(y, axis=0, keepdims=True) * inv_n
        yc = y - mean
        var = jnp.sum(yc * yc, axis=0, keepdims=True) * inv_n
        return yc * lax.rsqrt(var + EPS)

    y = jnp.maximum(instance_norm(conv3x3_reflect(x_ref[0], w1_ref)), 0.0)
    z = instance_norm(conv3x3_reflect(y.astype(jnp.bfloat16), w2_ref))
    # Residual straight from the bf16 input block (no persistent f32 x copy),
    # summed in f32, stored as bf16.
    o_ref[0] = (x_ref[0].astype(jnp.float32) + z).astype(o_ref.dtype)


# ---------------------------------------------------------------------------
# Wrapper (layout plumbing: NCHW <-> flattened lane-dense NHWC, weight reshape)
# ---------------------------------------------------------------------------
@jax.jit
def resnet_block(x_nchw, w1_oihw, w2_oihw):
    N, C, H, W = x_nchw.shape
    assert H >= 2 and W >= 2, "ReflectionPad2d(1) requires H, W >= 2"
    Cp = _round_up(C, LANE)
    HW = H * W
    NTH = (H + 2) * W

    # NOTE: Cp = round_up(C, 128). Production C >= 256 fully uses the MXU; for
    # genuinely small C (like the C=4 test) the zero-padded channels waste MXU
    # FLOPs and a VPU conv would win -- kept simple here.

    # NCHW -> (N, H*W, Cp), bf16, channels zero-padded to a lane multiple.
    x = jnp.transpose(x_nchw, (0, 2, 3, 1)).reshape(N, HW, C)
    x = jnp.pad(x, ((0, 0), (0, 0), (0, Cp - C))).astype(jnp.bfloat16)

    def prep_w(w_oihw):
        w = jnp.transpose(w_oihw, (2, 3, 1, 0))                        # HWIO (3,3,C,C)
        w = jnp.pad(w, ((0, 0), (0, 0), (0, Cp - C), (0, Cp - C)))     # (3,3,Cp,Cp)
        return w.reshape(3, 3 * Cp, Cp).astype(jnp.bfloat16)           # [kh][kw*Cp+ci, co]

    w1 = prep_w(w1_oihw)
    w2 = prep_w(w2_oihw)

    vmem_cap = _tpu_vmem_capacity_bytes()
    unfused_taps = vmem_cap <= (64 << 20)   # v7x-class core (64 MiB VMEM per TC)

    kernel = functools.partial(
        _resnet_block_kernel, H=H, W=W, unfused_taps=unfused_taps)

    out = pl.pallas_call(
        kernel,
        out_shape=jax.ShapeDtypeStruct((N, HW, Cp), jnp.bfloat16),
        grid_spec=pltpu.PrefetchScalarGridSpec(
            num_scalar_prefetch=0,
            grid=(N,),
            in_specs=[
                pl.BlockSpec((1, HW, Cp), lambda n: (n, 0, 0)),
                pl.BlockSpec((3, 3 * Cp, Cp), lambda n: (0, 0, 0)),
                pl.BlockSpec((3, 3 * Cp, Cp), lambda n: (0, 0, 0)),
            ],
            out_specs=pl.BlockSpec((1, HW, Cp), lambda n: (n, 0, 0)),
        ),
        compiler_params=pltpu.CompilerParams(
            dimension_semantics=("parallel",),
            vmem_limit_bytes=_vmem_limit_bytes(HW, NTH, Cp, unfused_taps, vmem_cap),
        ),
    )(x, w1, w2)

    out = out.reshape(N, H, W, Cp)[..., :C].astype(jnp.float32)
    return jnp.transpose(out, (0, 3, 1, 2))  # back to NCHW, f32


# ---------------------------------------------------------------------------
# Pure-JAX f32 reference (for correctness check)
# ---------------------------------------------------------------------------
def ref_resnet_block(x, w1, w2):
    def conv(x, w):
        xpad = jnp.pad(x, ((0, 0), (0, 0), (1, 1), (1, 1)), mode="reflect")
        return jax.lax.conv_general_dilated(
            xpad, w, window_strides=(1, 1), padding="VALID",
            dimension_numbers=("NCHW", "OIHW", "NCHW"))

    def inorm(y):
        m = jnp.mean(y, axis=(2, 3), keepdims=True)
        v = jnp.mean((y - m) ** 2, axis=(2, 3), keepdims=True)
        return (y - m) * jax.lax.rsqrt(v + EPS)

    y = jnp.maximum(inorm(conv(x, w1)), 0.0)
    z = inorm(conv(y, w2))
    return x + z


# ---------------------------------------------------------------------------
if __name__ == "__main__":
    N, C, H, W = 2, 4, 16, 16

    key = jax.random.PRNGKey(0)
    kx, k1, k2 = jax.random.split(key, 3)

    x = jax.random.normal(kx, (N, C, H, W), dtype=jnp.float32)
    # Deterministic conv weights, PyTorch OIHW layout: (dim, dim, 3, 3)
    fan_in = C * 3 * 3
    scale = 1.0 / jnp.sqrt(fan_in)
    w1 = jax.random.uniform(k1, (C, C, 3, 3), jnp.float32, -scale, scale)
    w2 = jax.random.uniform(k2, (C, C, 3, 3), jnp.float32, -scale, scale)

    out = jax.block_until_ready(resnet_block(x, w1, w2))
    ref = ref_resnet_block(x, w1, w2)

    assert out.shape == (N, C, H, W)
    max_err = float(jnp.max(jnp.abs(out - ref)))
    # bf16 MXU path + bf16 activations/output vs f32 reference -> loosened tolerance.
    assert jnp.allclose(out, ref, rtol=5e-2, atol=5e-2), (
        f"mismatch vs reference (max abs err {max_err})")

    print("KERNEL_OK")
</pallas_src>

<mosaic_0001>
module attributes {stable_mosaic.version = 11 : i64} {
  func.func @_resnet_block_kernel(%arg0: i32, %arg1: memref<1x256x128xbf16, #tpu.memory_space<vmem>>, %arg2: memref<3x384x128xbf16, #tpu.memory_space<vmem>>, %arg3: memref<3x384x128xbf16, #tpu.memory_space<vmem>>, %arg4: memref<1x256x128xbf16, #tpu.memory_space<vmem>>) attributes {dimension_semantics = [#tpu.dimension_semantics<parallel>], iteration_bounds = array<i64: 2>, scalar_prefetch = 0 : i64, scratch_operands = 0 : i64, tpu.core_type = #tpu.core_type<tc>, window_params = [{transform_indices = @transform_0, window_bounds = array<i64: 1, 256, 128>}, {pipeline_mode = #tpu.pipeline_mode<synchronous>, transform_indices = @transform_1, window_bounds = array<i64: 3, 384, 128>}, {pipeline_mode = #tpu.pipeline_mode<synchronous>, transform_indices = @transform_2, window_bounds = array<i64: 3, 384, 128>}, {transform_indices = @transform_3, window_bounds = array<i64: 1, 256, 128>}]} {
    %0 = tpu.iota {dimensions = array<i32: 1>} : vector<18x16x128xi32>
    %1 = vector.shape_cast %0 : vector<18x16x128xi32> to vector<288x128xi32>
    %c0_i32 = arith.constant 0 : i32
    %2 = vector.broadcast %c0_i32 : i32 to vector<288x128xi32>
    %3 = arith.cmpi eq, %1, %2 : vector<288x128xi32>
    %c15_i32 = arith.constant 15 : i32
    %4 = vector.broadcast %c15_i32 : i32 to vector<288x128xi32>
    %5 = arith.cmpi eq, %1, %4 : vector<288x128xi32>
    %c0 = arith.constant 0 : index
    %c0_0 = arith.constant 0 : index
    %c0_1 = arith.constant 0 : index
    %6 = vector.load %arg1[%c0, %c0_0, %c0_1] : memref<1x256x128xbf16, #tpu.memory_space<vmem>>, vector<1x256x128xbf16>
    %7 = vector.shape_cast %6 : vector<1x256x128xbf16> to vector<256x128xbf16>
    %8 = vector.extract_strided_slice %7 {offsets = [16, 0], sizes = [16, 128], strides = [1, 1]} : vector<256x128xbf16> to vector<16x128xbf16>
    %9 = vector.extract_strided_slice %7 {offsets = [224, 0], sizes = [16, 128], strides = [1, 1]} : vector<256x128xbf16> to vector<16x128xbf16>
    %10 = tpu.concatenate %8, %7, %9 in 0 : vector<16x128xbf16>, vector<256x128xbf16>, vector<16x128xbf16> -> vector<288x128xbf16>
    %11 = arith.extf %10 : vector<288x128xbf16> to vector<288x128xf32>
    %c1_i32 = arith.constant 1 : i32
    %12 = tpu.dynamic_rotate %11 by %c1_i32 dim 0 : vector<288x128xf32>, i32 -> vector<288x128xf32>
    %c287_i32 = arith.constant 287 : i32
    %13 = tpu.dynamic_rotate %11 by %c287_i32 dim 0 : vector<288x128xf32>, i32 -> vector<288x128xf32>
    %14 = arith.select %3, %13, %12 : vector<288x128xi1>, vector<288x128xf32>
    %15 = arith.truncf %14 : vector<288x128xf32> to vector<288x128xbf16>
    %16 = arith.select %5, %12, %13 : vector<288x128xi1>, vector<288x128xf32>
    %17 = arith.truncf %16 : vector<288x128xf32> to vector<288x128xbf16>
    %18 = tpu.concatenate %15, %10, %17 in 1 : vector<288x128xbf16>, vector<288x128xbf16>, vector<288x128xbf16> -> vector<288x384xbf16>
    %19 = vector.extract_strided_slice %18 {offsets = [0, 0], sizes = [256, 384], strides = [1, 1]} : vector<288x384xbf16> to vector<256x384xbf16>
    %c0_2 = arith.constant 0 : index
    %c0_3 = arith.constant 0 : index
    %c0_4 = arith.constant 0 : index
    %20 = vector.load %arg2[%c0_2, %c0_3, %c0_4] : memref<3x384x128xbf16, #tpu.memory_space<vmem>>, vector<1x384x128xbf16>
    %21 = vector.shape_cast %20 : vector<1x384x128xbf16> to vector<384x128xbf16>
    %cst = arith.constant dense<0.000000e+00> : vector<256x128xf32>
    %22 = tpu.matmul %19, %21, %cst {dimension_numbers = #tpu.dot_dimension_numbers<[1], [0], [0], [1], [0, 0, 1, 1], [], []>} : vector<256x384xbf16>, vector<384x128xbf16>, vector<256x128xf32> -> vector<256x128xf32>
    %23 = vector.extract_strided_slice %18 {offsets = [16, 0], sizes = [256, 384], strides = [1, 1]} : vector<288x384xbf16> to vector<256x384xbf16>
    %c1 = arith.constant 1 : index
    %c0_5 = arith.constant 0 : index
    %c0_6 = arith.constant 0 : index
    %24 = vector.load %arg2[%c1, %c0_5, %c0_6] : memref<3x384x128xbf16, #tpu.memory_space<vmem>>, vector<1x384x128xbf16>
    %25 = vector.shape_cast %24 : vector<1x384x128xbf16> to vector<384x128xbf16>
    %cst_7 = arith.constant dense<0.000000e+00> : vector<256x128xf32>
    %26 = tpu.matmul %23, %25, %cst_7 {dimension_numbers = #tpu.dot_dimension_numbers<[1], [0], [0], [1], [0, 0, 1, 1], [], []>} : vector<256x384xbf16>, vector<384x128xbf16>, vector<256x128xf32> -> vector<256x128xf32>
    %27 = arith.addf %22, %26 : vector<256x128xf32>
    %28 = vector.extract_strided_slice %18 {offsets = [32, 0], sizes = [256, 384], strides = [1, 1]} : vector<288x384xbf16> to vector<256x384xbf16>
    %c2 = arith.constant 2 : index
    %c0_8 = arith.constant 0 : index
    %c0_9 = arith.constant 0 : index
    %29 = vector.load %arg2[%c2, %c0_8, %c0_9] : memref<3x384x128xbf16, #tpu.memory_space<vmem>>, vector<1x384x128xbf16>
    %30 = vector.shape_cast %29 : vector<1x384x128xbf16> to vector<384x128xbf16>
    %cst_10 = arith.constant dense<0.000000e+00> : vector<256x128xf32>
    %31 = tpu.matmul %28, %30, %cst_10 {dimension_numbers = #tpu.dot_dimension_numbers<[1], [0], [0], [1], [0, 0, 1, 1], [], []>} : vector<256x384xbf16>, vector<384x128xbf16>, vector<256x128xf32> -> vector<256x128xf32>
    %32 = arith.addf %27, %31 : vector<256x128xf32>
    %cst_11 = arith.constant dense<0.000000e+00> : vector<128xf32>
    %33 = vector.multi_reduction <add>, %32, %cst_11 [0] : vector<256x128xf32> to vector<128xf32>
    %34 = vector.shape_cast %33 : vector<128xf32> to vector<1x128xf32>
    %cst_12 = arith.constant 3.906250e-03 : f32
    %35 = vector.broadcast %cst_12 : f32 to vector<1x128xf32>
    %36 = arith.mulf %34, %35 : vector<1x128xf32>
    %37 = vector.broadcast %36 : vector<1x128xf32> to vector<256x128xf32>
    %38 = arith.subf %32, %37 : vector<256x128xf32>
    %39 = arith.mulf %38, %38 : vector<256x128xf32>
    %cst_13 = arith.constant dense<0.000000e+00> : vector<128xf32>
    %40 = vector.multi_reduction <add>, %39, %cst_13 [0] : vector<256x128xf32> to vector<128xf32>
    %41 = vector.shape_cast %40 : vector<128xf32> to vector<1x128xf32>
    %cst_14 = arith.constant 3.906250e-03 : f32
    %42 = vector.broadcast %cst_14 : f32 to vector<1x128xf32>
    %43 = arith.mulf %41, %42 : vector<1x128xf32>
    %cst_15 = arith.constant 9.99999974E-6 : f32
    %44 = vector.broadcast %cst_15 : f32 to vector<1x128xf32>
    %45 = arith.addf %43, %44 : vector<1x128xf32>
    %46 = math.rsqrt %45 : vector<1x128xf32>
    %47 = vector.broadcast %46 : vector<1x128xf32> to vector<256x128xf32>
    %48 = arith.mulf %38, %47 : vector<256x128xf32>
    %cst_16 = arith.constant 0.000000e+00 : f32
    %49 = vector.broadcast %cst_16 : f32 to vector<256x128xf32>
    %50 = arith.maximumf %48, %49 : vector<256x128xf32>
    %51 = arith.truncf %50 : vector<256x128xf32> to vector<256x128xbf16>
    %52 = vector.extract_strided_slice %51 {offsets = [16, 0], sizes = [16, 128], strides = [1, 1]} : vector<256x128xbf16> to vector<16x128xbf16>
    %53 = vector.extract_strided_slice %51 {offsets = [224, 0], sizes = [16, 128], strides = [1, 1]} : vector<256x128xbf16> to vector<16x128xbf16>
    %54 = tpu.concatenate %52, %51, %53 in 0 : vector<16x128xbf16>, vector<256x128xbf16>, vector<16x128xbf16> -> vector<288x128xbf16>
    %55 = arith.extf %54 : vector<288x128xbf16> to vector<288x128xf32>
    %c1_i32_17 = arith.constant 1 : i32
    %56 = tpu.dynamic_rotate %55 by %c1_i32_17 dim 0 : vector<288x128xf32>, i32 -> vector<288x128xf32>
    %c287_i32_18 = arith.constant 287 : i32
    %57 = tpu.dynamic_rotate %55 by %c287_i32_18 dim 0 : vector<288x128xf32>, i32 -> vector<288x128xf32>
    %58 = arith.select %3, %57, %56 : vector<288x128xi1>, vector<288x128xf32>
    %59 = arith.truncf %58 : vector<288x128xf32> to vector<288x128xbf16>
    %60 = arith.select %5, %56, %57 : vector<288x128xi1>, vector<288x128xf32>
    %61 = arith.truncf %60 : vector<288x128xf32> to vector<288x128xbf16>
    %62 = tpu.concatenate %59, %54, %61 in 1 : vector<288x128xbf16>, vector<288x128xbf16>, vector<288x128xbf16> -> vector<288x384xbf16>
    %63 = vector.extract_strided_slice %62 {offsets = [0, 0], sizes = [256, 384], strides = [1, 1]} : vector<288x384xbf16> to vector<256x384xbf16>
    %c0_19 = arith.constant 0 : index
    %c0_20 = arith.constant 0 : index
    %c0_21 = arith.constant 0 : index
    %64 = vector.load %arg3[%c0_19, %c0_20, %c0_21] : memref<3x384x128xbf16, #tpu.memory_space<vmem>>, vector<1x384x128xbf16>
    %65 = vector.shape_cast %64 : vector<1x384x128xbf16> to vector<384x128xbf16>
    %cst_22 = arith.constant dense<0.000000e+00> : vector<256x128xf32>
    %66 = tpu.matmul %63, %65, %cst_22 {dimension_numbers = #tpu.dot_dimension_numbers<[1], [0], [0], [1], [0, 0, 1, 1], [], []>} : vector<256x384xbf16>, vector<384x128xbf16>, vector<256x128xf32> -> vector<256x128xf32>
    %67 = vector.extract_strided_slice %62 {offsets = [16, 0], sizes = [256, 384], strides = [1, 1]} : vector<288x384xbf16> to vector<256x384xbf16>
    %c1_23 = arith.constant 1 : index
    %c0_24 = arith.constant 0 : index
    %c0_25 = arith.constant 0 : index
    %68 = vector.load %arg3[%c1_23, %c0_24, %c0_25] : memref<3x384x128xbf16, #tpu.memory_space<vmem>>, vector<1x384x128xbf16>
    %69 = vector.shape_cast %68 : vector<1x384x128xbf16> to vector<384x128xbf16>
    %cst_26 = arith.constant dense<0.000000e+00> : vector<256x128xf32>
    %70 = tpu.matmul %67, %69, %cst_26 {dimension_numbers = #tpu.dot_dimension_numbers<[1], [0], [0], [1], [0, 0, 1, 1], [], []>} : vector<256x384xbf16>, vector<384x128xbf16>, vector<256x128xf32> -> vector<256x128xf32>
    %71 = arith.addf %66, %70 : vector<256x128xf32>
    %72 = vector.extract_strided_slice %62 {offsets = [32, 0], sizes = [256, 384], strides = [1, 1]} : vector<288x384xbf16> to vector<256x384xbf16>
    %c2_27 = arith.constant 2 : index
    %c0_28 = arith.constant 0 : index
    %c0_29 = arith.constant 0 : index
    %73 = vector.load %arg3[%c2_27, %c0_28, %c0_29] : memref<3x384x128xbf16, #tpu.memory_space<vmem>>, vector<1x384x128xbf16>
    %74 = vector.shape_cast %73 : vector<1x384x128xbf16> to vector<384x128xbf16>
    %cst_30 = arith.constant dense<0.000000e+00> : vector<256x128xf32>
    %75 = tpu.matmul %72, %74, %cst_30 {dimension_numbers = #tpu.dot_dimension_numbers<[1], [0], [0], [1], [0, 0, 1, 1], [], []>} : vector<256x384xbf16>, vector<384x128xbf16>, vector<256x128xf32> -> vector<256x128xf32>
    %76 = arith.addf %71, %75 : vector<256x128xf32>
    %cst_31 = arith.constant dense<0.000000e+00> : vector<128xf32>
    %77 = vector.multi_reduction <add>, %76, %cst_31 [0] : vector<256x128xf32> to vector<128xf32>
    %78 = vector.shape_cast %77 : vector<128xf32> to vector<1x128xf32>
    %cst_32 = arith.constant 3.906250e-03 : f32
    %79 = vector.broadcast %cst_32 : f32 to vector<1x128xf32>
    %80 = arith.mulf %78, %79 : vector<1x128xf32>
    %81 = vector.broadcast %80 : vector<1x128xf32> to vector<256x128xf32>
    %82 = arith.subf %76, %81 : vector<256x128xf32>
    %83 = arith.mulf %82, %82 : vector<256x128xf32>
    %cst_33 = arith.constant dense<0.000000e+00> : vector<128xf32>
    %84 = vector.multi_reduction <add>, %83, %cst_33 [0] : vector<256x128xf32> to vector<128xf32>
    %85 = vector.shape_cast %84 : vector<128xf32> to vector<1x128xf32>
    %cst_34 = arith.constant 3.906250e-03 : f32
    %86 = vector.broadcast %cst_34 : f32 to vector<1x128xf32>
    %87 = arith.mulf %85, %86 : vector<1x128xf32>
    %cst_35 = arith.constant 9.99999974E-6 : f32
    %88 = vector.broadcast %cst_35 : f32 to vector<1x128xf32>
    %89 = arith.addf %87, %88 : vector<1x128xf32>
    %90 = math.rsqrt %89 : vector<1x128xf32>
    %91 = vector.broadcast %90 : vector<1x128xf32> to vector<256x128xf32>
    %92 = arith.mulf %82, %91 : vector<256x128xf32>
    %c0_36 = arith.constant 0 : index
    %c0_37 = arith.constant 0 : index
    %c0_38 = arith.constant 0 : index
    %93 = vector.load %arg1[%c0_36, %c0_37, %c0_38] : memref<1x256x128xbf16, #tpu.memory_space<vmem>>, vector<1x256x128xbf16>
    %94 = vector.shape_cast %93 : vector<1x256x128xbf16> to vector<256x128xbf16>
    %95 = arith.extf %94 : vector<256x128xbf16> to vector<256x128xf32>
    %96 = arith.addf %95, %92 : vector<256x128xf32>
    %97 = arith.truncf %96 : vector<256x128xf32> to vector<256x128xbf16>
    %c0_39 = arith.constant 0 : index
    %c0_40 = arith.constant 0 : index
    %c0_41 = arith.constant 0 : index
    %98 = vector.load %arg4[%c0_39, %c0_40, %c0_41] : memref<1x256x128xbf16, #tpu.memory_space<vmem>>, vector<1x256x128xbf16>
    %99 = vector.shape_cast %98 : vector<1x256x128xbf16> to vector<256x128xbf16>
    %100 = vector.shape_cast %97 : vector<256x128xbf16> to vector<1x256x128xbf16>
    tpu.vector_store %arg4[%c0_39, %c0_40, %c0_41], %100 {strides = array<i32>} : memref<1x256x128xbf16, #tpu.memory_space<vmem>>, vector<1x256x128xbf16>,
    return
  }
  func.func @transform_0(%arg0: i32) -> (i32, i32, i32) {
    %c0_i32 = arith.constant 0 : i32
    %c0_i32_0 = arith.constant 0 : i32
    %c0_i32_1 = arith.constant 0 : i32
    return %arg0, %c0_i32, %c0_i32_0 : i32, i32, i32
  }
  func.func @transform_1(%arg0: i32) -> (i32, i32, i32) {
    %c0_i32 = arith.constant 0 : i32
    %c0_i32_0 = arith.constant 0 : i32
    %c0_i32_1 = arith.constant 0 : i32
    %c0_i32_2 = arith.constant 0 : i32
    return %c0_i32, %c0_i32_0, %c0_i32_1 : i32, i32, i32
  }
  func.func @transform_2(%arg0: i32) -> (i32, i32, i32) {
    %c0_i32 = arith.constant 0 : i32
    %c0_i32_0 = arith.constant 0 : i32
    %c0_i32_1 = arith.constant 0 : i32
    %c0_i32_2 = arith.constant 0 : i32
    return %c0_i32, %c0_i32_0, %c0_i32_1 : i32, i32, i32
  }
  func.func @transform_3(%arg0: i32) -> (i32, i32, i32) {
    %c0_i32 = arith.constant 0 : i32
    %c0_i32_0 = arith.constant 0 : i32
    %c0_i32_1 = arith.constant 0 : i32
    return %arg0, %c0_i32, %c0_i32_0 : i32, i32, i32
  }
}

</mosaic_0001>

<bundles_post_ra>
// kernel: resnet_block.1
= control target key start
LH: loop header
LB: loop body
LE: loop exit
PB: predicated region body
PF: predicated region fallthrough
CT: control target
= control target key end

     0   :  { %s6058_s12 = smov 0   ;;  %s9451_s0 = inlined_call_operand.vmem [shape: bf16[2,256,128], index: 0, kind: input, shape index: {}]   ;;  %s9452_s1 = inlined_call_operand.vmem [shape: bf16[3,384,128], index: 1, kind: input, shape index: {}]   ;;  %s9453_s2 = inlined_call_operand.vmem [shape: bf16[3,384,128], index: 2, kind: input, shape index: {}]   ;;  %s9454_s3 = inlined_call_operand.vmem [shape: bf16[2,256,128], index: 3, kind: output, shape index: {}]  }
   0x1 LB: > { %s4887_s13 = sadd.s32 4294967295, %s6036_s12   ;;  %p4891_p0 = scmp.ge.s32.totalorder %s6036_s12, 1  ;;  %s6036_s12 = sphi %s6058_s12, %s13_s12  }
   0x2   : > { %p137_p1 = scmp.lt.s32.totalorder %s6036_s12, 3 }
   0x4   : > { %p138_p2 = pnand %p4891_p0, %p137_p1 }
   0x6   : > { %141 = sbr.rel (%p138_p2) target bundleno = 1999 (0x7cf), region = 32 }
   0xb   : > { %v5779_v0 = vld [vmem:[%s9452_s1 + $0xf8] sm:$0xff]  ;;  %p161_p3 = scmp.lt.s32.totalorder %s4887_s13, 1  ;;  %v5778_v2 = vld [vmem:[%s9452_s1 + $0xf0] sm:$0xff]  ;;  %v171_v3 = vlaneseq  ;;  %v5777_v5 = vld [vmem:[%s9452_s1 + $0xe8] sm:$0xff] }
   0xc   : > { %v5787_v1 = vld [vmem:[%s9452_s1 + $0x138] sm:$0xff]  ;;  %1073 = vmatpush.bf16.msra.mxu0 %v5779_v0  ;;  %5987 = vmatpush.bf16.msra.mxu2 %v5779_v0  ;;  %v5786_v4 = vld [vmem:[%s9452_s1 + $0x130] sm:$0xff]  ;;  %v5785_v10 = vld [vmem:[%s9452_s1 + $0x128] sm:$0xff] }
   0xd   : > { %s9907_s13 = smov (!%p161_p3, %s4887_s13), 1  ;;  %1162 = vmatpush.bf16.msra.mxu1 %v5787_v1  ;;  %5995 = vmatpush.bf16.msra.mxu3 %v5787_v1  ;;  %v6091_v6 = vshrl.u32 %v171_v3, 7  ;;  %v5776_v18 = vld [vmem:[%s9452_s1 + $0xe0] sm:$0xff]  ;;  %v5775_v29 = vld [vmem:[%s9452_s1 + $0xd8] sm:$0xff]  ;;  %v5774_v37 = vld [vmem:[%s9452_s1 + $0xd0] sm:$0xff] }
   0xe   : > { %s5730_s22 = sshll.u32 %s9907_s13, 7  ;;  %v5784_v21 = vld [vmem:[%s9452_s1 + $0x120] sm:$0xff]  ;;  %v5783_v32 = vld [vmem:[%s9452_s1 + $0x118] sm:$0xff]  ;;  %v5782_v41 = vld [vmem:[%s9452_s1 + $0x110] sm:$0xff] }
   0xf   : > { %s6089_s27 = scalar_lea.vmem %s9451_s0, %s5730_s22  ;;  %9596 = vst [vmem:[#allocation2_spill] sm:$0xff] %v6091_v6  ;;  %vm370_vm0 = vcmp.lt.s32.totalorder %v6091_v6, 1  ;;  %vm437_vm1 = vcmp.lt.s32.totalorder %v6091_v6, 7  ;;  %vm174_vm2 = vcmp.eq.s32.totalorder %v6091_v6, 0  ;;  %v5773_v47 = vld [vmem:[%s9452_s1 + $0xc8] sm:$0xff]  ;;  %v5772_v56 = vld [vmem:[%s9452_s1 + $0xc0] sm:$0xff]  ;;  %s9410_s4 = scalar_lea.vmem %s9454_s3, %s5730_s22 }
  0x10   : > { %1074 = vmatpush.bf16.msra.mxu0 %v5778_v2  ;;  %5988 = vmatpush.bf16.msra.mxu2 %v5778_v2  ;;  %v6094_v7 = vld [vmem:[%s6089_s27] sm:$0xff]  ;;  %v6097_v8 = vld [vmem:[%s6089_s27 + $0x8] sm:$0xff]  ;;  %v6100_v9 = vld [vmem:[%s6089_s27 + $0x38] sm:$0xff] }
  0x11   : > { %1163 = vmatpush.bf16.msra.mxu1 %v5786_v4  ;;  %5996 = vmatpush.bf16.msra.mxu3 %v5786_v4  ;;  %v6106_v11 = vld [vmem:[%s6089_s27 + $0x40] sm:$0xff]  ;;  %v307_v12 = vunpack.c.h.bf16 %v6097_v8  ;;  %v308_v13 = vunpack.c.l.bf16 %v6094_v7  ;;  %v309_v14 = vunpack.c.h.bf16 %v6094_v7  ;;  %v9455_v15 = vunpack.c.h.bf16 %v6100_v9  ;;  %v6184_v42 = vld [vmem:[%s6089_s27 + $0x48] sm:$0xff]  ;;  %v5795_v0 = vld [vmem:[%s9452_s1 + $0x178] sm:$0xff] }
  0x12   : > { %v322_v16 = vunpack.c.l.bf16 %v6106_v11  ;;  %v323_v17 = vunpack.c.h.bf16 %v6106_v11  ;;  %v306_v48 = vunpack.c.l.bf16 %v6097_v8  ;;  %v5781_v49 = vld [vmem:[%s9452_s1 + $0x108] sm:$0xff]  ;;  %v324_v50 = vunpack.c.l.bf16 %v6184_v42  ;;  %v5780_v59 = vld [vmem:[%s9452_s1 + $0x100] sm:$0xff]  ;;  %v5755_v1 = vld [vmem:[%s9452_s1 + $0x38] sm:$0xff] }
  0x13   : > { %v6119_v19 = vrot.slane %v307_v12, 7  ;;  %v340_v20 = vrot.slane %v308_v13, 7  ;;  %v6125_v22 = vrot.slane %v308_v13, 1  ;;  %v6127_v23 = vrot.slane %v309_v14, 1 }
  0x14   : > { %1075 = vmatpush.bf16.msra.mxu0 %v5777_v5  ;;  %5989 = vmatpush.bf16.msra.mxu2 %v5777_v5  ;;  %v6131_v24 = vrot.slane %v9455_v15, 7  ;;  %v354_v25 = vrot.slane %v322_v16, 7  ;;  %v6134_v26 = vrot.slane %v322_v16, 1  ;;  %v6136_v27 = vrot.slane %v323_v17, 1  ;;  %v5794_v16 = vld [vmem:[%s9452_s1 + $0x170] sm:$0xff] }
  0x15   : > { %1164 = vmatpush.bf16.msra.mxu1 %v5785_v10  ;;  %5997 = vmatpush.bf16.msra.mxu3 %v5785_v10  ;;  %v341_v28 = vrot.slane %v309_v14, 7  ;;  %v403_v30 = vsel %vm370_vm0, %v6119_v19, %v340_v20  ;;  %v355_v31 = vrot.slane %v323_v17, 7  ;;  %v6152_v33 = vsel %vm437_vm1, %v6125_v22, %v6127_v23  ;;  %v5763_v10 = vld [vmem:[%s9452_s1 + $0x78] sm:$0xff]  ;;  %v5754_v17 = vld [vmem:[%s9452_s1 + $0x30] sm:$0xff] }
  0x16   : > { %9597 = vst [vmem:[#allocation3_spill] sm:$0xff] %v6134_v26  ;;  %v387_v34 = vsel %vm370_vm0, %v6131_v24, %v354_v25  ;;  %v6161_v35 = vsel %vm437_vm1, %v6134_v26, %v6136_v27  ;;  %v474_v38 = vsel %vm174_vm2, %v6152_v33, %v403_v30  ;;  %v325_v51 = vunpack.c.h.bf16 %v6184_v42  ;;  %v5793_v30 = vld [vmem:[%s9452_s1 + $0x168] sm:$0xff] }
  0x17   : > { %9598 = vst [vmem:[#allocation4_spill] sm:$0xff] %v6136_v27  ;;  %v6165_v36 = vsel %vm370_vm0, %v340_v20, %v341_v28  ;;  %v6175_v39 = vsel %vm370_vm0, %v354_v25, %v355_v31  ;;  %v490_v40 = vsel %vm174_vm2, %v6161_v35, %v387_v34  ;;  %v510_v43 = vpack.c.bf16 %v474_v38, %v474_v38 }
  0x18   : > { %1076 = vmatpush.bf16.msra.mxu0 %v5776_v18  ;;  %5990 = vmatpush.bf16.msra.mxu2 %v5776_v18  ;;  %9599 = vst [vmem:[#allocation5_spill] sm:$0xff] %v6161_v35  ;;  %v511_v44 = vpack.c.bf16 %v6165_v36, %v6165_v36  ;;  %v526_v45 = vpack.c.bf16 %v490_v40, %v490_v40  ;;  %v6202_v57 = vrot.slane %v306_v48, 7  ;;  %v6204_v58 = vrot.slane %v306_v48, 1 }
  0x19   : > { %1165 = vmatpush.bf16.msra.mxu1 %v5784_v21  ;;  %5998 = vmatpush.bf16.msra.mxu3 %v5784_v21  ;;  %9600 = vst [vmem:[#allocation6_spill] sm:$0xff] %v6175_v39  ;;  %v527_v46 = vpack.c.bf16 %v6175_v39, %v6175_v39  ;;  %v654_v52 = vunpack.c.l.b16 %v510_v43  ;;  %v6211_v60 = vrot.slane %v307_v12, 1  ;;  %v356_v61 = vrot.slane %v324_v50, 7 }
  0x1a   : > { %v655_v53 = vunpack.c.l.b16 %v511_v44  ;;  %v670_v54 = vunpack.c.l.b16 %v526_v45  ;;  %9601 = vst [vmem:[#allocation7_spill] sm:$0xff] %v6204_v58  ;;  %v6213_v62 = vrot.slane %v324_v50, 1  ;;  %v6215_v63 = vrot.slane %v325_v51, 1  ;;  %v5761_v45 = vld [vmem:[%s9452_s1 + $0x68] sm:$0xff] }
  0x1b   : > { %v671_v55 = vunpack.c.l.b16 %v527_v46  ;;  %v401_v4 = vsel %vm370_vm0, %v341_v28, %v6202_v57  ;;  %v357_v5 = vrot.slane %v325_v51, 7  ;;  %v6237_v12 = vsel %vm437_vm1, %v6204_v58, %v6211_v60  ;;  %v6274_v28 = vld [vmem:[%s6089_s27 + $0x10] sm:$0xff] }
  0x1c   : > { %1077 = vmatpush.bf16.msra.mxu0 %v5775_v29  ;;  %5991 = vmatpush.bf16.msra.mxu2 %v5775_v29  ;;  %9602 = vst [vmem:[#allocation8_spill] sm:$0xff] %v6213_v62  ;;  %v6223_v2 = vpack.c.b16 %v655_v53, %v654_v52  ;;  %v385_v13 = vsel %vm370_vm0, %v355_v31, %v356_v61  ;;  %v5762_v29 = vld [vmem:[%s9452_s1 + $0x70] sm:$0xff]  ;;  %v5753_v31 = vld [vmem:[%s9452_s1 + $0x28] sm:$0xff]  ;;  %v310_v40 = vunpack.c.l.bf16 %v6274_v28 }
  0x1d   : > { %1166 = vmatpush.bf16.msra.mxu1 %v5783_v32  ;;  %5999 = vmatpush.bf16.msra.mxu3 %v5783_v32  ;;  %9603 = vst [vmem:[#allocation9_spill] sm:$0xff] %v6215_v63  ;;  %v6225_v3 = vpack.c.b16 %v671_v55, %v670_v54  ;;  %v6245_v14 = vsel %vm437_vm1, %v6213_v62, %v6215_v63 }
  0x1e   : > { %9605 = vst [vmem:[#allocation11_spill] sm:$0xff] %v6245_v14  ;;  %v6259_v18 = vsel %vm370_vm0, %v6202_v57, %v6119_v19  ;;  %v476_v20 = vsel %vm174_vm2, %v6237_v12, %v401_v4  ;;  %v6268_v21 = vsel %vm370_vm0, %v356_v61, %v357_v5  ;;  %v492_v25 = vsel %vm174_vm2, %v6245_v14, %v385_v13 }
  0x1f   : > { %9604 = vst [vmem:[#allocation10_spill] sm:$0xff] %v6225_v3  ;;  %v509_v32 = vpack.c.bf16 %v6259_v18, %v6259_v18  ;;  %v512_v34 = vpack.c.bf16 %v476_v20, %v476_v20  ;;  %v529_v38 = vpack.c.bf16 %v6268_v21, %v6268_v21  ;;  %v342_v50 = vrot.slane %v310_v40, 7 }
  0x20   : > { %1078 = vmatpush.bf16.msra.mxu0 %v5774_v37  ;;  %5992 = vmatpush.bf16.msra.mxu2 %v5774_v37  ;;  %9606 = vst [vmem:[#allocation12_spill] sm:$0xff] %v6268_v21  ;;  %v528_v37 = vpack.c.bf16 %v492_v25, %v492_v25  ;;  %v6301_v51 = vrot.slane %v310_v40, 1  ;;  %v5792_v25 = vld [vmem:[%s9452_s1 + $0x160] sm:$0xff] }
  0x21   : > { %1167 = vmatpush.bf16.msra.mxu1 %v5782_v41  ;;  %6000 = vmatpush.bf16.msra.mxu3 %v5782_v41  ;;  %v311_v41 = vunpack.c.h.bf16 %v6274_v28  ;;  %v6299_v46 = vunpack.c.l.b16 %v509_v32 }
  0x22   : > { %v672_v48 = vunpack.c.l.b16 %v528_v37 }
  0x23   : > { %v6303_v52 = vrot.slane %v311_v41, 1  ;;  %v343_v61 = vrot.slane %v311_v41, 7 }
  0x24   : > { %1079 = vmatpush.bf16.msra.mxu0 %v5773_v47  ;;  %5993 = vmatpush.bf16.msra.mxu2 %v5773_v47  ;;  %v656_v47 = vunpack.c.l.b16 %v512_v34 }
  0x25   : > { %1168 = vmatpush.bf16.msra.mxu1 %v5781_v49  ;;  %6001 = vmatpush.bf16.msra.mxu3 %v5781_v49  ;;  %v673_v49 = vunpack.c.l.b16 %v529_v38  ;;  %v6321_v4 = vsel %vm437_vm1, %v6301_v51, %v6303_v52 }
  0x28   : > { %1080 = vmatpush.bf16.msra.mxu0 %v5772_v56  ;;  %5994 = vmatpush.bf16.msra.mxu2 %v5772_v56  ;;  %v6310_v56 = vpack.c.b16 %v6299_v46, %v656_v47 }
  0x29   : > { %1169 = vmatpush.bf16.msra.mxu1 %v5780_v59  ;;  %6002 = vmatpush.bf16.msra.mxu3 %v5780_v59  ;;  %v6312_v59 = vpack.c.b16 %v673_v49, %v672_v48 }
  0x2b   : > { %1081 = vmatmul.bf16.vlgmr.msra.gmra.mxu0 %v6223_v2  ;;  %1121 = vmatmul.bf16.vlgmr.msra.gmra.mxu2 %v6225_v3  ;;  %9609 = vst [vmem:[#allocation15_spill] sm:$0xff] %v6312_v59 }
  0x2c   : > { %1251 = vmatpush.bf16.msrb.mxu2 %v5795_v0  ;;  %1170 = vmatmul.bf16.vlgmr.msra.gmra.mxu1 %v6094_v7 }
  0x2d   : > { %1484 = vmatpush.bf16.msrb.mxu3 %v5755_v1  ;;  %1573 = vmatpush.bf16.msrb.mxu0 %v5763_v10  ;;  %v399_v1 = vsel %vm370_vm0, %v6119_v19, %v342_v50  ;;  %v6335_v19 = vsel %vm370_vm0, %v342_v50, %v343_v61 }
  0x2e   : > { %1210 = vmatmul.bf16.vlgmr.msra.gmra.mxu3 %v6106_v11  ;;  %v6280_v11 = vld [vmem:[%s6089_s27 + $0x50] sm:$0xff]  ;;  %v515_v32 = vpack.c.bf16 %v6335_v19, %v6335_v19 }
  0x2f   : > { %v326_v43 = vunpack.c.l.bf16 %v6280_v11  ;;  %v327_v44 = vunpack.c.h.bf16 %v6280_v11 }
  0x30   : > { %1252 = vmatpush.bf16.msrb.mxu2 %v5794_v16  ;;  %v6338_v16 = vld [vmem:[%s6089_s27 + $0x18] sm:$0xff] }
  0x31   : > { %1485 = vmatpush.bf16.msrb.mxu3 %v5754_v17  ;;  %1574 = vmatpush.bf16.msrb.mxu0 %v5762_v29  ;;  %v358_v53 = vrot.slane %v326_v43, 7  ;;  %v6305_v54 = vrot.slane %v326_v43, 1  ;;  %v6307_v55 = vrot.slane %v327_v44, 1  ;;  %v359_v0 = vrot.slane %v327_v44, 7  ;;  %v5760_v29 = vld [vmem:[%s9452_s1 + $0x60] sm:$0xff] }
  0x32   : > { %v312_v38 = vunpack.c.l.bf16 %v6338_v16  ;;  %v313_v40 = vunpack.c.h.bf16 %v6338_v16 }
  0x33   : > { %9607 = vst [vmem:[#allocation13_spill] sm:$0xff] %v6305_v54  ;;  %v383_v10 = vsel %vm370_vm0, %v357_v5, %v358_v53  ;;  %v6329_v13 = vsel %vm437_vm1, %v6305_v54, %v6307_v55  ;;  %v478_v5 = vsel %vm174_vm2, %v6321_v4, %v399_v1  ;;  %v6347_v17 = vsel %vm370_vm0, %v358_v53, %v359_v0 }
  0x34   : > { %1253 = vmatpush.bf16.msrb.mxu2 %v5793_v30  ;;  %9608 = vst [vmem:[#allocation14_spill] sm:$0xff] %v6307_v55  ;;  %v494_v20 = vsel %vm174_vm2, %v6329_v13, %v383_v10  ;;  %v6362_v30 = vld [vmem:[%s6089_s27 + $0x58] sm:$0xff]  ;;  %v531_v37 = vpack.c.bf16 %v6347_v17, %v6347_v17  ;;  %v344_v49 = vrot.slane %v312_v38, 7  ;;  %v6372_v50 = vrot.slane %v312_v38, 1  ;;  %v6407_v38 = vld [vmem:[%s6089_s27 + $0x20] sm:$0xff] }
  0x35   : > { %1486 = vmatpush.bf16.msrb.mxu3 %v5753_v31  ;;  %1575 = vmatpush.bf16.msrb.mxu0 %v5761_v45  ;;  %9610 = vst [vmem:[#allocation16_spill] sm:$0xff] %v6329_v13  ;;  %v514_v31 = vpack.c.bf16 %v478_v5, %v478_v5  ;;  %v530_v34 = vpack.c.bf16 %v494_v20, %v494_v20  ;;  %v328_v41 = vunpack.c.l.bf16 %v6362_v30  ;;  %v329_v43 = vunpack.c.h.bf16 %v6362_v30 }
  0x36   : > { %9611 = vst [vmem:[#allocation17_spill] sm:$0xff] %v6347_v17  ;;  %v659_v45 = vunpack.c.l.b16 %v515_v32  ;;  %v675_v48 = vunpack.c.l.b16 %v531_v37  ;;  %v6374_v53 = vrot.slane %v313_v40, 1 }
  0x37   : > { %v658_v44 = vunpack.c.l.b16 %v514_v31  ;;  %v674_v47 = vunpack.c.l.b16 %v530_v34  ;;  %v360_v1 = vrot.slane %v328_v41, 7  ;;  %v6376_v10 = vrot.slane %v328_v41, 1  ;;  %9616 = vst [vmem:[#allocation22_spill] sm:$0xff] %v6407_v38 }
  0x38   : > { %1254 = vmatpush.bf16.msrb.mxu2 %v5792_v25  ;;  %v6378_v5 = vrot.slane %v329_v43, 1  ;;  %v397_v31 = vsel %vm370_vm0, %v343_v61, %v344_v49  ;;  %v6390_v32 = vsel %vm437_vm1, %v6372_v50, %v6374_v53 }
  0x39   : > { %1576 = vmatpush.bf16.msrb.mxu0 %v5760_v29  ;;  %9612 = vst [vmem:[#allocation18_spill] sm:$0xff] %v6376_v10  ;;  %v6380_v20 = vpack.c.b16 %v659_v45, %v658_v44  ;;  %v6382_v25 = vpack.c.b16 %v675_v48, %v674_v47  ;;  %v361_v29 = vrot.slane %v329_v43, 7  ;;  %v381_v34 = vsel %vm370_vm0, %v359_v0, %v360_v1  ;;  %v5791_v43 = vld [vmem:[%s9452_s1 + $0x158] sm:$0xff]  ;;  %v6431_v45 = vld [vmem:[%s6089_s27 + $0x60] sm:$0xff] }
  0x3a   : > { %9613 = vst [vmem:[#allocation19_spill] sm:$0xff] %v6378_v5  ;;  %v6398_v37 = vsel %vm437_vm1, %v6376_v10, %v6378_v5  ;;  %v480_v0 = vsel %vm174_vm2, %v6390_v32, %v397_v31  ;;  %v5759_v44 = vld [vmem:[%s9452_s1 + $0x58] sm:$0xff]  ;;  %v314_v31 = vunpack.c.l.bf16 %v6407_v38  ;;  %v330_v15 = vunpack.c.l.bf16 %v6431_v45 }
  0x3b   : > { %1086 = vmatmul.bf16.gmra.mxu0 %v6310_v56  ;;  %1126 = vmatmul.bf16.gmra.mxu2 %v6312_v59  ;;  %9614 = vst [vmem:[#allocation20_spill] sm:$0xff] %v6382_v25  ;;  %v496_v41 = vsel %vm174_vm2, %v6398_v37, %v381_v34  ;;  %v516_v47 = vpack.c.bf16 %v480_v0, %v480_v0  ;;  %v315_v34 = vunpack.c.h.bf16 %v6407_v38 }
  0x3c   : > { %1175 = vmatmul.bf16.gmra.mxu1 %v6097_v8  ;;  %9615 = vst [vmem:[#allocation21_spill] sm:$0xff] %v6398_v37  ;;  %1255 = vmatpush.bf16.msrb.mxu2 %v5791_v43  ;;  %v346_v59 = vrot.slane %v314_v31, 7  ;;  %v6441_v5 = vrot.slane %v314_v31, 1 }
  0x3d   : > { %1577 = vmatpush.bf16.msrb.mxu0 %v5759_v44  ;;  %v660_v37 = vunpack.c.l.b16 %v516_v47  ;;  %v6445_v44 = vrot.slane %v330_v15, 1  ;;  %v347_v55 = vrot.slane %v315_v34, 7 }
  0x3e   : > { %1215 = vmatmul.bf16.gmra.mxu3 %v6184_v42  ;;  %v5752_v42 = vld [vmem:[%s9452_s1 + $0x20] sm:$0xff] }
  0x3f   : > { %1487 = vmatpush.bf16.msrb.mxu3 %v5752_v42  ;;  %v345_v42 = vrot.slane %v313_v40, 7  ;;  %v6416_v40 = vsel %vm370_vm0, %v360_v1, %v361_v29  ;;  %9618 = vst [vmem:[#allocation24_spill] sm:$0xff] %v6445_v44 }
  0x40   : > { %9617 = vst [vmem:[#allocation23_spill] sm:$0xff] %v6416_v40  ;;  %v533_v1 = vpack.c.bf16 %v6416_v40, %v6416_v40  ;;  %v362_v40 = vrot.slane %v330_v15, 7 }
  0x41   : > { %v6404_v61 = vsel %vm370_vm0, %v344_v49, %v345_v42  ;;  %v532_v49 = vpack.c.bf16 %v496_v41, %v496_v41  ;;  %v6443_v41 = vrot.slane %v315_v34, 1  ;;  %v5758_v34 = vld [vmem:[%s9452_s1 + $0x50] sm:$0xff] }
  0x42   : > { %v517_v48 = vpack.c.bf16 %v6404_v61, %v6404_v61  ;;  %v677_v0 = vunpack.c.l.b16 %v533_v1  ;;  %v379_v15 = vsel %vm370_vm0, %v361_v29, %v362_v40  ;;  %1578 = vmatpush.bf16.msrb.mxu0 %v5758_v34 }
  0x44   : > { %v661_v43 = vunpack.c.l.b16 %v517_v48  ;;  %v395_v48 = vsel %vm370_vm0, %v345_v42, %v346_v59  ;;  %v6476_v42 = vld [vmem:[%s6089_s27 + $0x28] sm:$0xff] }
  0x45   : > { %9622 = vst [vmem:[#allocation28_spill] sm:$0xff] %v6476_v42 }
  0x46   : > { %v6449_v17 = vpack.c.b16 %v661_v43, %v660_v37  ;;  %v6500_v43 = vld [vmem:[%s6089_s27 + $0x68] sm:$0xff] }
  0x4b   : > { %1091 = vmatmul.bf16.gmra.mxu0 %v6380_v20  ;;  %1131 = vmatmul.bf16.gmra.mxu2 %v6382_v25  ;;  %v331_v25 = vunpack.c.h.bf16 %v6431_v45 }
  0x4c   : > { %1180 = vmatmul.bf16.gmra.mxu1 %v6274_v28 }
  0x4d   : > { %v6447_v13 = vrot.slane %v331_v25, 1  ;;  %v363_v47 = vrot.slane %v331_v25, 7  ;;  %v6473_v25 = vsel %vm370_vm0, %v346_v59, %v347_v55  ;;  %v5790_v59 = vld [vmem:[%s9452_s1 + $0x150] sm:$0xff] }
  0x4e   : > { %1220 = vmatmul.bf16.gmra.mxu3 %v6280_v11  ;;  %v5751_v11 = vld [vmem:[%s9452_s1 + $0x18] sm:$0xff]  ;;  %1256 = vmatpush.bf16.msrb.mxu2 %v5790_v59 }
  0x4f   : > { %1488 = vmatpush.bf16.msrb.mxu3 %v5751_v11  ;;  %v676_v11 = vunpack.c.l.b16 %v532_v49  ;;  %9619 = vst [vmem:[#allocation25_spill] sm:$0xff] %v6447_v13  ;;  %v6459_v49 = vsel %vm437_vm1, %v6441_v5, %v6443_v41  ;;  %v6467_v37 = vsel %vm437_vm1, %v6445_v44, %v6447_v13  ;;  %v6485_v1 = vsel %vm370_vm0, %v362_v40, %v363_v47 }
  0x50   : > { %9621 = vst [vmem:[#allocation27_spill] sm:$0xff] %v6467_v37  ;;  %v482_v29 = vsel %vm174_vm2, %v6459_v49, %v395_v48  ;;  %v498_v31 = vsel %vm174_vm2, %v6467_v37, %v379_v15  ;;  %v535_v48 = vpack.c.bf16 %v6485_v1, %v6485_v1  ;;  %v316_v15 = vunpack.c.l.bf16 %v6476_v42 }
  0x51   : > { %v6451_v3 = vpack.c.b16 %v677_v0, %v676_v11  ;;  %9623 = vst [vmem:[#allocation29_spill] sm:$0xff] %v6485_v1  ;;  %v518_v40 = vpack.c.bf16 %v482_v29, %v482_v29  ;;  %v519_v11 = vpack.c.bf16 %v6473_v25, %v6473_v25  ;;  %v534_v0 = vpack.c.bf16 %v498_v31, %v498_v31 }
  0x52   : > { %v332_v37 = vunpack.c.l.bf16 %v6500_v43  ;;  %v333_v13 = vunpack.c.h.bf16 %v6500_v43  ;;  %v679_v29 = vunpack.c.l.b16 %v535_v48  ;;  %v348_v10 = vrot.slane %v316_v15, 7 }
  0x53   : > { %9620 = vst [vmem:[#allocation26_spill] sm:$0xff] %v6451_v3  ;;  %v662_v44 = vunpack.c.l.b16 %v518_v40  ;;  %v663_v59 = vunpack.c.l.b16 %v519_v11  ;;  %v6510_v14 = vrot.slane %v316_v15, 1  ;;  %v5757_v15 = vld [vmem:[%s9452_s1 + $0x48] sm:$0xff] }
  0x54   : > { %v364_v1 = vrot.slane %v332_v37, 7  ;;  %v6514_v34 = vrot.slane %v332_v37, 1  ;;  %v6516_v21 = vrot.slane %v333_v13, 1  ;;  %v365_v40 = vrot.slane %v333_v13, 7  ;;  %1579 = vmatpush.bf16.msrb.mxu0 %v5757_v15 }
  0x55   : > { %v6518_v63 = vpack.c.b16 %v663_v59, %v662_v44  ;;  %v393_v11 = vsel %vm370_vm0, %v347_v55, %v348_v10  ;;  %v6545_v55 = vld [vmem:[%s6089_s27 + $0x30] sm:$0xff] }
  0x56   : > { %9624 = vst [vmem:[#allocation30_spill] sm:$0xff] %v6514_v34  ;;  %v377_v37 = vsel %vm370_vm0, %v363_v47, %v364_v1  ;;  %v6536_v44 = vsel %vm437_vm1, %v6514_v34, %v6516_v21  ;;  %v6554_v47 = vsel %vm370_vm0, %v364_v1, %v365_v40  ;;  %v6569_v59 = vld [vmem:[%s6089_s27 + $0x70] sm:$0xff]  ;;  %v5771_v1 = vld [vmem:[%s9452_s1 + $0xb8] sm:$0xff] }
  0x57   : > { %9625 = vst [vmem:[#allocation31_spill] sm:$0xff] %v6516_v21  ;;  %v500_v48 = vsel %vm174_vm2, %v6536_v44, %v377_v37  ;;  %v537_v37 = vpack.c.bf16 %v6554_v47, %v6554_v47  ;;  %1662 = vmatpush.bf16.msrb.mxu1 %v5771_v1  ;;  %v334_v21 = vunpack.c.l.bf16 %v6569_v59  ;;  %v335_v34 = vunpack.c.h.bf16 %v6569_v59 }
  0x58   : > { %9626 = vst [vmem:[#allocation32_spill] sm:$0xff] %v6518_v63 }
  0x59   : > { %9628 = vst [vmem:[#allocation34_spill] sm:$0xff] %v6536_v44  ;;  %v319_v44 = vunpack.c.h.bf16 %v6545_v55  ;;  %v6588_v15 = vrot.slane %v334_v21, 1  ;;  %v6590_v1 = vrot.slane %v335_v34, 1 }
  0x5a   : > { %9629 = vst [vmem:[#allocation35_spill] sm:$0xff] %v6554_v47  ;;  %v6586_v47 = vrot.slane %v334_v21, 7 }
  0x5b   : > { %1096 = vmatmul.bf16.gmra.mxu0 %v6449_v17  ;;  %1136 = vmatmul.bf16.gmra.mxu2 %v6451_v3  ;;  %v317_v3 = vunpack.c.h.bf16 %v6476_v42  ;;  %9631 = vst [vmem:[#allocation37_spill] sm:$0xff] %v6588_v15 }
  0x5c   : > { %1185 = vmatmul.bf16.gmra.mxu1 %v6338_v16  ;;  %9630 = vst [vmem:[#allocation36_spill] sm:$0xff] %v6586_v47 }
  0x5d   : > { %v6512_v31 = vrot.slane %v317_v3, 1  ;;  %v349_v35 = vrot.slane %v317_v3, 7  ;;  %9632 = vst [vmem:[#allocation38_spill] sm:$0xff] %v6590_v1 }
  0x5e   : > { %1225 = vmatmul.bf16.gmra.mxu3 %v6362_v30  ;;  %v5750_v30 = vld [vmem:[%s9452_s1 + $0x10] sm:$0xff] }
  0x5f   : > { %1489 = vmatpush.bf16.msrb.mxu3 %v5750_v30  ;;  %v678_v30 = vunpack.c.l.b16 %v534_v0  ;;  %v6528_v0 = vsel %vm437_vm1, %v6510_v14, %v6512_v31  ;;  %v6542_v3 = vsel %vm370_vm0, %v348_v10, %v349_v35  ;;  %v5789_v10 = vld [vmem:[%s9452_s1 + $0x148] sm:$0xff] }
  0x60   : > { %v484_v13 = vsel %vm174_vm2, %v6528_v0, %v393_v11  ;;  %1257 = vmatpush.bf16.msrb.mxu2 %v5789_v10  ;;  %v536_v11 = vpack.c.bf16 %v500_v48, %v500_v48  ;;  %v681_v10 = vunpack.c.l.b16 %v537_v37  ;;  %v6584_v48 = vrot.slane %v319_v44, 1  ;;  %v5769_v37 = vld [vmem:[%s9452_s1 + $0xa8] sm:$0xff] }
  0x61   : > { %v6520_v54 = vpack.c.b16 %v679_v29, %v678_v30  ;;  %v521_v30 = vpack.c.bf16 %v6542_v3, %v6542_v3  ;;  %v520_v29 = vpack.c.bf16 %v484_v13, %v484_v13 }
  0x62   : > { %v680_v62 = vunpack.c.l.b16 %v536_v11  ;;  %v6645_v11 = vld [vmem:[%s6089_s27 + $0x78] sm:$0xff] }
  0x63   : > { %9627 = vst [vmem:[#allocation33_spill] sm:$0xff] %v6520_v54  ;;  %v664_v39 = vunpack.c.l.b16 %v520_v29  ;;  %v665_v27 = vunpack.c.l.b16 %v521_v30  ;;  %v6596_v29 = vrot.slane %v335_v34, 7 }
  0x65   : > { %v6592_v26 = vpack.c.b16 %v665_v27, %v664_v39  ;;  %v375_v27 = vsel %vm370_vm0, %v365_v40, %v6586_v47  ;;  %v6613_v39 = vsel %vm437_vm1, %v6588_v15, %v6590_v1  ;;  %v6633_v34 = vsel %vm370_vm0, %v6586_v47, %v6596_v29 }
  0x66   : > { %9636 = vst [vmem:[#allocation42_spill] sm:$0xff] %v6613_v39  ;;  %v502_v40 = vsel %vm174_vm2, %v6613_v39, %v375_v27  ;;  %v539_v47 = vpack.c.bf16 %v6633_v34, %v6633_v34  ;;  %v337_v39 = vunpack.c.h.bf16 %v6645_v11 }
  0x67   : > { %9633 = vst [vmem:[#allocation39_spill] sm:$0xff] %v6592_v26  ;;  %v538_v27 = vpack.c.bf16 %v502_v40, %v502_v40 }
  0x68   : > { %9638 = vst [vmem:[#allocation44_spill] sm:$0xff] %v6633_v34  ;;  %v6663_v15 = vunpack.c.l.b16 %v539_v47  ;;  %v9640_v34 = vunpack.c.h.bf16 %v6100_v9  ;;  %v5767_v47 = vld [vmem:[%s9452_s1 + $0x98] sm:$0xff] }
  0x69   : > { %v682_v1 = vunpack.c.l.b16 %v538_v27 }
  0x6a   : > { %9639 = vst [vmem:[#allocation45_spill] sm:$0xff] %v6663_v15 }
  0x6b   : > { %1101 = vmatmul.bf16.gmra.mxu0 %v6518_v63  ;;  %1141 = vmatmul.bf16.gmra.mxu2 %v6520_v54  ;;  %v318_v54 = vunpack.c.l.bf16 %v6545_v55  ;;  %v6594_v63 = vpack.c.b16 %v681_v10, %v680_v62  ;;  %v5770_v62 = vld [vmem:[%s9452_s1 + $0xb0] sm:$0xff]  ;;  %v5756_v10 = vld [vmem:[%s9452_s1 + $0x40] sm:$0xff] }
  0x6c   : > { %1190 = vmatmul.bf16.gmra.mxu1 %v6407_v38  ;;  %v351_v38 = vrot.slane %v319_v44, 7  ;;  %v5788_v44 = vld [vmem:[%s9452_s1 + $0x140] sm:$0xff]  ;;  %1580 = vmatpush.bf16.msrb.mxu0 %v5756_v10  ;;  %v6667_v10 = vrot.slane %v9640_v34, 1 }
  0x6d   : > { %v6582_v13 = vrot.slane %v318_v54, 1  ;;  %9634 = vst [vmem:[#allocation40_spill] sm:$0xff] %v6594_v63  ;;  %1663 = vmatpush.bf16.msrb.mxu1 %v5770_v62  ;;  %1258 = vmatpush.bf16.msrb.mxu2 %v5788_v44  ;;  %v320_v62 = vunpack.c.l.bf16 %v6100_v9  ;;  %v5768_v44 = vld [vmem:[%s9452_s1 + $0xa0] sm:$0xff] }
  0x6e   : > { %1230 = vmatmul.bf16.gmra.mxu3 %v6431_v45  ;;  %v5749_v45 = vld [vmem:[%s9452_s1 + $0x8] sm:$0xff] }
  0x6f   : > { %1490 = vmatpush.bf16.msrb.mxu3 %v5749_v45  ;;  %v350_v45 = vrot.slane %v318_v54, 7  ;;  %v6604_v30 = vsel %vm437_vm1, %v6582_v13, %v6584_v48  ;;  %v352_v40 = vrot.slane %v320_v62, 7 }
  0x70   : > { %9635 = vst [vmem:[#allocation41_spill] sm:$0xff] %v6604_v30 }
  0x71   : > { %v391_v54 = vsel %vm370_vm0, %v349_v35, %v350_v45  ;;  %v6619_v35 = vsel %vm370_vm0, %v350_v45, %v351_v38  ;;  %1664 = vmatpush.bf16.msrb.mxu1 %v5769_v37  ;;  %v6673_v37 = vrot.slane %v337_v39, 1  ;;  %v389_v34 = vsel %vm370_vm0, %v351_v38, %v352_v40 }
  0x72   : > { %9637 = vst [vmem:[#allocation43_spill] sm:$0xff] %v6619_v35  ;;  %v486_v21 = vsel %vm174_vm2, %v6604_v30, %v391_v54  ;;  %v523_v54 = vpack.c.bf16 %v6619_v35, %v6619_v35  ;;  %v6707_v38 = vsel %vm370_vm0, %v352_v40, %v6131_v24 }
  0x73   : > { %v522_v45 = vpack.c.bf16 %v486_v21, %v486_v21 }
  0x75   : > { %v666_v21 = vunpack.c.l.b16 %v522_v45  ;;  %1665 = vmatpush.bf16.msrb.mxu1 %v5768_v44  ;;  %v6678_v45 = vpack.c.b16 %v6663_v15, %v682_v1  ;;  %v6745_v15 = vadd.s32 8, %v6091_v6 }
  0x77   : > { %9642 = vst [vmem:[#allocation47_spill] sm:$0xff] %v6678_v45  ;;  %vm177_vm3 = vcmp.eq.s32.totalorder %v6745_v15, 15 }
  0x78   : > { %9644 = vst [vmem:[#allocation49_spill] sm:$0xff] %v6745_v15 }
  0x79   : > { %1666 = vmatpush.bf16.msrb.mxu1 %v5767_v47 }
  0x7b   : > { %1106 = vmatmul.bf16.gmra.mxu0 %v6592_v26  ;;  %1146 = vmatmul.bf16.gmra.mxu2 %v6594_v63  ;;  %v336_v63 = vunpack.c.l.bf16 %v6645_v11  ;;  %v6669_v26 = vrot.slane %v320_v62, 1 }
  0x7c   : > { %1195 = vmatmul.bf16.gmra.mxu1 %v6476_v42 }
  0x7d   : > { %v368_v42 = vrot.slane %v336_v63, 7  ;;  %v6671_v30 = vrot.slane %v336_v63, 1  ;;  %v6691_v63 = vsel %vm437_vm1, %v6669_v26, %v6667_v10 }
  0x7e   : > { %1235 = vmatmul.bf16.gmra.mxu3 %v6500_v43  ;;  %v5748_v43 = vld [vmem:[%s9452_s1] sm:$0xff]  ;;  %v488_v62 = vsel %vm174_vm2, %v6691_v63, %v389_v34  ;;  %v5765_v34 = vld [vmem:[%s9452_s1 + $0x88] sm:$0xff] }
  0x7f   : > { %1491 = vmatpush.bf16.msrb.mxu3 %v5748_v43  ;;  %v667_v43 = vunpack.c.l.b16 %v523_v54  ;;  %v6683_v54 = vrot.slane %v337_v39, 7  ;;  %v374_v1 = vsel %vm370_vm0, %v6596_v29, %v368_v42  ;;  %v6700_v27 = vsel %vm437_vm1, %v6671_v30, %v6673_v37  ;;  %v5766_v39 = vld [vmem:[%s9452_s1 + $0x90] sm:$0xff] }
  0x80   : > { %v504_v24 = vsel %vm174_vm2, %v6700_v27, %v374_v1  ;;  %1667 = vmatpush.bf16.msrb.mxu1 %v5766_v39  ;;  %v5819_v1 = vld [vmem:[%s9452_s1 + $0x238] sm:$0xff]  ;;  %v5764_v39 = vld [vmem:[%s9452_s1 + $0x80] sm:$0xff] }
  0x81   : > { %v6675_v35 = vpack.c.b16 %v667_v43, %v666_v21  ;;  %9643 = vst [vmem:[#allocation48_spill] sm:$0xff] %v6683_v54  ;;  %v6720_v44 = vsel %vm370_vm0, %v368_v42, %v6683_v54  ;;  %v5803_v21 = vld [vmem:[%s9452_s1 + $0x1b8] sm:$0xff]  ;;  %v524_v43 = vpack.c.bf16 %v488_v62, %v488_v62  ;;  %v525_v42 = vpack.c.bf16 %v6707_v38, %v6707_v38 }
  0x82   : > { %1944 = vmatpush.bf16.msra.mxu2 %v5803_v21  ;;  %v540_v40 = vpack.c.bf16 %v504_v24, %v504_v24  ;;  %v541_v47 = vpack.c.bf16 %v6720_v44, %v6720_v44  ;;  %2122 = vmatpush.bf16.msra.mxu0 %v5819_v1 }
  0x83   : > { %9641 = vst [vmem:[#allocation46_spill] sm:$0xff] %v6675_v35  ;;  %v668_v62 = vunpack.c.l.b16 %v524_v43  ;;  %v669_v21 = vunpack.c.l.b16 %v525_v42  ;;  %v404_v43 = vsel %vm370_vm0, %v6596_v29, %v6202_v57  ;;  %v470_v42 = vsel %vm437_vm1, %v6211_v60, %v6125_v22 }
  0x84   : > { %1668 = vmatpush.bf16.msrb.mxu1 %v5765_v34  ;;  %v685_v24 = vunpack.c.l.b16 %v541_v47  ;;  %v472_v57 = vsel %vm174_vm2, %v6237_v12, %v404_v43  ;;  %v545_v22 = vsel %vm177_vm3, %v6259_v18, %v470_v42  ;;  %v582_v29 = vpack.c.bf16 %v6152_v33, %v6152_v33 }
  0x85   : > { %v6747_v54 = vpack.c.b16 %v669_v21, %v668_v62  ;;  %v508_v47 = vpack.c.bf16 %v472_v57, %v472_v57  ;;  %v466_v33 = vsel %vm437_vm1, %v6211_v60, %v6301_v51  ;;  %v5810_v57 = vld [vmem:[%s9452_s1 + $0x1f0] sm:$0xff] }
  0x86   : > { %v762_v1 = vunpack.c.l.b16 %v582_v29 }
  0x87   : > { %9645 = vst [vmem:[#allocation50_spill] sm:$0xff] %v6747_v54 }
  0x88   : > { %1669 = vmatpush.bf16.msrb.mxu1 %v5764_v39 }
  0x8b   : > { %1111 = vmatmul.bf16.gmra.mxu0 %v6675_v35  ;;  %1151 = vmatmul.bf16.gmra.mxu2 %v6678_v45  ;;  %v468_v45 = vsel %vm437_vm1, %v6127_v23, %v6204_v58 }
  0x8c   : > { %1200 = vmatmul.bf16.gmra.mxu1 %v6545_v55  ;;  %v547_v23 = vsel %vm177_vm3, %v6165_v36, %v468_v45  ;;  %v652_v36 = vunpack.c.l.b16 %v508_v47 }
  0x8e   : > { %1240 = vmatmul.bf16.gmra.mxu3 %v6569_v59  ;;  %v5811_v59 = vld [vmem:[%s9452_s1 + $0x1f8] sm:$0xff] }
  0x8f   : > { %2033 = vmatpush.bf16.msra.mxu3 %v5811_v59  ;;  %v684_v59 = vunpack.c.l.b16 %v540_v40  ;;  %v583_v40 = vpack.c.bf16 %v547_v23, %v547_v23 }
  0x91   : > { %v6749_v34 = vpack.c.b16 %v685_v24, %v684_v59  ;;  %v763_v39 = vunpack.c.l.b16 %v583_v40  ;;  %v688_v24 = vpack.c.b16 %v6299_v46, %v652_v36  ;;  %v5802_v46 = vld [vmem:[%s9452_s1 + $0x1b0] sm:$0xff] }
  0x92   : > { %1945 = vmatpush.bf16.msra.mxu2 %v5802_v46  ;;  %v586_v46 = vpack.c.bf16 %v6321_v4, %v6321_v4  ;;  %v462_v4 = vsel %vm437_vm1, %v6374_v53, %v6441_v5  ;;  %v5809_v53 = vld [vmem:[%s9452_s1 + $0x1e8] sm:$0xff] }
  0x93   : > { %9646 = vst [vmem:[#allocation51_spill] sm:$0xff] %v6749_v34  ;;  %v797_v21 = vpack.c.b16 %v763_v39, %v762_v1  ;;  %2034 = vmatpush.bf16.msra.mxu3 %v5810_v57 }
  0x97   : > { %2035 = vmatpush.bf16.msra.mxu3 %v5809_v53 }
  0x9b   : > { %1116 = vmatmul.bf16.gmra.mxu0 %v6747_v54  ;;  %1156 = vmatmul.bf16.gmra.mxu2 %v6749_v34 }
  0x9c   : > { %1205 = vmatmul.bf16.gmra.mxu1 %v6100_v9  ;;  %v580_v9 = vpack.c.bf16 %v6237_v12, %v6237_v12  ;;  %v549_v12 = vsel %vm177_vm3, %v6259_v18, %v466_v33  ;;  %v5818_v18 = vld [vmem:[%s9452_s1 + $0x230] sm:$0xff] }
  0x9d   : > { %2123 = vmatpush.bf16.msra.mxu0 %v5818_v18 }
  0x9e   : > { %1245 = vmatmul.bf16.gmra.mxu3 %v6645_v11  ;;  %v581_v11 = vpack.c.bf16 %v545_v22, %v545_v22  ;;  %v760_v45 = vunpack.c.l.b16 %v580_v9  ;;  %v585_v22 = vpack.c.bf16 %v549_v12, %v549_v12 }
  0xa0   : > { %v761_v62 = vunpack.c.l.b16 %v581_v11  ;;  %v765_v11 = vunpack.c.l.b16 %v585_v22 }
  0xa2   : > { %v796_v43 = vpack.c.b16 %v761_v62, %v760_v45  ;;  %v6805_v36 = vpack.c.b16 %v765_v11, %v760_v45 }
  0xa8   : > { %v1082_v59 = vpop.f32.mrf.mxu0 }
  0xa9   : > { %v1171_v42 = vpop.f32.mrf.mxu1 }
  0xaa   : > { %v6786_v23 = vadd.f32 %v1171_v42, %v1082_v59 }
  0xab   : > { %1259 = vmatmul.bf16.vlgmr.msrb.gmra.mxu2 %v797_v21  ;;  %1581 = vmatmul.bf16.vlgmr.msrb.gmra.mxu0 %v6097_v8 }
  0xac   : > { %1670 = vmatmul.bf16.vlgmr.msrb.gmra.mxu1 %v796_v43  ;;  %v464_v43 = vsel %vm437_vm1, %v6303_v52, %v6372_v50 }
  0xad   : > { %v551_v45 = vsel %vm177_vm3, %v6335_v19, %v464_v43 }
  0xae   : > { %1492 = vmatmul.bf16.vlgmr.msrb.gmra.mxu3 %v688_v24  ;;  %v1122_v60 = vpop.f32.mrf.mxu2  ;;  %v587_v57 = vpack.c.bf16 %v551_v45, %v551_v45 }
  0xb0   : > { %v1084_v40 = vpop.f32.mrf.mxu0  ;;  %v767_v22 = vunpack.c.l.b16 %v587_v57 }
  0xb1   : > { %v1211_v51 = vpop.f32.mrf.mxu3  ;;  %v1173_v47 = vpop.f32.mrf.mxu1 }
  0xb2   : > { %v6798_v29 = vadd.f32 %v1211_v51, %v1122_v60  ;;  %v6800_v9 = vadd.f32 %v1173_v47, %v1084_v40 }
  0xb6   : > { %v1124_v1 = vpop.f32.mrf.mxu2 }
  0xb8   : > { %v1087_v59 = vpop.f32.mrf.mxu0 }
  0xb9   : > { %v1213_v39 = vpop.f32.mrf.mxu3  ;;  %v1176_v24 = vpop.f32.mrf.mxu1 }
  0xba   : > { %v6807_v62 = vadd.f32 %v1213_v39, %v1124_v1  ;;  %v6813_v42 = vadd.f32 %v1176_v24, %v1087_v59  ;;  %v553_v1 = vsel %vm177_vm3, %v6404_v61, %v462_v4  ;;  %v5801_v39 = vld [vmem:[%s9452_s1 + $0x1a8] sm:$0xff]  ;;  %v588_v59 = vpack.c.bf16 %v6390_v32, %v6390_v32 }
  0xbb   : > { %1264 = vmatmul.bf16.gmra.mxu2 %v6805_v36  ;;  %1586 = vmatmul.bf16.gmra.mxu0 %v6094_v7  ;;  %v766_v7 = vunpack.c.l.b16 %v586_v46  ;;  %v589_v24 = vpack.c.bf16 %v553_v1, %v553_v1 }
  0xbc   : > { %1675 = vmatmul.bf16.gmra.mxu1 %v797_v21  ;;  %1946 = vmatpush.bf16.msra.mxu2 %v5801_v39  ;;  %v768_v46 = vunpack.c.l.b16 %v588_v59  ;;  %v590_v39 = vpack.c.bf16 %v6459_v49, %v6459_v49  ;;  %v458_v49 = vsel %vm437_vm1, %v6512_v31, %v6582_v13  ;;  %v5808_v31 = vld [vmem:[%s9452_s1 + $0x1e0] sm:$0xff] }
  0xbd   : > { %v6827_v40 = vpack.c.b16 %v767_v22, %v766_v7  ;;  %v769_v57 = vunpack.c.l.b16 %v589_v24  ;;  %2036 = vmatpush.bf16.msra.mxu3 %v5808_v31 }
  0xbe   : > { %1497 = vmatmul.bf16.gmra.mxu3 %v6223_v2  ;;  %v1127_v33 = vpop.f32.mrf.mxu2 }
  0xbf   : > { %v6859_v7 = vpack.c.b16 %v769_v57, %v768_v46 }
  0xc0   : > { %v1089_v50 = vpop.f32.mrf.mxu0 }
  0xc1   : > { %v1216_v12 = vpop.f32.mrf.mxu3  ;;  %v1178_v60 = vpop.f32.mrf.mxu1 }
  0xc2   : > { %v6823_v52 = vadd.f32 %v1216_v12, %v1127_v33  ;;  %v6825_v51 = vadd.f32 %v1178_v60, %v1089_v50  ;;  %v5817_v12 = vld [vmem:[%s9452_s1 + $0x228] sm:$0xff] }
  0xc3   : > { %2124 = vmatpush.bf16.msra.mxu0 %v5817_v12 }
  0xc6   : > { %v1129_v2 = vpop.f32.mrf.mxu2 }
  0xc8   : > { %v1092_v19 = vpop.f32.mrf.mxu0 }
  0xc9   : > { %v1218_v21 = vpop.f32.mrf.mxu3  ;;  %v1181_v18 = vpop.f32.mrf.mxu1 }
  0xca   : > { %v6829_v47 = vadd.f32 %v1218_v21, %v1129_v2  ;;  %v6835_v11 = vadd.f32 %v1181_v18, %v1092_v19  ;;  %v460_v21 = vsel %vm437_vm1, %v6443_v41, %v6510_v14 }
  0xcb   : > { %1269 = vmatmul.bf16.gmra.mxu2 %v6827_v40  ;;  %1591 = vmatmul.bf16.gmra.mxu0 %v6097_v8  ;;  %v555_v18 = vsel %vm177_vm3, %v6473_v25, %v460_v21 }
  0xcc   : > { %1680 = vmatmul.bf16.gmra.mxu1 %v6805_v36  ;;  %v591_v14 = vpack.c.bf16 %v555_v18, %v555_v18 }
  0xce   : > { %1502 = vmatmul.bf16.gmra.mxu3 %v6310_v56  ;;  %v1132_v5 = vpop.f32.mrf.mxu2  ;;  %v771_v59 = vunpack.c.l.b16 %v591_v14 }
  0xd0   : > { %v1094_v45 = vpop.f32.mrf.mxu0 }
  0xd1   : > { %v1221_v8 = vpop.f32.mrf.mxu3  ;;  %v1183_v61 = vpop.f32.mrf.mxu1 }
  0xd2   : > { %v6852_v43 = vadd.f32 %v1221_v8, %v1132_v5  ;;  %v6854_v33 = vadd.f32 %v1183_v61, %v1094_v45 }
  0xd6   : > { %v1134_v50 = vpop.f32.mrf.mxu2 }
  0xd8   : > { %v1097_v32 = vpop.f32.mrf.mxu0 }
  0xd9   : > { %v1223_v60 = vpop.f32.mrf.mxu3  ;;  %v1186_v2 = vpop.f32.mrf.mxu1 }
  0xda   : > { %v6861_v22 = vadd.f32 %v1223_v60, %v1134_v50  ;;  %v6867_v19 = vadd.f32 %v1186_v2, %v1097_v32  ;;  %v557_v50 = vsel %vm177_vm3, %v6542_v3, %v458_v49  ;;  %v5800_v60 = vld [vmem:[%s9452_s1 + $0x1a0] sm:$0xff]  ;;  %v592_v32 = vpack.c.bf16 %v6528_v0, %v6528_v0  ;;  %v9648_v49 = vld [vmem:[#allocation32_spill] sm:$0xff] }
  0xdb   : > { %1274 = vmatmul.bf16.gmra.mxu2 %v6859_v7  ;;  %1596 = vmatmul.bf16.gmra.mxu0 %v6274_v28  ;;  %v770_v28 = vunpack.c.l.b16 %v590_v39  ;;  %v593_v2 = vpack.c.bf16 %v557_v50, %v557_v50  ;;  %v9649_v50 = vld [vmem:[#allocation43_spill] sm:$0xff] }
  0xdc   : > { %1685 = vmatmul.bf16.gmra.mxu1 %v6827_v40  ;;  %1947 = vmatpush.bf16.msra.mxu2 %v5800_v60  ;;  %v772_v39 = vunpack.c.l.b16 %v592_v32 }
  0xdd   : > { %v6882_v61 = vpack.c.b16 %v771_v59, %v770_v28  ;;  %v773_v14 = vunpack.c.l.b16 %v593_v2 }
  0xde   : > { %1507 = vmatmul.bf16.gmra.mxu3 %v6380_v20  ;;  %v1137_v4 = vpop.f32.mrf.mxu2 }
  0xdf   : > { %v6914_v28 = vpack.c.b16 %v773_v14, %v772_v39 }
  0xe0   : > { %v1099_v53 = vpop.f32.mrf.mxu0 }
  0xe1   : > { %v1226_v1 = vpop.f32.mrf.mxu3  ;;  %v1188_v5 = vpop.f32.mrf.mxu1 }
  0xe2   : > { %v6878_v41 = vadd.f32 %v1226_v1, %v1137_v4  ;;  %v6880_v8 = vadd.f32 %v1188_v5, %v1099_v53  ;;  %v5816_v1 = vld [vmem:[%s9452_s1 + $0x220] sm:$0xff] }
  0xe3   : > { %2125 = vmatpush.bf16.msra.mxu0 %v5816_v1 }
  0xe6   : > { %v1139_v24 = vpop.f32.mrf.mxu2 }
  0xe8   : > { %v1102_v25 = vpop.f32.mrf.mxu0 }
  0xe9   : > { %v1228_v45 = vpop.f32.mrf.mxu3  ;;  %v1191_v46 = vpop.f32.mrf.mxu1 }
  0xea   : > { %v6884_v12 = vadd.f32 %v1228_v45, %v1139_v24  ;;  %v6890_v57 = vadd.f32 %v1191_v46, %v1102_v25  ;;  %v456_v45 = vsel %vm437_vm1, %v6584_v48, %v6669_v26  ;;  %v9647_v46 = vld [vmem:[#allocation22_spill] sm:$0xff] }
  0xeb   : > { %1279 = vmatmul.bf16.gmra.mxu2 %v6882_v61  ;;  %1601 = vmatmul.bf16.gmra.mxu0 %v6338_v16  ;;  %v559_v60 = vsel %vm177_vm3, %v9649_v50, %v456_v45 }
  0xec   : > { %1690 = vmatmul.bf16.gmra.mxu1 %v6859_v7  ;;  %v595_v26 = vpack.c.bf16 %v559_v60, %v559_v60 }
  0xee   : > { %1512 = vmatmul.bf16.gmra.mxu3 %v6449_v17  ;;  %v1142_v13 = vpop.f32.mrf.mxu2  ;;  %v775_v39 = vunpack.c.l.b16 %v595_v26 }
  0xf0   : > { %v1104_v18 = vpop.f32.mrf.mxu0 }
  0xf1   : > { %v1231_v16 = vpop.f32.mrf.mxu3  ;;  %v1193_v3 = vpop.f32.mrf.mxu1 }
  0xf2   : > { %v6907_v21 = vadd.f32 %v1231_v16, %v1142_v13  ;;  %v6909_v4 = vadd.f32 %v1193_v3, %v1104_v18  ;;  %v9650_v16 = vld [vmem:[#allocation41_spill] sm:$0xff] }
  0xf3   : > { %v594_v32 = vpack.c.bf16 %v9650_v16, %v9650_v16 }
  0xf5   : > { %v774_v1 = vunpack.c.l.b16 %v594_v32  ;;  %v5799_v32 = vld [vmem:[%s9452_s1 + $0x198] sm:$0xff] }
  0xf6   : > { %v1144_v53 = vpop.f32.mrf.mxu2  ;;  %1948 = vmatpush.bf16.msra.mxu2 %v5799_v32 }
  0xf8   : > { %v1107_v0 = vpop.f32.mrf.mxu0 }
  0xf9   : > { %v1233_v5 = vpop.f32.mrf.mxu3  ;;  %v1196_v24 = vpop.f32.mrf.mxu1 }
  0xfa   : > { %v6916_v59 = vadd.f32 %v1233_v5, %v1144_v53  ;;  %v6922_v25 = vadd.f32 %v1196_v24, %v1107_v0  ;;  %v6937_v5 = vpack.c.b16 %v775_v39, %v774_v1 }
  0xfb   : > { %1284 = vmatmul.bf16.gmra.mxu2 %v6914_v28  ;;  %1606 = vmatmul.bf16.gmra.mxu0 %v9647_v46  ;;  %v9654_v46 = vld [vmem:[#allocation3_spill] sm:$0xff] }
  0xfc   : > { %1695 = vmatmul.bf16.gmra.mxu1 %v6882_v61  ;;  %9652 = vst [vmem:[#allocation32_spill] sm:$0xff] %v6937_v5  ;;  %v454_v50 = vsel %vm437_vm1, %v6667_v10, %v9654_v46  ;;  %v5807_v10 = vld [vmem:[%s9452_s1 + $0x1d8] sm:$0xff] }
  0xfd   : > { %v561_v16 = vsel %vm177_vm3, %v6707_v38, %v454_v50  ;;  %2037 = vmatpush.bf16.msra.mxu3 %v5807_v10 }
  0xfe   : > { %1517 = vmatmul.bf16.gmra.mxu3 %v9648_v49  ;;  %v1147_v31 = vpop.f32.mrf.mxu2  ;;  %v597_v1 = vpack.c.bf16 %v561_v16, %v561_v16 }
 0x100   : > { %v1109_v2 = vpop.f32.mrf.mxu0  ;;  %v777_v46 = vunpack.c.l.b16 %v597_v1 }
 0x101   : > { %v1236_v13 = vpop.f32.mrf.mxu3  ;;  %v1198_v18 = vpop.f32.mrf.mxu1 }
 0x102   : > { %v6933_v48 = vadd.f32 %v1236_v13, %v1147_v31  ;;  %v6935_v3 = vadd.f32 %v1198_v18, %v1109_v2  ;;  %v9655_v31 = vld [vmem:[#allocation28_spill] sm:$0xff]  ;;  %v9656_v13 = vld [vmem:[#allocation39_spill] sm:$0xff]  ;;  %v596_v18 = vpack.c.bf16 %v6691_v63, %v6691_v63 }
 0x104   : > { %9651 = vst [vmem:[#allocation22_spill] sm:$0xff] %v6933_v48  ;;  %v9666_v48 = vld [vmem:[#allocation13_spill] sm:$0xff] }
 0x106   : > { %v1149_v14 = vpop.f32.mrf.mxu2 }
 0x108   : > { %v1112_v24 = vpop.f32.mrf.mxu0 }
 0x109   : > { %v1238_v53 = vpop.f32.mrf.mxu3  ;;  %v1201_v45 = vpop.f32.mrf.mxu1 }
 0x10a   : > { %v6939_v0 = vadd.f32 %v1238_v53, %v1149_v14  ;;  %v6945_v60 = vadd.f32 %v1201_v45, %v1112_v24  ;;  %v5815_v53 = vld [vmem:[%s9452_s1 + $0x218] sm:$0xff]  ;;  %v776_v45 = vunpack.c.l.b16 %v596_v18  ;;  %v9662_v18 = vld [vmem:[#allocation6_spill] sm:$0xff] }
 0x10b   : > { %1289 = vmatmul.bf16.gmra.mxu2 %v6937_v5  ;;  %1611 = vmatmul.bf16.gmra.mxu0 %v9655_v31 }
 0x10c   : > { %9653 = vst [vmem:[#allocation43_spill] sm:$0xff] %v6939_v0  ;;  %1700 = vmatmul.bf16.gmra.mxu1 %v6914_v28  ;;  %2126 = vmatpush.bf16.msra.mxu0 %v5815_v53  ;;  %v6969_v32 = vpack.c.b16 %v777_v46, %v776_v45  ;;  %v9663_v53 = vld [vmem:[#allocation5_spill] sm:$0xff] }
 0x10d   : > { %v598_v45 = vpack.c.bf16 %v9663_v53, %v9663_v53  ;;  %v9667_v53 = vld [vmem:[#allocation9_spill] sm:$0xff] }
 0x10e   : > { %1522 = vmatmul.bf16.gmra.mxu3 %v9656_v13  ;;  %v1152_v26 = vpop.f32.mrf.mxu2  ;;  %9658 = vst [vmem:[#allocation3_spill] sm:$0xff] %v6969_v32 }
 0x110   : > { %v1114_v14 = vpop.f32.mrf.mxu0 }
 0x111   : > { %v1241_v2 = vpop.f32.mrf.mxu3  ;;  %v1203_v38 = vpop.f32.mrf.mxu1 }
 0x112   : > { %v6962_v39 = vadd.f32 %v1241_v2, %v1152_v26  ;;  %v6967_v24 = vadd.f32 %v1203_v38, %v1114_v14  ;;  %v9660_v26 = vld [vmem:[#allocation8_spill] sm:$0xff] }
 0x113   : > { %v9661_v2 = vld [vmem:[#allocation4_spill] sm:$0xff] }
 0x114   : > { %9657 = vst [vmem:[#allocation41_spill] sm:$0xff] %v6962_v39  ;;  %v452_v34 = vsel %vm437_vm1, %v9661_v2, %v9660_v26 }
 0x115   : > { %v563_v1 = vsel %vm177_vm3, %v9662_v18, %v452_v34 }
 0x116   : > { %v1154_v50 = vpop.f32.mrf.mxu2  ;;  %v599_v46 = vpack.c.bf16 %v563_v1, %v563_v1  ;;  %v450_v1 = vsel %vm437_vm1, %v9667_v53, %v9666_v48  ;;  %v5806_v48 = vld [vmem:[%s9452_s1 + $0x1d0] sm:$0xff] }
 0x117   : > { %2038 = vmatpush.bf16.msra.mxu3 %v5806_v48 }
 0x118   : > { %v1117_v63 = vpop.f32.mrf.mxu0  ;;  %v779_v26 = vunpack.c.l.b16 %v599_v46 }
 0x119   : > { %v1243_v31 = vpop.f32.mrf.mxu3  ;;  %v1206_v16 = vpop.f32.mrf.mxu1 }
 0x11a   : > { %v6971_v10 = vadd.f32 %v1243_v31, %v1154_v50  ;;  %v6977_v58 = vadd.f32 %v1206_v16, %v1117_v63  ;;  %v778_v16 = vunpack.c.l.b16 %v598_v45  ;;  %v5798_v45 = vld [vmem:[%s9452_s1 + $0x190] sm:$0xff] }
 0x11b   : > { %1294 = vmatmul.bf16.gmra.mxu2 %v6969_v32  ;;  %1616 = vmatmul.bf16.gmra.mxu0 %v6545_v55 }
 0x11c   : > { %9659 = vst [vmem:[#allocation28_spill] sm:$0xff] %v6971_v10  ;;  %1705 = vmatmul.bf16.gmra.mxu1 %v6937_v5  ;;  %v6992_v39 = vpack.c.b16 %v779_v26, %v778_v16  ;;  %1949 = vmatpush.bf16.msra.mxu2 %v5798_v45  ;;  %v9670_v16 = vld [vmem:[#allocation11_spill] sm:$0xff]  ;;  %v9673_v5 = vld [vmem:[#allocation14_spill] sm:$0xff] }
 0x11d   : > { %v600_v26 = vpack.c.bf16 %v9670_v16, %v9670_v16 }
 0x11e   : > { %1527 = vmatmul.bf16.gmra.mxu3 %v6675_v35  ;;  %v1157_v14 = vpop.f32.mrf.mxu2 }
 0x120   : > { %v1119_v31 = vpop.f32.mrf.mxu0 }
 0x121   : > { %v1246_v38 = vpop.f32.mrf.mxu3  ;;  %v1208_v63 = vpop.f32.mrf.mxu1 }
 0x122   : > { %v6988_v50 = vadd.f32 %v1246_v38, %v1157_v14  ;;  %v6990_v55 = vadd.f32 %v1208_v63, %v1119_v31  ;;  %v7002_v14 = vld [vmem:[%s6089_s27 + $0x38] sm:$0xff]  ;;  %v9669_v38 = vld [vmem:[#allocation12_spill] sm:$0xff] }
 0x123   : > { %9668 = vst [vmem:[#allocation4_spill] sm:$0xff] %v7002_v14 }
 0x124   : > { %9664 = vst [vmem:[#allocation39_spill] sm:$0xff] %v6988_v50 }
 0x126   : > { %v1159_v2 = vpop.f32.mrf.mxu2 }
 0x128   : > { %v1582_v18 = vpop.f32.mrf.mxu0 }
 0x129   : > { %v1248_v10 = vpop.f32.mrf.mxu3  ;;  %v1671_v0 = vpop.f32.mrf.mxu1 }
 0x12a   : > { %v6994_v34 = vadd.f32 %v1248_v10, %v1159_v2  ;;  %v565_v10 = vsel %vm177_vm3, %v9669_v38, %v450_v1 }
 0x12b   : > { %1299 = vmatmul.bf16.gmra.mxu2 %v6992_v39  ;;  %1621 = vmatmul.bf16.gmra.mxu0 %v7002_v14  ;;  %v601_v2 = vpack.c.bf16 %v565_v10, %v565_v10  ;;  %v780_v14 = vunpack.c.l.b16 %v600_v26  ;;  %v9678_v26 = vld [vmem:[#allocation16_spill] sm:$0xff] }
 0x12c   : > { %9665 = vst [vmem:[#allocation8_spill] sm:$0xff] %v6994_v34  ;;  %1710 = vmatmul.bf16.gmra.mxu1 %v6969_v32  ;;  %v5814_v34 = vld [vmem:[%s9452_s1 + $0x210] sm:$0xff] }
 0x12d   : > { %v781_v32 = vunpack.c.l.b16 %v601_v2  ;;  %2127 = vmatpush.bf16.msra.mxu0 %v5814_v34  ;;  %v602_v2 = vpack.c.bf16 %v9678_v26, %v9678_v26  ;;  %v9680_v26 = vld [vmem:[#allocation24_spill] sm:$0xff] }
 0x12e   : > { %1532 = vmatmul.bf16.gmra.mxu3 %v6747_v54  ;;  %v1260_v46 = vpop.f32.mrf.mxu2  ;;  %v9672_v54 = vld [vmem:[#allocation18_spill] sm:$0xff] }
 0x12f   : > { %v1261_v31 = vadd.f32 %v1260_v46, %v6786_v23  ;;  %v7025_v16 = vpack.c.b16 %v781_v32, %v780_v14  ;;  %v448_v35 = vsel %vm437_vm1, %v9673_v5, %v9672_v54 }
 0x130   : > { %v1584_v53 = vpop.f32.mrf.mxu0 }
 0x131   : > { %v1493_v63 = vpop.f32.mrf.mxu3  ;;  %v1673_v38 = vpop.f32.mrf.mxu1 }
 0x132   : > { %v1494_v1 = vadd.f32 %v1493_v63, %v1261_v31 }
 0x134   : > { %v1583_v50 = vadd.f32 %v1582_v18, %v1494_v1  ;;  %v7033_v18 = vld [vmem:[%s6089_s27 + $0x40] sm:$0xff] }
 0x135   : > { %9674 = vst [vmem:[#allocation5_spill] sm:$0xff] %v7033_v18 }
 0x136   : > { %v7022_v45 = vadd.f32 %v1671_v0, %v1583_v50  ;;  %v1262_v23 = vpop.f32.mrf.mxu2  ;;  %v9675_v50 = vld [vmem:[#allocation10_spill] sm:$0xff] }
 0x137   : > { %v1263_v48 = vadd.f32 %v1262_v23, %v6800_v9  ;;  %v9676_v9 = vld [vmem:[#allocation17_spill] sm:$0xff] }
 0x138   : > { %9671 = vst [vmem:[#allocation6_spill] sm:$0xff] %v7022_v45  ;;  %v1587_v10 = vpop.f32.mrf.mxu0  ;;  %v567_v32 = vsel %vm177_vm3, %v9676_v9, %v448_v35 }
 0x139   : > { %v1495_v46 = vpop.f32.mrf.mxu3  ;;  %v1676_v63 = vpop.f32.mrf.mxu1  ;;  %v603_v1 = vpack.c.bf16 %v567_v32, %v567_v32  ;;  %v9681_v32 = vld [vmem:[#allocation19_spill] sm:$0xff] }
 0x13a   : > { %v1496_v31 = vadd.f32 %v1495_v46, %v1263_v48 }
 0x13b   : > { %1304 = vmatmul.bf16.gmra.mxu2 %v7025_v16  ;;  %1626 = vmatmul.bf16.gmra.mxu0 %v7033_v18  ;;  %v783_v45 = vunpack.c.l.b16 %v603_v1  ;;  %v5805_v1 = vld [vmem:[%s9452_s1 + $0x1c8] sm:$0xff] }
 0x13c   : > { %v1585_v0 = vadd.f32 %v1584_v53, %v1496_v31  ;;  %1715 = vmatmul.bf16.gmra.mxu1 %v6992_v39  ;;  %v782_v31 = vunpack.c.l.b16 %v602_v2  ;;  %v5797_v2 = vld [vmem:[%s9452_s1 + $0x188] sm:$0xff]  ;;  %2039 = vmatpush.bf16.msra.mxu3 %v5805_v1 }
 0x13d   : > { %1950 = vmatpush.bf16.msra.mxu2 %v5797_v2 }
 0x13e   : > { %1537 = vmatmul.bf16.gmra.mxu3 %v9675_v50  ;;  %v7041_v34 = vadd.f32 %v1673_v38, %v1585_v0  ;;  %v1265_v14 = vpop.f32.mrf.mxu2  ;;  %v7049_v9 = vpack.c.b16 %v783_v45, %v782_v31 }
 0x13f   : > { %v1266_v54 = vadd.f32 %v1265_v14, %v6813_v42 }
 0x140   : > { %9677 = vst [vmem:[#allocation13_spill] sm:$0xff] %v7041_v34  ;;  %v1589_v23 = vpop.f32.mrf.mxu0 }
 0x141   : > { %v1498_v5 = vpop.f32.mrf.mxu3  ;;  %v1678_v48 = vpop.f32.mrf.mxu1 }
 0x142   : > { %v1499_v53 = vadd.f32 %v1498_v5, %v1266_v54  ;;  %v446_v54 = vsel %vm437_vm1, %v9681_v32, %v9680_v26  ;;  %v9683_v5 = vld [vmem:[#allocation15_spill] sm:$0xff] }
 0x144   : > { %v1588_v46 = vadd.f32 %v1587_v10, %v1499_v53  ;;  %v7057_v10 = vld [vmem:[%s6089_s27 + $0x48] sm:$0xff] }
 0x145   : > { %9682 = vst [vmem:[#allocation12_spill] sm:$0xff] %v7057_v10 }
 0x146   : > { %v7046_v18 = vadd.f32 %v1676_v63, %v1588_v46  ;;  %v1267_v35 = vpop.f32.mrf.mxu2 }
 0x147   : > { %v1268_v38 = vadd.f32 %v1267_v35, %v6825_v51  ;;  %v9684_v51 = vld [vmem:[#allocation23_spill] sm:$0xff]  ;;  %v9686_v35 = vld [vmem:[#allocation21_spill] sm:$0xff] }
 0x148   : > { %9679 = vst [vmem:[#allocation9_spill] sm:$0xff] %v7046_v18  ;;  %v1592_v42 = vpop.f32.mrf.mxu0  ;;  %v569_v45 = vsel %vm177_vm3, %v9684_v51, %v446_v54  ;;  %v5813_v54 = vld [vmem:[%s9452_s1 + $0x208] sm:$0xff]  ;;  %v9689_v18 = vld [vmem:[#allocation25_spill] sm:$0xff] }
 0x149   : > { %v1500_v0 = vpop.f32.mrf.mxu3  ;;  %v1681_v34 = vpop.f32.mrf.mxu1  ;;  %2128 = vmatpush.bf16.msra.mxu0 %v5813_v54 }
 0x14a   : > { %v1501_v14 = vadd.f32 %v1500_v0, %v1268_v38  ;;  %v604_v38 = vpack.c.bf16 %v9686_v35, %v9686_v35  ;;  %v605_v0 = vpack.c.bf16 %v569_v45, %v569_v45 }
 0x14b   : > { %1309 = vmatmul.bf16.gmra.mxu2 %v7049_v9  ;;  %1631 = vmatmul.bf16.gmra.mxu0 %v7057_v10 }
 0x14c   : > { %v1590_v63 = vadd.f32 %v1589_v23, %v1501_v14  ;;  %1720 = vmatmul.bf16.gmra.mxu1 %v7025_v16  ;;  %v785_v51 = vunpack.c.l.b16 %v605_v0 }
 0x14e   : > { %1542 = vmatmul.bf16.gmra.mxu3 %v9683_v5  ;;  %v7071_v53 = vadd.f32 %v1678_v48, %v1590_v63  ;;  %v1270_v46 = vpop.f32.mrf.mxu2  ;;  %v784_v63 = vunpack.c.l.b16 %v604_v38  ;;  %v9691_v38 = vld [vmem:[#allocation20_spill] sm:$0xff] }
 0x14f   : > { %v1271_v23 = vadd.f32 %v1270_v46, %v6835_v11 }
 0x150   : > { %9685 = vst [vmem:[#allocation11_spill] sm:$0xff] %v7071_v53  ;;  %v1594_v14 = vpop.f32.mrf.mxu0  ;;  %v7082_v35 = vpack.c.b16 %v785_v51, %v784_v63  ;;  %v9688_v53 = vld [vmem:[#allocation30_spill] sm:$0xff] }
 0x151   : > { %v1503_v31 = vpop.f32.mrf.mxu3  ;;  %v1683_v32 = vpop.f32.mrf.mxu1  ;;  %v444_v10 = vsel %vm437_vm1, %v9689_v18, %v9688_v53 }
 0x152   : > { %v1504_v26 = vadd.f32 %v1503_v31, %v1271_v23 }
 0x154   : > { %v1593_v48 = vadd.f32 %v1592_v42, %v1504_v26  ;;  %v7090_v42 = vld [vmem:[%s6089_s27 + $0x50] sm:$0xff] }
 0x155   : > { %9690 = vst [vmem:[#allocation14_spill] sm:$0xff] %v7090_v42 }
 0x156   : > { %v7079_v2 = vadd.f32 %v1681_v34, %v1593_v48  ;;  %v1272_v11 = vpop.f32.mrf.mxu2  ;;  %v9694_v48 = vld [vmem:[#allocation27_spill] sm:$0xff] }
 0x157   : > { %v1273_v1 = vadd.f32 %v1272_v11, %v6854_v33  ;;  %v9692_v33 = vld [vmem:[#allocation29_spill] sm:$0xff]  ;;  %v606_v63 = vpack.c.bf16 %v9694_v48, %v9694_v48 }
 0x158   : > { %9687 = vst [vmem:[#allocation18_spill] sm:$0xff] %v7079_v2  ;;  %v1597_v45 = vpop.f32.mrf.mxu0  ;;  %v571_v0 = vsel %vm177_vm3, %v9692_v33, %v444_v10  ;;  %v9696_v48 = vld [vmem:[#allocation37_spill] sm:$0xff] }
 0x159   : > { %v1505_v46 = vpop.f32.mrf.mxu3  ;;  %v1686_v31 = vpop.f32.mrf.mxu1  ;;  %v607_v51 = vpack.c.bf16 %v571_v0, %v571_v0  ;;  %v9697_v0 = vld [vmem:[#allocation31_spill] sm:$0xff] }
 0x15a   : > { %v1506_v23 = vadd.f32 %v1505_v46, %v1273_v1 }
 0x15b   : > { %1314 = vmatmul.bf16.gmra.mxu2 %v7082_v35  ;;  %1636 = vmatmul.bf16.gmra.mxu0 %v7090_v42  ;;  %v787_v2 = vunpack.c.l.b16 %v607_v51  ;;  %v5804_v51 = vld [vmem:[%s9452_s1 + $0x1c0] sm:$0xff] }
 0x15c   : > { %v1595_v34 = vadd.f32 %v1594_v14, %v1506_v23  ;;  %1725 = vmatmul.bf16.gmra.mxu1 %v7049_v9  ;;  %v786_v23 = vunpack.c.l.b16 %v606_v63  ;;  %v5796_v63 = vld [vmem:[%s9452_s1 + $0x180] sm:$0xff]  ;;  %2040 = vmatpush.bf16.msra.mxu3 %v5804_v51 }
 0x15d   : > { %1951 = vmatpush.bf16.msra.mxu2 %v5796_v63 }
 0x15e   : > { %1547 = vmatmul.bf16.gmra.mxu3 %v9691_v38  ;;  %v7098_v26 = vadd.f32 %v1683_v32, %v1595_v34  ;;  %v1275_v54 = vpop.f32.mrf.mxu2  ;;  %v7106_v33 = vpack.c.b16 %v787_v2, %v786_v23 }
 0x15f   : > { %v1276_v18 = vadd.f32 %v1275_v54, %v6867_v19 }
 0x160   : > { %9693 = vst [vmem:[#allocation10_spill] sm:$0xff] %v7098_v26  ;;  %v1599_v11 = vpop.f32.mrf.mxu0 }
 0x161   : > { %v1508_v53 = vpop.f32.mrf.mxu3  ;;  %v1688_v1 = vpop.f32.mrf.mxu1 }
 0x162   : > { %v1509_v14 = vadd.f32 %v1508_v53, %v1276_v18  ;;  %v442_v18 = vsel %vm437_vm1, %v9697_v0, %v9696_v48  ;;  %v9698_v53 = vld [vmem:[#allocation26_spill] sm:$0xff] }
 0x164   : > { %v1598_v46 = vadd.f32 %v1597_v45, %v1509_v14  ;;  %v7114_v45 = vld [vmem:[%s6089_s27 + $0x58] sm:$0xff] }
 0x166   : > { %v7103_v42 = vadd.f32 %v1686_v31, %v1598_v46  ;;  %v1277_v10 = vpop.f32.mrf.mxu2 }
 0x167   : > { %v1278_v32 = vadd.f32 %v1277_v10, %v6880_v8  ;;  %v9699_v8 = vld [vmem:[#allocation35_spill] sm:$0xff]  ;;  %v9701_v10 = vld [vmem:[#allocation34_spill] sm:$0xff] }
 0x168   : > { %9695 = vst [vmem:[#allocation17_spill] sm:$0xff] %v7103_v42  ;;  %v1602_v19 = vpop.f32.mrf.mxu0  ;;  %v573_v2 = vsel %vm177_vm3, %v9699_v8, %v442_v18 }
 0x169   : > { %v1510_v34 = vpop.f32.mrf.mxu3  ;;  %v1691_v26 = vpop.f32.mrf.mxu1 }
 0x16a   : > { %v1511_v54 = vadd.f32 %v1510_v34, %v1278_v32  ;;  %v608_v32 = vpack.c.bf16 %v9701_v10, %v9701_v10  ;;  %v609_v34 = vpack.c.bf16 %v573_v2, %v573_v2 }
 0x16b   : > { %1319 = vmatmul.bf16.gmra.mxu2 %v7106_v33  ;;  %1641 = vmatmul.bf16.gmra.mxu0 %v7114_v45 }
 0x16c   : > { %v1600_v31 = vadd.f32 %v1599_v11, %v1511_v54  ;;  %1730 = vmatmul.bf16.gmra.mxu1 %v7082_v35  ;;  %v788_v8 = vunpack.c.l.b16 %v608_v32  ;;  %v789_v63 = vunpack.c.l.b16 %v609_v34  ;;  %v9707_v32 = vld [vmem:[#allocation44_spill] sm:$0xff] }
 0x16e   : > { %1552 = vmatmul.bf16.gmra.mxu3 %v9698_v53  ;;  %v7128_v14 = vadd.f32 %v1688_v1, %v1600_v31  ;;  %v1280_v46 = vpop.f32.mrf.mxu2  ;;  %v5812_v1 = vld [vmem:[%s9452_s1 + $0x200] sm:$0xff]  ;;  %v7141_v2 = vpack.c.b16 %v789_v63, %v788_v8 }
 0x16f   : > { %v1281_v11 = vadd.f32 %v1280_v46, %v6890_v57  ;;  %2129 = vmatpush.bf16.msra.mxu0 %v5812_v1 }
 0x170   : > { %9700 = vst [vmem:[#allocation16_spill] sm:$0xff] %v7128_v14  ;;  %v1604_v54 = vpop.f32.mrf.mxu0  ;;  %v9704_v14 = vld [vmem:[#allocation38_spill] sm:$0xff] }
 0x171   : > { %v1513_v23 = vpop.f32.mrf.mxu3  ;;  %v7133_v18 = vpop.f32.mrf.mxu1  ;;  %v441_v42 = vsel %vm437_vm1, %v9704_v14, %v6671_v30 }
 0x172   : > { %v1514_v0 = vadd.f32 %v1513_v23, %v1281_v11  ;;  %9702 = vst [vmem:[#allocation24_spill] sm:$0xff] %v7133_v18  ;;  %v575_v34 = vsel %vm177_vm3, %v9707_v32, %v441_v42 }
 0x173   : > { %v611_v63 = vpack.c.bf16 %v575_v34, %v575_v34 }
 0x174   : > { %v1603_v31 = vadd.f32 %v1602_v19, %v1514_v0  ;;  %v7149_v19 = vld [vmem:[%s6089_s27 + $0x60] sm:$0xff] }
 0x176   : > { %v7138_v51 = vadd.f32 %v1691_v26, %v1603_v31  ;;  %v1282_v57 = vpop.f32.mrf.mxu2  ;;  %v9708_v31 = vld [vmem:[#allocation42_spill] sm:$0xff] }
 0x177   : > { %v1283_v46 = vadd.f32 %v1282_v57, %v6909_v4  ;;  %v9706_v4 = vld [vmem:[#allocation33_spill] sm:$0xff]  ;;  %v610_v8 = vpack.c.bf16 %v9708_v31, %v9708_v31 }
 0x178   : > { %9703 = vst [vmem:[#allocation19_spill] sm:$0xff] %v7138_v51  ;;  %v1607_v11 = vpop.f32.mrf.mxu0 }
 0x179   : > { %v1515_v10 = vpop.f32.mrf.mxu3  ;;  %v1696_v18 = vpop.f32.mrf.mxu1 }
 0x17a   : > { %v1516_v23 = vadd.f32 %v1515_v10, %v1283_v46 }
 0x17b   : > { %1324 = vmatmul.bf16.gmra.mxu2 %v7141_v2  ;;  %1646 = vmatmul.bf16.gmra.mxu0 %v7149_v19 }
 0x17c   : > { %v7152_v26 = vadd.f32 %v1604_v54, %v1516_v23  ;;  %1735 = vmatmul.bf16.gmra.mxu1 %v7106_v33  ;;  %v7164_v23 = vunpack.c.l.b16 %v610_v8 }
 0x17e   : > { %9705 = vst [vmem:[#allocation15_spill] sm:$0xff] %v7152_v26  ;;  %1557 = vmatmul.bf16.gmra.mxu3 %v9706_v4  ;;  %v1285_v0 = vpop.f32.mrf.mxu2  ;;  %v791_v26 = vunpack.c.l.b16 %v611_v63 }
 0x17f   : > { %v1286_v1 = vadd.f32 %v1285_v0, %v6922_v25 }
 0x180   : > { %v1609_v57 = vpop.f32.mrf.mxu0  ;;  %v7170_v0 = vpack.c.b16 %v791_v26, %v7164_v23 }
 0x181   : > { %v1518_v30 = vpop.f32.mrf.mxu3  ;;  %v7162_v46 = vpop.f32.mrf.mxu1 }
 0x182   : > { %v1519_v54 = vadd.f32 %v1518_v30, %v1286_v1  ;;  %9709 = vst [vmem:[#allocation23_spill] sm:$0xff] %v7162_v46  ;;  %v7178_v1 = vld [vmem:[%s6089_s27 + $0x68] sm:$0xff] }
 0x184   : > { %v1608_v10 = vadd.f32 %v1607_v11, %v1519_v54  ;;  %v439_v11 = vsel %vm437_vm1, %v6673_v37, %v9696_v48  ;;  %v612_v48 = vpack.c.bf16 %v6700_v27, %v6700_v27 }
 0x185   : > { %v577_v26 = vsel %vm177_vm3, %v6720_v44, %v439_v11 }
 0x186   : > { %v7166_v14 = vadd.f32 %v1696_v18, %v1608_v10  ;;  %v1287_v42 = vpop.f32.mrf.mxu2  ;;  %v613_v8 = vpack.c.bf16 %v577_v26, %v577_v26  ;;  %v7200_v26 = vld [vmem:[%s6089_s27 + $0x70] sm:$0xff] }
 0x187   : > { %v1288_v32 = vadd.f32 %v1287_v42, %v6935_v3  ;;  %v9711_v3 = vld [vmem:[#allocation40_spill] sm:$0xff]  ;;  %v792_v42 = vunpack.c.l.b16 %v612_v48 }
 0x188   : > { %v1612_v31 = vpop.f32.mrf.mxu0 }
 0x189   : > { %v1520_v25 = vpop.f32.mrf.mxu3  ;;  %v1701_v51 = vpop.f32.mrf.mxu1 }
 0x18a   : > { %v1521_v34 = vadd.f32 %v1520_v25, %v1288_v32  ;;  %v793_v25 = vunpack.c.l.b16 %v613_v8 }
 0x18b   : > { %1329 = vmatmul.bf16.gmra.mxu2 %v7170_v0  ;;  %1651 = vmatmul.bf16.gmra.mxu0 %v7178_v1 }
 0x18c   : > { %v7181_v18 = vadd.f32 %v1609_v57, %v1521_v34  ;;  %1740 = vmatmul.bf16.gmra.mxu1 %v7141_v2 }
 0x18e   : > { %9710 = vst [vmem:[#allocation21_spill] sm:$0xff] %v7181_v18  ;;  %1562 = vmatmul.bf16.gmra.mxu3 %v9711_v3  ;;  %v1290_v32 = vpop.f32.mrf.mxu2 }
 0x18f   : > { %v1291_v30 = vadd.f32 %v1290_v32, %v6945_v60  ;;  %v7196_v60 = vpack.c.b16 %v793_v25, %v792_v42 }
 0x190   : > { %v1614_v63 = vpop.f32.mrf.mxu0 }
 0x191   : > { %v1523_v37 = vpop.f32.mrf.mxu3  ;;  %v7191_v54 = vpop.f32.mrf.mxu1 }
 0x192   : > { %v1524_v57 = vadd.f32 %v1523_v37, %v1291_v30  ;;  %v9712_v30 = vld [vmem:[#allocation47_spill] sm:$0xff] }
 0x194   : > { %v1613_v10 = vadd.f32 %v1612_v31, %v1524_v57 }
 0x196   : > { %v7193_v34 = vadd.f32 %v1701_v51, %v1613_v10  ;;  %v1292_v46 = vpop.f32.mrf.mxu2 }
 0x197   : > { %v1293_v44 = vadd.f32 %v1292_v46, %v6967_v24 }
 0x198   : > { %v1617_v32 = vpop.f32.mrf.mxu0 }
 0x199   : > { %v1525_v11 = vpop.f32.mrf.mxu3  ;;  %v1706_v27 = vpop.f32.mrf.mxu1 }
 0x19a   : > { %v1526_v18 = vadd.f32 %v1525_v11, %v1293_v44 }
 0x19b   : > { %1334 = vmatmul.bf16.gmra.mxu2 %v7196_v60  ;;  %1656 = vmatmul.bf16.gmra.mxu0 %v7200_v26 }
 0x19c   : > { %v7203_v31 = vadd.f32 %v1614_v63, %v1526_v18  ;;  %1745 = vmatmul.bf16.gmra.mxu1 %v7170_v0 }
 0x19e   : > { %1567 = vmatmul.bf16.gmra.mxu3 %v9712_v30  ;;  %v1295_v51 = vpop.f32.mrf.mxu2 }
 0x19f   : > { %v1296_v24 = vadd.f32 %v1295_v51, %v6977_v58  ;;  %v6023_v51 = vld [vmem:[%s6089_s27 + $0x8] sm:$0xff] }
 0x1a0   : > { %v1619_v37 = vpop.f32.mrf.mxu0 }
 0x1a1   : > { %v1528_v46 = vpop.f32.mrf.mxu3  ;;  %v7208_v8 = vpop.f32.mrf.mxu1 }
 0x1a2   : > { %v1529_v48 = vadd.f32 %v1528_v46, %v1296_v24 }
 0x1a4   : > { %v1618_v57 = vadd.f32 %v1617_v32, %v1529_v48 }
 0x1a6   : > { %v7210_v10 = vadd.f32 %v1706_v27, %v1618_v57  ;;  %v1297_v42 = vpop.f32.mrf.mxu2 }
 0x1a7   : > { %v1298_v18 = vadd.f32 %v1297_v42, %v6990_v55 }
 0x1a8   : > { %v1622_v25 = vpop.f32.mrf.mxu0 }
 0x1a9   : > { %v1530_v63 = vpop.f32.mrf.mxu3  ;;  %v1711_v11 = vpop.f32.mrf.mxu1 }
 0x1aa   : > { %v1531_v44 = vadd.f32 %v1530_v63, %v1298_v18 }
 0x1ab   : > { %1952 = vmatmul.bf16.vlgmr.msra.gmra.mxu2 %v6310_v56  ;;  %2130 = vmatmul.bf16.vlgmr.msra.gmra.mxu0 %v6805_v36 }
 0x1ac   : > { %v7215_v58 = vadd.f32 %v1619_v37, %v1531_v44 }
 0x1ae   : > { %2041 = vmatmul.bf16.vlgmr.msra.gmra.mxu3 %v6023_v51  ;;  %v1300_v24 = vpop.f32.mrf.mxu2 }
 0x1af   : > { %v1301_v32 = vadd.f32 %v1300_v24, %v6798_v29  ;;  %v6024_v29 = vld [vmem:[%s6089_s27 + $0x10] sm:$0xff] }
 0x1b0   : > { %v1624_v46 = vpop.f32.mrf.mxu0 }
 0x1b1   : > { %v1533_v27 = vpop.f32.mrf.mxu3  ;;  %v7219_v57 = vpop.f32.mrf.mxu1 }
 0x1b2   : > { %v1534_v48 = vadd.f32 %v1533_v27, %v1301_v32 }
 0x1b4   : > { %v1623_v55 = vadd.f32 %v1622_v25, %v1534_v48 }
 0x1b6   : > { %v7221_v42 = vadd.f32 %v1711_v11, %v1623_v55  ;;  %v1302_v18 = vpop.f32.mrf.mxu2 }
 0x1b7   : > { %v1303_v56 = vadd.f32 %v1302_v18, %v6807_v62 }
 0x1b8   : > { %v1627_v37 = vpop.f32.mrf.mxu0 }
 0x1b9   : > { %v1535_v36 = vpop.f32.mrf.mxu3  ;;  %v1716_v25 = vpop.f32.mrf.mxu1 }
 0x1ba   : > { %v1536_v63 = vadd.f32 %v1535_v36, %v1303_v56 }
 0x1bb   : > { %1957 = vmatmul.bf16.gmra.mxu2 %v6380_v20  ;;  %2135 = vmatmul.bf16.gmra.mxu0 %v6827_v40 }
 0x1bc   : > { %v7226_v44 = vadd.f32 %v1624_v46, %v1536_v63 }
 0x1be   : > { %2046 = vmatmul.bf16.gmra.mxu3 %v6024_v29  ;;  %v1305_v51 = vpop.f32.mrf.mxu2 }
 0x1bf   : > { %v1306_v11 = vadd.f32 %v1305_v51, %v6823_v52  ;;  %v6025_v52 = vld [vmem:[%s6089_s27 + $0x18] sm:$0xff] }
 0x1c0   : > { %v1629_v32 = vpop.f32.mrf.mxu0 }
 0x1c1   : > { %v1538_v24 = vpop.f32.mrf.mxu3  ;;  %v7233_v46 = vpop.f32.mrf.mxu1 }
 0x1c2   : > { %v1539_v27 = vadd.f32 %v1538_v24, %v1306_v11 }
 0x1c4   : > { %v1628_v62 = vadd.f32 %v1627_v37, %v1539_v27 }
 0x1c6   : > { %v7230_v48 = vadd.f32 %v1716_v25, %v1628_v62  ;;  %v1307_v55 = vpop.f32.mrf.mxu2 }
 0x1c7   : > { %v1308_v20 = vadd.f32 %v1307_v55, %v6829_v47 }
 0x1c8   : > { %v1632_v40 = vpop.f32.mrf.mxu0 }
 0x1c9   : > { %v1540_v18 = vpop.f32.mrf.mxu3  ;;  %v1721_v25 = vpop.f32.mrf.mxu1 }
 0x1ca   : > { %v1541_v56 = vadd.f32 %v1540_v18, %v1308_v20 }
 0x1cb   : > { %1962 = vmatmul.bf16.gmra.mxu2 %v6449_v17  ;;  %2140 = vmatmul.bf16.gmra.mxu0 %v6859_v7 }
 0x1cc   : > { %v7237_v36 = vadd.f32 %v1629_v32, %v1541_v56 }
 0x1ce   : > { %2051 = vmatmul.bf16.gmra.mxu3 %v6025_v52  ;;  %v1310_v63 = vpop.f32.mrf.mxu2 }
 0x1cf   : > { %v1311_v37 = vadd.f32 %v1310_v63, %v6852_v43  ;;  %v6026_v43 = vld [vmem:[%s6089_s27 + $0x20] sm:$0xff] }
 0x1d0   : > { %v1634_v51 = vpop.f32.mrf.mxu0 }
 0x1d1   : > { %v1543_v29 = vpop.f32.mrf.mxu3 }
 0x1d2   : > { %v1544_v47 = vadd.f32 %v1543_v29, %v1311_v37 }
 0x1d4   : > { %v1633_v11 = vadd.f32 %v1632_v40, %v1544_v47 }
 0x1d6   : > { %v7241_v24 = vadd.f32 %v1721_v25, %v1633_v11  ;;  %v1312_v27 = vpop.f32.mrf.mxu2 }
 0x1d7   : > { %v1313_v17 = vadd.f32 %v1312_v27, %v6861_v22 }
 0x1d8   : > { %v1637_v7 = vpop.f32.mrf.mxu0 }
 0x1d9   : > { %v1545_v62 = vpop.f32.mrf.mxu3 }
 0x1da   : > { %v1546_v32 = vadd.f32 %v1545_v62, %v1313_v17 }
 0x1db   : > { %1967 = vmatmul.bf16.gmra.mxu2 %v9648_v49  ;;  %2145 = vmatmul.bf16.gmra.mxu0 %v6882_v61 }
 0x1dc   : > { %v7246_v55 = vadd.f32 %v1634_v51, %v1546_v32  ;;  %v6027_v51 = vld [vmem:[%s6089_s27 + $0x28] sm:$0xff] }
 0x1de   : > { %2056 = vmatmul.bf16.gmra.mxu3 %v6026_v43  ;;  %v1315_v20 = vpop.f32.mrf.mxu2 }
 0x1df   : > { %v1316_v18 = vadd.f32 %v1315_v20, %v6878_v41  ;;  %v9714_v20 = vld [vmem:[#allocation32_spill] sm:$0xff] }
 0x1e0   : > { %v1639_v56 = vpop.f32.mrf.mxu0 }
 0x1e1   : > { %v1548_v40 = vpop.f32.mrf.mxu3 }
 0x1e2   : > { %v1549_v52 = vadd.f32 %v1548_v40, %v1316_v18  ;;  %v6028_v40 = vld [vmem:[%s6089_s27 + $0x30] sm:$0xff] }
 0x1e4   : > { %v7250_v63 = vadd.f32 %v1637_v7, %v1549_v52 }
 0x1e6   : > { %v1317_v22 = vpop.f32.mrf.mxu2 }
 0x1e7   : > { %v1318_v37 = vadd.f32 %v1317_v22, %v6884_v12 }
 0x1e8   : > { %v1642_v49 = vpop.f32.mrf.mxu0 }
 0x1e9   : > { %v1550_v29 = vpop.f32.mrf.mxu3 }
 0x1ea   : > { %v1551_v47 = vadd.f32 %v1550_v29, %v1318_v37 }
 0x1eb   : > { %1972 = vmatmul.bf16.gmra.mxu2 %v9656_v13  ;;  %2150 = vmatmul.bf16.gmra.mxu0 %v6914_v28  ;;  %v9713_v28 = vld [vmem:[#allocation46_spill] sm:$0xff] }
 0x1ec   : > { %v7255_v61 = vadd.f32 %v1639_v56, %v1551_v47  ;;  %v9715_v56 = vld [vmem:[#allocation22_spill] sm:$0xff]  ;;  %v9717_v47 = vld [vmem:[#allocation43_spill] sm:$0xff] }
 0x1ee   : > { %2061 = vmatmul.bf16.gmra.mxu3 %v6027_v51  ;;  %v1320_v41 = vpop.f32.mrf.mxu2 }
 0x1ef   : > { %v1321_v25 = vadd.f32 %v1320_v41, %v6907_v21 }
 0x1f0   : > { %v1644_v27 = vpop.f32.mrf.mxu0 }
 0x1f1   : > { %v1553_v11 = vpop.f32.mrf.mxu3 }
 0x1f2   : > { %v1554_v17 = vadd.f32 %v1553_v11, %v1321_v25 }
 0x1f4   : > { %v7259_v62 = vadd.f32 %v1642_v49, %v1554_v17  ;;  %v9718_v17 = vld [vmem:[#allocation50_spill] sm:$0xff] }
 0x1f6   : > { %v1322_v12 = vpop.f32.mrf.mxu2 }
 0x1f7   : > { %v1323_v7 = vadd.f32 %v1322_v12, %v6916_v59 }
 0x1f8   : > { %v1647_v13 = vpop.f32.mrf.mxu0 }
 0x1f9   : > { %v1555_v32 = vpop.f32.mrf.mxu3 }
 0x1fa   : > { %v1556_v43 = vadd.f32 %v1555_v32, %v1323_v7  ;;  %v9721_v7 = vld [vmem:[#allocation4_spill] sm:$0xff] }
 0x1fb   : > { %1977 = vmatmul.bf16.gmra.mxu2 %v9713_v28  ;;  %2155 = vmatmul.bf16.gmra.mxu0 %v9714_v20 }
 0x1fc   : > { %v7264_v18 = vadd.f32 %v1644_v27, %v1556_v43  ;;  %v9719_v27 = vld [vmem:[#allocation3_spill] sm:$0xff]  ;;  %v9722_v43 = vld [vmem:[#allocation41_spill] sm:$0xff] }
 0x1fe   : > { %2066 = vmatmul.bf16.gmra.mxu3 %v6028_v40  ;;  %v1325_v21 = vpop.f32.mrf.mxu2 }
 0x1ff   : > { %v1326_v52 = vadd.f32 %v1325_v21, %v9715_v56 }
 0x200   : > { %v1649_v37 = vpop.f32.mrf.mxu0 }
 0x201   : > { %v1558_v22 = vpop.f32.mrf.mxu3 }
 0x202   : > { %v1559_v29 = vadd.f32 %v1558_v22, %v1326_v52  ;;  %v9724_v52 = vld [vmem:[#allocation28_spill] sm:$0xff] }
 0x204   : > { %v7268_v49 = vadd.f32 %v1647_v13, %v1559_v29 }
 0x206   : > { %9716 = vst [vmem:[#allocation30_spill] sm:$0xff] %v7268_v49  ;;  %v1327_v59 = vpop.f32.mrf.mxu2 }
 0x207   : > { %v1328_v51 = vadd.f32 %v1327_v59, %v9717_v47 }
 0x208   : > { %v1652_v25 = vpop.f32.mrf.mxu0 }
 0x209   : > { %v1560_v41 = vpop.f32.mrf.mxu3 }
 0x20a   : > { %v1561_v11 = vadd.f32 %v1560_v41, %v1328_v51  ;;  %v9726_v51 = vld [vmem:[#allocation5_spill] sm:$0xff] }
 0x20b   : > { %1982 = vmatmul.bf16.gmra.mxu2 %v9718_v17  ;;  %2160 = vmatmul.bf16.gmra.mxu0 %v9719_v27 }
 0x20c   : > { %v7273_v12 = vadd.f32 %v1649_v37, %v1561_v11  ;;  %v9727_v11 = vld [vmem:[#allocation39_spill] sm:$0xff] }
 0x20e   : > { %9720 = vst [vmem:[#allocation25_spill] sm:$0xff] %v7273_v12  ;;  %2071 = vmatmul.bf16.gmra.mxu3 %v9721_v7  ;;  %v1330_v32 = vpop.f32.mrf.mxu2 }
 0x20f   : > { %v1331_v28 = vadd.f32 %v1330_v32, %v9722_v43 }
 0x210   : > { %v1654_v13 = vpop.f32.mrf.mxu0 }
 0x211   : > { %v1563_v20 = vpop.f32.mrf.mxu3 }
 0x212   : > { %v1564_v40 = vadd.f32 %v1563_v20, %v1331_v28  ;;  %v9729_v28 = vld [vmem:[#allocation8_spill] sm:$0xff] }
 0x214   : > { %v7277_v21 = vadd.f32 %v1652_v25, %v1564_v40 }
 0x216   : > { %9723 = vst [vmem:[#allocation20_spill] sm:$0xff] %v7277_v21  ;;  %v1332_v56 = vpop.f32.mrf.mxu2 }
 0x217   : > { %v1333_v22 = vadd.f32 %v1332_v56, %v9724_v52 }
 0x218   : > { %v1657_v59 = vpop.f32.mrf.mxu0 }
 0x219   : > { %v1565_v29 = vpop.f32.mrf.mxu3 }
 0x21a   : > { %v1566_v47 = vadd.f32 %v1565_v29, %v1333_v22 }
 0x21b   : > { %1987 = vmatmul.bf16.gmra.mxu2 %v9675_v50  ;;  %2165 = vmatmul.bf16.gmra.mxu0 %v6992_v39 }
 0x21c   : > { %v7282_v37 = vadd.f32 %v1654_v13, %v1566_v47  ;;  %v9731_v13 = vld [vmem:[#allocation12_spill] sm:$0xff] }
 0x21e   : > { %9725 = vst [vmem:[#allocation29_spill] sm:$0xff] %v7282_v37  ;;  %2076 = vmatmul.bf16.gmra.mxu3 %v9726_v51  ;;  %v1335_v41 = vpop.f32.mrf.mxu2  ;;  %v9732_v51 = vld [vmem:[#allocation6_spill] sm:$0xff] }
 0x21f   : > { %v1336_v17 = vadd.f32 %v1335_v41, %v9727_v11 }
 0x220   : > { %v1659_v25 = vpop.f32.mrf.mxu0 }
 0x221   : > { %v1568_v27 = vpop.f32.mrf.mxu3 }
 0x222   : > { %v1569_v7 = vadd.f32 %v1568_v27, %v1336_v17 }
 0x224   : > { %v7286_v32 = vadd.f32 %v1657_v59, %v1569_v7 }
 0x226   : > { %9728 = vst [vmem:[#allocation27_spill] sm:$0xff] %v7286_v32  ;;  %v1337_v43 = vpop.f32.mrf.mxu2 }
 0x227   : > { %v1338_v20 = vadd.f32 %v1337_v43, %v9729_v28 }
 0x228   : > { %v2131_v56 = vpop.f32.mrf.mxu0 }
 0x229   : > { %v1570_v40 = vpop.f32.mrf.mxu3 }
 0x22a   : > { %v1571_v50 = vadd.f32 %v1570_v40, %v1338_v20 }
 0x22b   : > { %1992 = vmatmul.bf16.gmra.mxu2 %v9683_v5  ;;  %2170 = vmatmul.bf16.gmra.mxu0 %v7025_v16  ;;  %v9734_v16 = vld [vmem:[#allocation13_spill] sm:$0xff] }
 0x22c   : > { %v7291_v39 = vadd.f32 %v1659_v25, %v1571_v50  ;;  %v9736_v25 = vld [vmem:[#allocation14_spill] sm:$0xff] }
 0x22e   : > { %9730 = vst [vmem:[#allocation37_spill] sm:$0xff] %v7291_v39  ;;  %2081 = vmatmul.bf16.gmra.mxu3 %v9731_v13  ;;  %v1953_v52 = vpop.f32.mrf.mxu2  ;;  %v9737_v13 = vld [vmem:[#allocation9_spill] sm:$0xff] }
 0x230   : > { %v2133_v47 = vpop.f32.mrf.mxu0 }
 0x231   : > { %v2042_v22 = vpop.f32.mrf.mxu3 }
 0x232   : > { %v2043_v29 = vadd.f32 %v2042_v22, %v1953_v52 }
 0x234   : > { %v2132_v59 = vadd.f32 %v2131_v56, %v2043_v29 }
 0x236   : > { %v7295_v41 = vadd.f32 %v2132_v59, %v9732_v51  ;;  %v1955_v11 = vpop.f32.mrf.mxu2 }
 0x238   : > { %9733 = vst [vmem:[#allocation31_spill] sm:$0xff] %v7295_v41  ;;  %v2136_v7 = vpop.f32.mrf.mxu0 }
 0x239   : > { %v2044_v17 = vpop.f32.mrf.mxu3 }
 0x23a   : > { %v2045_v27 = vadd.f32 %v2044_v17, %v1955_v11 }
 0x23b   : > { %1997 = vmatmul.bf16.gmra.mxu2 %v9691_v38  ;;  %2175 = vmatmul.bf16.gmra.mxu0 %v7049_v9  ;;  %v9739_v9 = vld [vmem:[#allocation11_spill] sm:$0xff] }
 0x23c   : > { %v2134_v43 = vadd.f32 %v2133_v47, %v2045_v27 }
 0x23e   : > { %v7300_v5 = vadd.f32 %v2134_v43, %v9734_v16  ;;  %2086 = vmatmul.bf16.gmra.mxu3 %v9736_v25  ;;  %v1958_v28 = vpop.f32.mrf.mxu2  ;;  %v9741_v16 = vld [vmem:[#allocation18_spill] sm:$0xff] }
 0x240   : > { %9735 = vst [vmem:[#allocation26_spill] sm:$0xff] %v7300_v5  ;;  %v2138_v56 = vpop.f32.mrf.mxu0 }
 0x241   : > { %v2047_v20 = vpop.f32.mrf.mxu3 }
 0x242   : > { %v2048_v40 = vadd.f32 %v2047_v20, %v1958_v28 }
 0x244   : > { %v2137_v50 = vadd.f32 %v2136_v7, %v2048_v40 }
 0x246   : > { %v7304_v52 = vadd.f32 %v2137_v50, %v9737_v13  ;;  %v1960_v22 = vpop.f32.mrf.mxu2 }
 0x248   : > { %9738 = vst [vmem:[#allocation35_spill] sm:$0xff] %v7304_v52  ;;  %v2141_v59 = vpop.f32.mrf.mxu0 }
 0x249   : > { %v2049_v29 = vpop.f32.mrf.mxu3 }
 0x24a   : > { %v2050_v47 = vadd.f32 %v2049_v29, %v1960_v22 }
 0x24b   : > { %2002 = vmatmul.bf16.gmra.mxu2 %v9698_v53  ;;  %2180 = vmatmul.bf16.gmra.mxu0 %v7082_v35  ;;  %v9743_v35 = vld [vmem:[#allocation10_spill] sm:$0xff] }
 0x24c   : > { %v2139_v38 = vadd.f32 %v2138_v56, %v2050_v47 }
 0x24e   : > { %v7309_v51 = vadd.f32 %v2139_v38, %v9739_v9  ;;  %2091 = vmatmul.bf16.gmra.mxu3 %v7114_v45  ;;  %v1963_v11 = vpop.f32.mrf.mxu2 }
 0x250   : > { %9740 = vst [vmem:[#allocation34_spill] sm:$0xff] %v7309_v51  ;;  %v2143_v7 = vpop.f32.mrf.mxu0 }
 0x251   : > { %v2052_v17 = vpop.f32.mrf.mxu3 }
 0x252   : > { %v2053_v27 = vadd.f32 %v2052_v17, %v1963_v11 }
 0x254   : > { %v2142_v43 = vadd.f32 %v2141_v59, %v2053_v27  ;;  %v9745_v59 = vld [vmem:[#allocation17_spill] sm:$0xff] }
 0x256   : > { %v7313_v25 = vadd.f32 %v2142_v43, %v9741_v16  ;;  %v1965_v28 = vpop.f32.mrf.mxu2 }
 0x258   : > { %9742 = vst [vmem:[#allocation33_spill] sm:$0xff] %v7313_v25  ;;  %v2146_v56 = vpop.f32.mrf.mxu0 }
 0x259   : > { %v2054_v20 = vpop.f32.mrf.mxu3 }
 0x25a   : > { %v2055_v40 = vadd.f32 %v2054_v20, %v1965_v28 }
 0x25b   : > { %2007 = vmatmul.bf16.gmra.mxu2 %v9706_v4  ;;  %2185 = vmatmul.bf16.gmra.mxu0 %v7106_v33  ;;  %v9746_v33 = vld [vmem:[#allocation16_spill] sm:$0xff] }
 0x25c   : > { %v2144_v53 = vadd.f32 %v2143_v7, %v2055_v40  ;;  %v9747_v40 = vld [vmem:[#allocation19_spill] sm:$0xff] }
 0x25e   : > { %v7318_v50 = vadd.f32 %v2144_v53, %v9743_v35  ;;  %2096 = vmatmul.bf16.gmra.mxu3 %v7149_v19  ;;  %v1968_v45 = vpop.f32.mrf.mxu2 }
 0x260   : > { %9744 = vst [vmem:[#allocation40_spill] sm:$0xff] %v7318_v50  ;;  %v2148_v29 = vpop.f32.mrf.mxu0 }
 0x261   : > { %v2057_v13 = vpop.f32.mrf.mxu3 }
 0x262   : > { %v2058_v22 = vadd.f32 %v2057_v13, %v1968_v45 }
 0x264   : > { %v2147_v47 = vadd.f32 %v2146_v56, %v2058_v22 }
 0x266   : > { %v7322_v38 = vadd.f32 %v2147_v47, %v9745_v59  ;;  %v1970_v9 = vpop.f32.mrf.mxu2 }
 0x268   : > { %v2151_v27 = vpop.f32.mrf.mxu0 }
 0x269   : > { %v2059_v11 = vpop.f32.mrf.mxu3 }
 0x26a   : > { %v2060_v17 = vadd.f32 %v2059_v11, %v1970_v9  ;;  %v9749_v11 = vld [vmem:[#allocation48_spill] sm:$0xff] }
 0x26b   : > { %2012 = vmatmul.bf16.gmra.mxu2 %v9711_v3  ;;  %2190 = vmatmul.bf16.gmra.mxu0 %v7141_v2 }
 0x26c   : > { %v2149_v4 = vadd.f32 %v2148_v29, %v2060_v17  ;;  %v9750_v17 = vld [vmem:[#allocation7_spill] sm:$0xff] }
 0x26e   : > { %v7327_v7 = vadd.f32 %v2149_v4, %v9746_v33  ;;  %2101 = vmatmul.bf16.gmra.mxu3 %v7178_v1  ;;  %v1973_v19 = vpop.f32.mrf.mxu2  ;;  %v9752_v33 = vld [vmem:[#allocation51_spill] sm:$0xff] }
 0x270   : > { %v7330_v28 = vpop.f32.mrf.mxu0 }
 0x271   : > { %v2062_v43 = vpop.f32.mrf.mxu3 }
 0x272   : > { %v2063_v16 = vadd.f32 %v2062_v43, %v1973_v19  ;;  %v9753_v19 = vld [vmem:[#allocation42_spill] sm:$0xff] }
 0x274   : > { %v2152_v20 = vadd.f32 %v2151_v27, %v2063_v16  ;;  %v9751_v27 = vld [vmem:[#allocation38_spill] sm:$0xff]  ;;  %v9754_v16 = vld [vmem:[#allocation44_spill] sm:$0xff] }
 0x275   : > { %v471_v4 = vsel %vm437_vm1, %v9751_v27, %v9750_v17 }
 0x276   : > { %v7333_v56 = vadd.f32 %v2152_v20, %v9747_v40  ;;  %v7335_v53 = vpop.f32.mrf.mxu2  ;;  %v579_v20 = vsel %vm177_vm3, %v9754_v16, %v471_v4 }
 0x278   : > { %v2156_v3 = vpop.f32.mrf.mxu0 }
 0x279   : > { %v7337_v35 = vpop.f32.mrf.mxu3 }
 0x27b   : > { %2017 = vmatmul.bf16.gmra.mxu2 %v9712_v30  ;;  %2195 = vmatmul.bf16.gmra.mxu0 %v7170_v0  ;;  %v9748_v30 = vld [vmem:[#allocation36_spill] sm:$0xff] }
 0x27c   : > { %v372_v0 = vsel %vm370_vm0, %v9749_v11, %v9748_v30 }
 0x27d   : > { %v506_v43 = vsel %vm174_vm2, %v9753_v19, %v372_v0 }
 0x27e   : > { %2106 = vmatmul.bf16.gmra.mxu3 %v7200_v26  ;;  %v1978_v2 = vpop.f32.mrf.mxu2 }
 0x280   : > { %v7342_v13 = vpop.f32.mrf.mxu0 }
 0x281   : > { %v2067_v1 = vpop.f32.mrf.mxu3 }
 0x282   : > { %v2068_v45 = vadd.f32 %v2067_v1, %v1978_v2  ;;  %v542_v2 = vpack.c.bf16 %v506_v43, %v506_v43  ;;  %v615_v1 = vpack.c.bf16 %v579_v20, %v579_v20 }
 0x284   : > { %v2157_v22 = vadd.f32 %v2156_v3, %v2068_v45  ;;  %v686_v11 = vunpack.c.l.b16 %v542_v2 }
 0x286   : > { %v7345_v29 = vadd.f32 %v2157_v22, %v7166_v14  ;;  %v7347_v47 = vpop.f32.mrf.mxu2  ;;  %v6029_v14 = vld [vmem:[%s6089_s27 + $0x78] sm:$0xff] }
 0x288   : > { %v2161_v9 = vpop.f32.mrf.mxu0 }
 0x289   : > { %v7349_v59 = vpop.f32.mrf.mxu3 }
 0x28b   : > { %2022 = vmatmul.bf16.gmra.mxu2 %v9752_v33  ;;  %2200 = vmatmul.bf16.gmra.mxu0 %v7196_v60  ;;  %v795_v60 = vunpack.c.l.b16 %v615_v1  ;;  %v9755_v33 = vld [vmem:[#allocation45_spill] sm:$0xff] }
 0x28d   : > { %v813_v4 = vpack.c.b16 %v795_v60, %v7164_v23 }
 0x28e   : > { %2111 = vmatmul.bf16.gmra.mxu3 %v6029_v14  ;;  %v1983_v40 = vpop.f32.mrf.mxu2  ;;  %v705_v14 = vpack.c.b16 %v9755_v33, %v686_v11 }
 0x290   : > { %v7368_v22 = vpop.f32.mrf.mxu0 }
 0x291   : > { %v2072_v3 = vpop.f32.mrf.mxu3 }
 0x292   : > { %v2073_v45 = vadd.f32 %v2072_v3, %v1983_v40 }
 0x294   : > { %v2162_v30 = vadd.f32 %v2161_v9, %v2073_v45  ;;  %v5851_v9 = vld [vmem:[%s9453_s2 + $0xf8] sm:$0xff] }
 0x295   : > { %3351 = vmatpush.bf16.msra.mxu1 %v5851_v9 }
 0x296   : > { %v7371_v17 = vadd.f32 %v2162_v30, %v7193_v34  ;;  %v7373_v27 = vpop.f32.mrf.mxu2 }
 0x298   : > { %v2166_v19 = vpop.f32.mrf.mxu0 }
 0x299   : > { %v7375_v0 = vpop.f32.mrf.mxu3 }
 0x29b   : > { %2027 = vmatmul.bf16.gmra.mxu2 %v705_v14  ;;  %2205 = vmatmul.bf16.gmra.mxu0 %v813_v4 }
 0x29e   : > { %2116 = vmatmul.bf16.gmra.mxu3 %v7200_v26  ;;  %v1988_v43 = vpop.f32.mrf.mxu2 }
 0x2a0   : > { %v7383_v20 = vpop.f32.mrf.mxu0 }
 0x2a1   : > { %v2077_v34 = vpop.f32.mrf.mxu3 }
 0x2a2   : > { %v2078_v16 = vadd.f32 %v2077_v34, %v1988_v43 }
 0x2a4   : > { %v2167_v40 = vadd.f32 %v2166_v19, %v2078_v16 }
 0x2a6   : > { %v7386_v3 = vadd.f32 %v2167_v40, %v7210_v10  ;;  %v7388_v23 = vpop.f32.mrf.mxu2  ;;  %v5850_v10 = vld [vmem:[%s9453_s2 + $0xf0] sm:$0xff] }
 0x2a7   : > { %3352 = vmatpush.bf16.msra.mxu1 %v5850_v10 }
 0x2a8   : > { %v2171_v1 = vpop.f32.mrf.mxu0 }
 0x2a9   : > { %v2079_v2 = vpop.f32.mrf.mxu3 }
 0x2ae   : > { %v1993_v45 = vpop.f32.mrf.mxu2 }
 0x2b0   : > { %v7390_v11 = vpop.f32.mrf.mxu0 }
 0x2b1   : > { %v2082_v26 = vpop.f32.mrf.mxu3 }
 0x2b2   : > { %v2083_v30 = vadd.f32 %v2082_v26, %v1993_v45  ;;  %v7400_v45 = vpop.f32.mrf.mxu1 }
 0x2b4   : > { %v2172_v60 = vadd.f32 %v2171_v1, %v2083_v30 }
 0x2b6   : > { %v7393_v33 = vadd.f32 %v2172_v60, %v7221_v42  ;;  %v1995_v14 = vpop.f32.mrf.mxu2 }
 0x2b8   : > { %v2176_v43 = vpop.f32.mrf.mxu0 }
 0x2b9   : > { %v2084_v4 = vpop.f32.mrf.mxu3 }
 0x2ba   : > { %v7405_v60 = vpop.f32.mrf.mxu1 }
 0x2be   : > { %v1998_v19 = vpop.f32.mrf.mxu2 }
 0x2c0   : > { %v7398_v16 = vpop.f32.mrf.mxu0 }
 0x2c1   : > { %v2087_v9 = vpop.f32.mrf.mxu3 }
 0x2c2   : > { %v2088_v34 = vadd.f32 %v2087_v9, %v1998_v19  ;;  %v7412_v10 = vpop.f32.mrf.mxu1 }
 0x2c4   : > { %v2177_v40 = vadd.f32 %v2176_v43, %v2088_v34 }
 0x2c6   : > { %v7403_v1 = vadd.f32 %v2177_v40, %v7230_v48  ;;  %v2000_v42 = vpop.f32.mrf.mxu2  ;;  %v2243_v40 = vadd.f32 %v7300_v5, %v7295_v41 }
 0x2c8   : > { %v2181_v30 = vpop.f32.mrf.mxu0  ;;  %v2244_v37 = vadd.f32 %v2243_v40, %v7304_v52 }
 0x2c9   : > { %v2089_v26 = vpop.f32.mrf.mxu3 }
 0x2ca   : > { %v2245_v21 = vadd.f32 %v2244_v37, %v7309_v51  ;;  %v7426_v12 = vpop.f32.mrf.mxu1  ;;  %v2070_v37 = vadd.f32 %v7349_v59, %v7347_v47 }
 0x2ce   : > { %v2003_v15 = vpop.f32.mrf.mxu2 }
 0x2d0   : > { %v7407_v32 = vpop.f32.mrf.mxu0 }
 0x2d1   : > { %v2092_v6 = vpop.f32.mrf.mxu3 }
 0x2d2   : > { %v2093_v39 = vadd.f32 %v2092_v6, %v2003_v15  ;;  %v2065_v6 = vadd.f32 %v7337_v35, %v7335_v53  ;;  %v9756_v53 = vld [vmem:[#allocation15_spill] sm:$0xff]  ;;  %v9757_v35 = vld [vmem:[#allocation24_spill] sm:$0xff] }
 0x2d3   : > { %v1694_v51 = vadd.f32 %v9757_v35, %v9756_v53  ;;  %v2085_v35 = vadd.f32 %v2084_v4, %v1995_v14 }
 0x2d4   : > { %v2182_v19 = vadd.f32 %v2181_v30, %v2093_v39  ;;  %v2246_v30 = vadd.f32 %v2245_v21, %v7313_v25  ;;  %v2154_v40 = vadd.f32 %v7330_v28, %v2065_v6  ;;  %v2159_v21 = vadd.f32 %v7342_v13, %v2070_v37  ;;  %v9758_v28 = vld [vmem:[#allocation21_spill] sm:$0xff]  ;;  %v9759_v6 = vld [vmem:[#allocation23_spill] sm:$0xff]  ;;  %v1733_v13 = vpop.f32.mrf.mxu1 }
 0x2d5   : > { %v1699_v25 = vadd.f32 %v9759_v6, %v9758_v28  ;;  %v1714_v6 = vadd.f32 %v7219_v57, %v7226_v44 }
 0x2d6   : > { %v7410_v9 = vadd.f32 %v2182_v19, %v7241_v24  ;;  %v2005_v43 = vpop.f32.mrf.mxu2  ;;  %v5849_v24 = vld [vmem:[%s9453_s2 + $0xe8] sm:$0xff]  ;;  %v2247_v5 = vadd.f32 %v2246_v30, %v7318_v50  ;;  %v7436_v49 = vadd.f32 %v2154_v40, %v1694_v51  ;;  %v2080_v51 = vadd.f32 %v2079_v2, %v7388_v23 }
 0x2d7   : > { %3353 = vmatpush.bf16.msra.mxu1 %v5849_v24  ;;  %v2075_v24 = vadd.f32 %v7375_v0, %v7373_v27  ;;  %v1704_v27 = vadd.f32 %v7191_v54, %v7203_v31  ;;  %v2174_v31 = vadd.f32 %v7390_v11, %v2085_v35 }
 0x2d8   : > { %v7414_v48 = vpop.f32.mrf.mxu0  ;;  %v2248_v52 = vadd.f32 %v2247_v5, %v7322_v38  ;;  %v7445_v5 = vadd.f32 %v2159_v21, %v1699_v25 }
 0x2d9   : > { %v2094_v34 = vpop.f32.mrf.mxu3 }
 0x2da   : > { %v2249_v41 = vadd.f32 %v2248_v52, %v7327_v7  ;;  %v2164_v52 = vadd.f32 %v7368_v22, %v2075_v24  ;;  %v1709_v22 = vadd.f32 %v7208_v8, %v7215_v58  ;;  %v2090_v24 = vadd.f32 %v2089_v26, %v2000_v42 }
 0x2db   : > { %v2095_v58 = vadd.f32 %v2094_v34, %v2005_v43 }
 0x2dc   : > { %v2250_v47 = vadd.f32 %v2249_v41, %v7333_v56  ;;  %v7453_v37 = vadd.f32 %v2164_v52, %v1704_v27  ;;  %v2169_v41 = vadd.f32 %v7383_v20, %v2080_v51  ;;  %v1736_v14 = vpop.f32.mrf.mxu1  ;;  %v2179_v8 = vadd.f32 %v7398_v16, %v2090_v24  ;;  %v9760_v24 = vld [vmem:[#allocation30_spill] sm:$0xff] }
 0x2dd   : > { %v1719_v51 = vadd.f32 %v7233_v46, %v7237_v36  ;;  %v2184_v27 = vadd.f32 %v7407_v32, %v2095_v58  ;;  %v1724_v16 = vadd.f32 %v7400_v45, %v7246_v55  ;;  %v1727_v46 = vadd.f32 %v7405_v60, %v7250_v63  ;;  %v5848_v32 = vld [vmem:[%s9453_s2 + $0xe0] sm:$0xff] }
 0x2de   : > { %v2008_v15 = vpop.f32.mrf.mxu2  ;;  %v2251_v53 = vadd.f32 %v2250_v47, %v7436_v49  ;;  %v7460_v54 = vadd.f32 %v2169_v41, %v1709_v22  ;;  %v7467_v47 = vadd.f32 %v2174_v31, %v1714_v6  ;;  %v1729_v55 = vadd.f32 %v7412_v10, %v7255_v61  ;;  %3354 = vmatpush.bf16.msra.mxu1 %v5848_v32  ;;  %v9763_v32 = vld [vmem:[#allocation29_spill] sm:$0xff] }
 0x2df   : > { %v7474_v44 = vadd.f32 %v2179_v8, %v1719_v51  ;;  %v1734_v61 = vadd.f32 %v1733_v13, %v7264_v18 }
 0x2e0   : > { %v2188_v19 = vpop.f32.mrf.mxu0  ;;  %v2252_v0 = vadd.f32 %v2251_v53, %v7345_v29 }
 0x2e1   : > { %v2097_v39 = vpop.f32.mrf.mxu3 }
 0x2e2   : > { %v2253_v40 = vadd.f32 %v2252_v0, %v7445_v5  ;;  %v2098_v42 = vadd.f32 %v2097_v39, %v2008_v15  ;;  %v7484_v15 = vadd.f32 %v2184_v27, %v1724_v16 }
 0x2e4   : > { %v2254_v23 = vadd.f32 %v2253_v40, %v7371_v17  ;;  %v2187_v34 = vadd.f32 %v7414_v48, %v2098_v42 }
 0x2e6   : > { %v2010_v30 = vpop.f32.mrf.mxu2  ;;  %v2255_v21 = vadd.f32 %v2254_v23, %v7453_v37 }
 0x2e8   : > { %v2191_v59 = vpop.f32.mrf.mxu0  ;;  %v2256_v20 = vadd.f32 %v2255_v21, %v7386_v3 }
 0x2e9   : > { %v2099_v50 = vpop.f32.mrf.mxu3 }
 0x2ea   : > { %v2257_v4 = vadd.f32 %v2256_v20, %v7460_v54  ;;  %v2100_v0 = vadd.f32 %v2099_v50, %v2010_v30  ;;  %v1738_v50 = vpop.f32.mrf.mxu1  ;;  %v7492_v30 = vadd.f32 %v2187_v34, %v1727_v46 }
 0x2ec   : > { %v2258_v11 = vadd.f32 %v2257_v4, %v7393_v33  ;;  %v2189_v39 = vadd.f32 %v2188_v19, %v2100_v0  ;;  %v1732_v19 = vadd.f32 %v7426_v12, %v7259_v62  ;;  %v9762_v0 = vld [vmem:[#allocation20_spill] sm:$0xff] }
 0x2ee   : > { %v2013_v28 = vpop.f32.mrf.mxu2  ;;  %v2259_v57 = vadd.f32 %v2258_v11, %v7467_v47  ;;  %v7497_v22 = vadd.f32 %v2189_v39, %v1729_v55 }
 0x2f0   : > { %v2193_v2 = vpop.f32.mrf.mxu0  ;;  %v2260_v43 = vadd.f32 %v2259_v57, %v7403_v1 }
 0x2f1   : > { %v2102_v25 = vpop.f32.mrf.mxu3 }
 0x2f2   : > { %v2103_v40 = vadd.f32 %v2102_v25, %v2013_v28  ;;  %v2261_v36 = vadd.f32 %v2260_v43, %v7474_v44 }
 0x2f4   : > { %v2262_v48 = vadd.f32 %v2261_v36, %v7410_v9  ;;  %v2192_v63 = vadd.f32 %v2191_v59, %v2103_v40  ;;  %v1737_v59 = vadd.f32 %v1736_v14, %v9760_v24 }
 0x2f6   : > { %v2015_v53 = vpop.f32.mrf.mxu2  ;;  %v2263_v25 = vadd.f32 %v2262_v48, %v7484_v15  ;;  %v7501_v21 = vadd.f32 %v2192_v63, %v1732_v19 }
 0x2f8   : > { %v2196_v26 = vpop.f32.mrf.mxu0  ;;  %v2264_v10 = vadd.f32 %v2263_v25, %v7492_v30 }
 0x2f9   : > { %v2104_v52 = vpop.f32.mrf.mxu3 }
 0x2fa   : > { %v2105_v41 = vadd.f32 %v2104_v52, %v2015_v53  ;;  %v2265_v6 = vadd.f32 %v2264_v10, %v7497_v22  ;;  %v9761_v53 = vld [vmem:[#allocation25_spill] sm:$0xff] }
 0x2fb   : > { %v1739_v18 = vadd.f32 %v1738_v50, %v9761_v53 }
 0x2fc   : > { %v2194_v23 = vadd.f32 %v2193_v2, %v2105_v41  ;;  %v2266_v12 = vadd.f32 %v2265_v6, %v7501_v21  ;;  %v1741_v2 = vpop.f32.mrf.mxu1 }
 0x2fd   : > { %v1742_v16 = vadd.f32 %v1741_v2, %v9762_v0 }
 0x2fe   : > { %v2018_v35 = vpop.f32.mrf.mxu2  ;;  %v7505_v20 = vadd.f32 %v2194_v23, %v1734_v61  ;;  %v9764_v23 = vld [vmem:[#allocation27_spill] sm:$0xff] }
 0x300   : > { %v2198_v28 = vpop.f32.mrf.mxu0  ;;  %v2267_v13 = vadd.f32 %v2266_v12, %v7505_v20 }
 0x301   : > { %v2107_v45 = vpop.f32.mrf.mxu3 }
 0x302   : > { %v2108_v60 = vadd.f32 %v2107_v45, %v2018_v35 }
 0x304   : > { %v2197_v31 = vadd.f32 %v2196_v26, %v2108_v60  ;;  %v1743_v34 = vpop.f32.mrf.mxu1 }
 0x305   : > { %v1744_v55 = vadd.f32 %v1743_v34, %v9763_v32 }
 0x306   : > { %v2020_v4 = vpop.f32.mrf.mxu2  ;;  %v2237_v8 = vadd.f32 %v2197_v31, %v1737_v59 }
 0x308   : > { %v2201_v51 = vpop.f32.mrf.mxu0  ;;  %v2268_v11 = vadd.f32 %v2267_v13, %v2237_v8 }
 0x309   : > { %v2109_v62 = vpop.f32.mrf.mxu3 }
 0x30a   : > { %v2110_v58 = vadd.f32 %v2109_v62, %v2020_v4 }
 0x30c   : > { %v2199_v52 = vadd.f32 %v2198_v28, %v2110_v58  ;;  %v1746_v48 = vpop.f32.mrf.mxu1  ;;  %v9765_v58 = vld [vmem:[#allocation37_spill] sm:$0xff] }
 0x30d   : > { %v1747_v61 = vadd.f32 %v1746_v48, %v9764_v23  ;;  %v9770_v48 = vld [vmem:[#allocation33_spill] sm:$0xff] }
 0x30e   : > { %v2238_v42 = vadd.f32 %v2199_v52, %v1739_v18  ;;  %v2023_v26 = vpop.f32.mrf.mxu2 }
 0x310   : > { %v2269_v14 = vadd.f32 %v2268_v11, %v2238_v42  ;;  %v2203_v46 = vpop.f32.mrf.mxu0 }
 0x311   : > { %v2112_v57 = vpop.f32.mrf.mxu3 }
 0x312   : > { %v2113_v27 = vadd.f32 %v2112_v57, %v2023_v26 }
 0x314   : > { %v2202_v43 = vadd.f32 %v2201_v51, %v2113_v27  ;;  %v1748_v6 = vpop.f32.mrf.mxu1 }
 0x315   : > { %v1749_v2 = vadd.f32 %v1748_v6, %v9765_v58 }
 0x316   : > { %v2239_v40 = vadd.f32 %v2202_v43, %v1742_v16  ;;  %v2025_v39 = vpop.f32.mrf.mxu2 }
 0x318   : > { %v2270_v36 = vadd.f32 %v2269_v14, %v2239_v40  ;;  %v2206_v28 = vpop.f32.mrf.mxu0 }
 0x319   : > { %v2114_v41 = vpop.f32.mrf.mxu3 }
 0x31a   : > { %v2115_v35 = vadd.f32 %v2114_v41, %v2025_v39  ;;  %v9766_v39 = vld [vmem:[#allocation31_spill] sm:$0xff] }
 0x31c   : > { %v2204_v50 = vadd.f32 %v2203_v46, %v2115_v35 }
 0x31e   : > { %v2240_v45 = vadd.f32 %v2204_v50, %v1744_v55  ;;  %v2028_v60 = vpop.f32.mrf.mxu2  ;;  %v9769_v50 = vld [vmem:[#allocation34_spill] sm:$0xff] }
 0x320   : > { %v2271_v63 = vadd.f32 %v2270_v36, %v2240_v45  ;;  %v2208_v12 = vpop.f32.mrf.mxu0 }
 0x321   : > { %v2117_v19 = vpop.f32.mrf.mxu3 }
 0x322   : > { %v2118_v25 = vadd.f32 %v2117_v19, %v2028_v60  ;;  %v9771_v19 = vld [vmem:[#allocation40_spill] sm:$0xff] }
 0x324   : > { %v2207_v10 = vadd.f32 %v2206_v28, %v2118_v25 }
 0x326   : > { %v2241_v31 = vadd.f32 %v2207_v10, %v1747_v61  ;;  %v2030_v59 = vpop.f32.mrf.mxu2 }
 0x328   : > { %v2272_v24 = vadd.f32 %v2271_v63, %v2241_v31 }
 0x329   : > { %v2119_v4 = vpop.f32.mrf.mxu3 }
 0x32a   : > { %v2120_v62 = vadd.f32 %v2119_v4, %v2030_v59 }
 0x32c   : > { %v2209_v53 = vadd.f32 %v2208_v12, %v2120_v62 }
 0x32e   : > { %v2242_v18 = vadd.f32 %v2209_v53, %v1749_v2 }
 0x330   : > { %v2273_v13 = vadd.f32 %v2272_v24, %v2242_v18 }
 0x332   : > { %v2274_v52 = vrot.slane %v2273_v13, 4 }
 0x334   : > { %v2275_v51 = vadd.f32 %v2274_v52, %v2273_v13 }
 0x336   : > { %v2276_v11 = vrot.slane %v2275_v51, 2 }
 0x338   : > { %v2277_v14 = vadd.f32 %v2276_v11, %v2275_v51 }
 0x33a   : > { %v2278_v26 = vrot.slane %v2277_v14, 1 }
 0x33c   : > { %v2279_v57 = vadd.f32 %v2278_v26, %v2277_v14 }
 0x33e   : > { %v7514_v27 = vmul.f32 0.00390625, %v2279_v57 }
 0x340   : > { %v7517_v0 = vsub.f32 %v2237_v8, %v7514_v27  ;;  %v7520_v16 = vsub.f32 %v2238_v42, %v7514_v27  ;;  %v7523_v43 = vsub.f32 %v2239_v40, %v7514_v27  ;;  %v7526_v34 = vsub.f32 %v2240_v45, %v7514_v27  ;;  %v9767_v8 = vld [vmem:[#allocation26_spill] sm:$0xff]  ;;  %v9768_v40 = vld [vmem:[#allocation35_spill] sm:$0xff] }
 0x341   : > { %v7529_v46 = vsub.f32 %v2241_v31, %v7514_v27  ;;  %v7532_v36 = vsub.f32 %v2242_v18, %v7514_v27  ;;  %v7536_v41 = vsub.f32 %v9766_v39, %v7514_v27  ;;  %v7540_v42 = vsub.f32 %v9767_v8, %v7514_v27 }
 0x342   : > { %v7544_v35 = vsub.f32 %v9768_v40, %v7514_v27  ;;  %v7552_v45 = vsub.f32 %v9769_v50, %v7514_v27  ;;  %v7556_v63 = vsub.f32 %v9770_v48, %v7514_v27  ;;  %v7562_v25 = vsub.f32 %v9771_v19, %v7514_v27 }
 0x343   : > { %v2313_v32 = vmul.f32 %v7536_v41, %v7536_v41  ;;  %v2314_v55 = vmul.f32 %v7540_v42, %v7540_v42  ;;  %v7568_v10 = vsub.f32 %v7322_v38, %v7514_v27  ;;  %v7574_v59 = vsub.f32 %v7327_v7, %v7514_v27 }
 0x344   : > { %v2315_v60 = vmul.f32 %v7544_v35, %v7544_v35  ;;  %v2316_v23 = vmul.f32 %v7552_v45, %v7552_v45  ;;  %v2317_v31 = vmul.f32 %v7556_v63, %v7556_v63  ;;  %v2318_v6 = vmul.f32 %v7562_v25, %v7562_v25 }
 0x345   : > { %v2345_v28 = vadd.f32 %v2314_v55, %v2313_v32  ;;  %v7580_v62 = vsub.f32 %v7333_v56, %v7514_v27  ;;  %v2319_v38 = vmul.f32 %v7568_v10, %v7568_v10  ;;  %v7586_v58 = vsub.f32 %v7436_v49, %v7514_v27 }
 0x346   : > { %v2320_v7 = vmul.f32 %v7574_v59, %v7574_v59  ;;  %v7592_v53 = vsub.f32 %v7345_v29, %v7514_v27  ;;  %v7598_v13 = vsub.f32 %v7445_v5, %v7514_v27  ;;  %v7604_v51 = vsub.f32 %v7371_v17, %v7514_v27 }
 0x347   : > { %v2346_v61 = vadd.f32 %v2345_v28, %v2315_v60  ;;  %v2321_v56 = vmul.f32 %v7580_v62, %v7580_v62  ;;  %v2322_v49 = vmul.f32 %v7586_v58, %v7586_v58  ;;  %v7610_v14 = vsub.f32 %v7453_v37, %v7514_v27 }
 0x348   : > { %v2323_v29 = vmul.f32 %v7592_v53, %v7592_v53  ;;  %v2324_v5 = vmul.f32 %v7598_v13, %v7598_v13  ;;  %v7616_v57 = vsub.f32 %v7386_v3, %v7514_v27  ;;  %v2325_v17 = vmul.f32 %v7604_v51, %v7604_v51 }
 0x349   : > { %v2347_v24 = vadd.f32 %v2346_v61, %v2316_v23  ;;  %v7622_v8 = vsub.f32 %v7460_v54, %v7514_v27  ;;  %v2326_v37 = vmul.f32 %v7610_v14, %v7610_v14  ;;  %v7628_v32 = vsub.f32 %v7393_v33, %v7514_v27 }
 0x34a   : > { %v2327_v3 = vmul.f32 %v7616_v57, %v7616_v57  ;;  %v7634_v50 = vsub.f32 %v7467_v47, %v7514_v27  ;;  %v7640_v60 = vsub.f32 %v7403_v1, %v7514_v27  ;;  %v7646_v19 = vsub.f32 %v7474_v44, %v7514_v27 }
 0x34b   : > { %v2348_v4 = vadd.f32 %v2347_v24, %v2317_v31  ;;  %v2328_v54 = vmul.f32 %v7622_v8, %v7622_v8  ;;  %v2329_v33 = vmul.f32 %v7628_v32, %v7628_v32  ;;  %v7652_v61 = vsub.f32 %v7410_v9, %v7514_v27 }
 0x34c   : > { %v2330_v47 = vmul.f32 %v7634_v50, %v7634_v50  ;;  %v2331_v1 = vmul.f32 %v7640_v60, %v7640_v60  ;;  %v7658_v24 = vsub.f32 %v7484_v15, %v7514_v27  ;;  %v2332_v44 = vmul.f32 %v7646_v19, %v7646_v19 }
 0x34d   : > { %v2349_v12 = vadd.f32 %v2348_v4, %v2318_v6  ;;  %v7664_v4 = vsub.f32 %v7492_v30, %v7514_v27  ;;  %v2333_v9 = vmul.f32 %v7652_v61, %v7652_v61 }
 0x34e   : > { %v2334_v15 = vmul.f32 %v7658_v24, %v7658_v24 }
 0x34f   : > { %v2350_v2 = vadd.f32 %v2349_v12, %v2319_v38  ;;  %v7670_v12 = vsub.f32 %v7497_v22, %v7514_v27  ;;  %v2335_v30 = vmul.f32 %v7664_v4, %v7664_v4 }
 0x351   : > { %v2351_v18 = vadd.f32 %v2350_v2, %v2320_v7  ;;  %v7676_v2 = vsub.f32 %v7501_v21, %v7514_v27  ;;  %v2336_v22 = vmul.f32 %v7670_v12, %v7670_v12 }
 0x353   : > { %v2352_v52 = vadd.f32 %v2351_v18, %v2321_v56  ;;  %v7682_v18 = vsub.f32 %v7505_v20, %v7514_v27  ;;  %v2340_v20 = vmul.f32 %v7520_v16, %v7520_v16 }
 0x355   : > { %v2353_v11 = vadd.f32 %v2352_v52, %v2322_v49  ;;  %v2337_v52 = vmul.f32 %v7676_v2, %v7676_v2  ;;  %v2338_v21 = vmul.f32 %v7682_v18, %v7682_v18 }
 0x357   : > { %v2354_v26 = vadd.f32 %v2353_v11, %v2323_v29 }
 0x359   : > { %v2355_v39 = vadd.f32 %v2354_v26, %v2324_v5  ;;  %v2339_v5 = vmul.f32 %v7517_v0, %v7517_v0 }
 0x35b   : > { %v2356_v40 = vadd.f32 %v2355_v39, %v2325_v17  ;;  %v2341_v17 = vmul.f32 %v7523_v43, %v7523_v43 }
 0x35d   : > { %v2357_v55 = vadd.f32 %v2356_v40, %v2326_v37  ;;  %v2342_v37 = vmul.f32 %v7526_v34, %v7526_v34 }
 0x35f   : > { %v2358_v48 = vadd.f32 %v2357_v55, %v2327_v3  ;;  %v2343_v3 = vmul.f32 %v7529_v46, %v7529_v46 }
 0x361   : > { %v2359_v28 = vadd.f32 %v2358_v48, %v2328_v54  ;;  %v2344_v54 = vmul.f32 %v7532_v36, %v7532_v36 }
 0x363   : > { %v2360_v23 = vadd.f32 %v2359_v28, %v2329_v33 }
 0x365   : > { %v2361_v31 = vadd.f32 %v2360_v23, %v2330_v47 }
 0x367   : > { %v2362_v6 = vadd.f32 %v2361_v31, %v2331_v1  ;;  %v5859_v31 = vld [vmem:[%s9453_s2 + $0x138] sm:$0xff] }
 0x368   : > { %3440 = vmatpush.bf16.msrb.mxu2 %v5859_v31 }
 0x369   : > { %v2363_v38 = vadd.f32 %v2362_v6, %v2332_v44 }
 0x36b   : > { %v2364_v7 = vadd.f32 %v2363_v38, %v2333_v9  ;;  %v5858_v9 = vld [vmem:[%s9453_s2 + $0x130] sm:$0xff] }
 0x36c   : > { %3441 = vmatpush.bf16.msrb.mxu2 %v5858_v9  ;;  %v5821_v9 = vld [vmem:[%s9453_s2 + $0x8] sm:$0xff] }
 0x36d   : > { %v2365_v56 = vadd.f32 %v2364_v7, %v2334_v15  ;;  %v5857_v7 = vld [vmem:[%s9453_s2 + $0x128] sm:$0xff] }
 0x36f   : > { %v2366_v49 = vadd.f32 %v2365_v56, %v2335_v30  ;;  %v5856_v30 = vld [vmem:[%s9453_s2 + $0x120] sm:$0xff]  ;;  %v5867_v56 = vld [vmem:[%s9453_s2 + $0x178] sm:$0xff] }
 0x370   : > { %3442 = vmatpush.bf16.msrb.mxu2 %v5857_v7  ;;  %3529 = vmatpush.bf16.msrb.mxu3 %v5867_v56  ;;  %v5844_v7 = vld [vmem:[%s9453_s2 + $0xc0] sm:$0xff] }
 0x371   : > { %v2367_v29 = vadd.f32 %v2366_v49, %v2336_v22  ;;  %v5827_v22 = vld [vmem:[%s9453_s2 + $0x38] sm:$0xff]  ;;  %v5820_v56 = vld [vmem:[%s9453_s2] sm:$0xff] }
 0x372   : > { %3762 = vmatpush.bf16.msrb.mxu0 %v5827_v22 }
 0x373   : > { %v2368_v11 = vadd.f32 %v2367_v29, %v2337_v52  ;;  %v5855_v52 = vld [vmem:[%s9453_s2 + $0x118] sm:$0xff]  ;;  %v5866_v29 = vld [vmem:[%s9453_s2 + $0x170] sm:$0xff] }
 0x374   : > { %3443 = vmatpush.bf16.msrb.mxu2 %v5856_v30  ;;  %3530 = vmatpush.bf16.msrb.mxu3 %v5866_v29  ;;  %v5860_v30 = vld [vmem:[%s9453_s2 + $0x140] sm:$0xff] }
 0x375   : > { %v2369_v26 = vadd.f32 %v2368_v11, %v2338_v21  ;;  %v5826_v21 = vld [vmem:[%s9453_s2 + $0x30] sm:$0xff] }
 0x376   : > { %3763 = vmatpush.bf16.msrb.mxu0 %v5826_v21 }
 0x377   : > { %v2370_v27 = vadd.f32 %v2369_v26, %v2339_v5  ;;  %v5854_v26 = vld [vmem:[%s9453_s2 + $0x110] sm:$0xff] }
 0x378   : > { %3444 = vmatpush.bf16.msrb.mxu2 %v5855_v52 }
 0x379   : > { %v2371_v39 = vadd.f32 %v2370_v27, %v2340_v20  ;;  %v5865_v20 = vld [vmem:[%s9453_s2 + $0x168] sm:$0xff] }
 0x37a   : > { %v5825_v27 = vld [vmem:[%s9453_s2 + $0x28] sm:$0xff]  ;;  %3531 = vmatpush.bf16.msrb.mxu3 %v5865_v20 }
 0x37b   : > { %v2372_v40 = vadd.f32 %v2371_v39, %v2341_v17  ;;  %3764 = vmatpush.bf16.msrb.mxu0 %v5825_v27  ;;  %v5853_v39 = vld [vmem:[%s9453_s2 + $0x108] sm:$0xff] }
 0x37c   : > { %3445 = vmatpush.bf16.msrb.mxu2 %v5854_v26 }
 0x37d   : > { %v2373_v55 = vadd.f32 %v2372_v40, %v2342_v37  ;;  %v5864_v37 = vld [vmem:[%s9453_s2 + $0x160] sm:$0xff] }
 0x37e   : > { %v5824_v40 = vld [vmem:[%s9453_s2 + $0x20] sm:$0xff]  ;;  %3532 = vmatpush.bf16.msrb.mxu3 %v5864_v37 }
 0x37f   : > { %v2374_v48 = vadd.f32 %v2373_v55, %v2343_v3  ;;  %3765 = vmatpush.bf16.msrb.mxu0 %v5824_v40  ;;  %v5847_v55 = vld [vmem:[%s9453_s2 + $0xd8] sm:$0xff] }
 0x380   : > { %3446 = vmatpush.bf16.msrb.mxu2 %v5853_v39  ;;  %3355 = vmatpush.bf16.msra.mxu1 %v5847_v55 }
 0x381   : > { %v2375_v33 = vadd.f32 %v2374_v48, %v2344_v54  ;;  %v5852_v54 = vld [vmem:[%s9453_s2 + $0x100] sm:$0xff]  ;;  %v5863_v48 = vld [vmem:[%s9453_s2 + $0x158] sm:$0xff] }
 0x382   : > { %3533 = vmatpush.bf16.msrb.mxu3 %v5863_v48 }
 0x383   : > { %v2376_v28 = vrot.slane %v2375_v33, 4 }
 0x384   : > { %3447 = vmatpush.bf16.msrb.mxu2 %v5852_v54 }
 0x385   : > { %v2377_v47 = vadd.f32 %v2376_v28, %v2375_v33  ;;  %v5823_v33 = vld [vmem:[%s9453_s2 + $0x18] sm:$0xff] }
 0x386   : > { %3766 = vmatpush.bf16.msrb.mxu0 %v5823_v33 }
 0x387   : > { %v2378_v23 = vrot.slane %v2377_v47, 2 }
 0x389   : > { %v2379_v1 = vadd.f32 %v2378_v23, %v2377_v47  ;;  %v5846_v47 = vld [vmem:[%s9453_s2 + $0xd0] sm:$0xff] }
 0x38a   : > { %v5862_v23 = vld [vmem:[%s9453_s2 + $0x150] sm:$0xff]  ;;  %3356 = vmatpush.bf16.msra.mxu1 %v5846_v47 }
 0x38b   : > { %v2380_v44 = vrot.slane %v2379_v1, 1  ;;  %3534 = vmatpush.bf16.msrb.mxu3 %v5862_v23 }
 0x38d   : > { %v2381_v6 = vadd.f32 %v2380_v44, %v2379_v1  ;;  %v5822_v1 = vld [vmem:[%s9453_s2 + $0x10] sm:$0xff]  ;;  %v5845_v44 = vld [vmem:[%s9453_s2 + $0xc8] sm:$0xff] }
 0x38e   : > { %3767 = vmatpush.bf16.msrb.mxu0 %v5822_v1  ;;  %3357 = vmatpush.bf16.msra.mxu1 %v5845_v44 }
 0x38f   : > { %v2382_v38 = vmul.f32 0.00390625, %v2381_v6  ;;  %v5861_v6 = vld [vmem:[%s9453_s2 + $0x148] sm:$0xff] }
 0x390   : > { %3535 = vmatpush.bf16.msrb.mxu3 %v5861_v6 }
 0x391   : > { %v2383_v15 = vadd.f32 1e-05, %v2382_v38 }
 0x392   : > { %3768 = vmatpush.bf16.msrb.mxu0 %v5821_v9  ;;  %3358 = vmatpush.bf16.msra.mxu1 %v5844_v7 }
 0x393   : > { %6011 = vrsqrt.f32 %v2383_v15  ;;  %vm2390_vm5 = vweird.f32 %v2383_v15 }
 0x394   : > { %3536 = vmatpush.bf16.msrb.mxu3 %v5860_v30 }
 0x396   : > { %3769 = vmatpush.bf16.msrb.mxu0 %v5820_v56 }
 0x399   : > { %v6012_v49 = vpop.eup %6011 }
 0x39a   : > { %v2385_v11 = vmul.f32 %v6012_v49, %v2383_v15  ;;  %vm2391_vm4 = vweird.f32 %v6012_v49 }
 0x39b   : > { %vm2392_vm6 = vmor %vm2390_vm5, %vm2391_vm4 }
 0x39c   : > { %v2386_v5 = vmul.f32 %v6012_v49, %v2385_v11 }
 0x39e   : > { %v2387_v17 = vmul.f32 0.5, %v2386_v5 }
 0x3a0   : > { %v2388_v3 = vsub.f32 1.5, %v2387_v17 }
 0x3a2   : > { %v2389_v28 = vmul.f32 %v6012_v49, %v2388_v3 }
 0x3a4   : > { %v7768_v31 = vsel %vm2392_vm6, %v6012_v49, %v2389_v28 }
 0x3a5   : > { %v2422_v38 = vmul.f32 %v7768_v31, %v7523_v43  ;;  %v2423_v15 = vmul.f32 %v7768_v31, %v7526_v34  ;;  %v2396_v43 = vmul.f32 %v7768_v31, %v7544_v35  ;;  %v2397_v34 = vmul.f32 %v7768_v31, %v7552_v45  ;;  %v5835_v35 = vld [vmem:[%s9453_s2 + $0x78] sm:$0xff] }
 0x3a6   : > { %v2394_v22 = vmul.f32 %v7768_v31, %v7536_v41  ;;  %v2395_v49 = vmul.f32 %v7768_v31, %v7540_v42  ;;  %v2398_v52 = vmul.f32 %v7768_v31, %v7556_v63  ;;  %v2399_v29 = vmul.f32 %v7768_v31, %v7562_v25  ;;  %3851 = vmatpush.bf16.msrb.mxu1 %v5835_v35 }
 0x3a7   : > { %v2428_v21 = vmax.f32 %v2396_v43, 0.0  ;;  %v2429_v11 = vmax.f32 %v2397_v34, 0.0  ;;  %v2454_v20 = vmax.f32 %v2422_v38, 0.0  ;;  %v2455_v27 = vmax.f32 %v2423_v15, 0.0 }
 0x3a8   : > { %v2426_v45 = vmax.f32 %v2394_v22, 0.0  ;;  %v2427_v5 = vmax.f32 %v2395_v49, 0.0  ;;  %v2430_v26 = vmax.f32 %v2398_v52, 0.0  ;;  %v2431_v41 = vmax.f32 %v2399_v29, 0.0 }
 0x3a9   : > { %v2460_v42 = vpack.c.bf16 %v2428_v21, %v2428_v21  ;;  %v2461_v17 = vpack.c.bf16 %v2429_v11, %v2429_v11  ;;  %v2400_v63 = vmul.f32 %v7768_v31, %v7568_v10  ;;  %v2486_v3 = vpack.c.bf16 %v2454_v20, %v2454_v20 }
 0x3aa   : > { %v2458_v39 = vpack.c.bf16 %v2426_v45, %v2426_v45  ;;  %v2459_v25 = vpack.c.bf16 %v2427_v5, %v2427_v5  ;;  %v2462_v37 = vpack.c.bf16 %v2430_v26, %v2430_v26  ;;  %v2463_v40 = vpack.c.bf16 %v2431_v41, %v2431_v41 }
 0x3ab   : > { %v2487_v55 = vpack.c.bf16 %v2455_v27, %v2455_v27  ;;  %v2492_v54 = vunpack.c.l.b16 %v2460_v42  ;;  %v2493_v48 = vunpack.c.l.b16 %v2461_v17  ;;  %v2401_v33 = vmul.f32 %v7768_v31, %v7574_v59 }
 0x3ac   : > { %v2432_v28 = vmax.f32 %v2400_v63, 0.0  ;;  %v2526_v47 = vunpack.c.l.b16 %v2458_v39  ;;  %v2527_v23 = vunpack.c.l.b16 %v2459_v25  ;;  %v2528_v1 = vunpack.c.l.b16 %v2462_v37 }
 0x3ad   : > { %v7811_v44 = vpack.c.b16 %v2493_v48, %v2492_v54  ;;  %v2529_v6 = vunpack.c.l.b16 %v2463_v40  ;;  %v2552_v9 = vunpack.c.l.b16 %v2486_v3  ;;  %v2553_v10 = vunpack.c.l.b16 %v2487_v55 }
 0x3ae   : > { %v2433_v38 = vmax.f32 %v2401_v33, 0.0  ;;  %v7815_v7 = vpack.c.b16 %v2527_v23, %v2526_v47  ;;  %v7817_v30 = vpack.c.bf16 %v2432_v28, %v2432_v28 }
 0x3af   : > { %v7813_v15 = vpack.c.b16 %v2553_v10, %v2552_v9  ;;  %v7819_v56 = vpack.c.b16 %v2529_v6, %v2528_v1  ;;  %v2587_v59 = vunpack.c.h.bf16 %v7811_v44  ;;  %v2586_v43 = vunpack.c.l.bf16 %v7811_v44 }
 0x3b0   : > { %v2465_v34 = vpack.c.bf16 %v2433_v38, %v2433_v38  ;;  %v2588_v22 = vunpack.c.l.bf16 %v7815_v7  ;;  %v2589_v49 = vunpack.c.h.bf16 %v7815_v7  ;;  %3448 = vmatmul.bf16.vlgmr.msrb.gmra.mxu2 %v7815_v7 }
 0x3b1   : > { %v2615_v52 = vunpack.c.h.bf16 %v7813_v15  ;;  %v7827_v29 = vrot.slane %v2587_v59, 7  ;;  %v7829_v35 = vrot.slane %v2586_v43, 1  ;;  %v2618_v21 = vrot.slane %v2586_v43, 7 }
 0x3b2   : > { %v2685_v11 = vrot.slane %v2587_v59, 1  ;;  %v2620_v45 = vrot.slane %v2588_v22, 7  ;;  %v2621_v5 = vrot.slane %v2589_v49, 7  ;;  %v2686_v26 = vrot.slane %v2588_v22, 1 }
 0x3b3   : > { %v2687_v41 = vrot.slane %v2589_v49, 1  ;;  %v7833_v20 = vrot.slane %v2615_v52, 7  ;;  %v2679_v42 = vsel %vm370_vm0, %v2618_v21, %v7827_v29  ;;  %v2590_v63 = vunpack.c.l.bf16 %v7819_v56 }
 0x3b4   : > { %v2745_v17 = vsel %vm437_vm1, %v7829_v35, %v2685_v11  ;;  %v2681_v39 = vsel %vm370_vm0, %v2620_v45, %v2621_v5  ;;  %v2682_v25 = vsel %vm370_vm0, %v7827_v29, %v2620_v45  ;;  %v2787_v1 = vpack.c.bf16 %v2679_v42, %v2679_v42 }
 0x3b5   : > { %v2747_v37 = vsel %vm437_vm1, %v2686_v26, %v2687_v41  ;;  %v2746_v40 = vsel %vm437_vm1, %v2687_v41, %v7829_v35  ;;  %v2789_v55 = vpack.c.bf16 %v2681_v39, %v2681_v39  ;;  %v2683_v23 = vsel %vm370_vm0, %v7833_v20, %v2618_v21 }
 0x3b6   : > { %v2752_v3 = vsel %vm174_vm2, %v2747_v37, %v2682_v25  ;;  %v2825_v48 = vsel %vm177_vm3, %v2681_v39, %v2746_v40  ;;  %v2860_v33 = vpack.c.bf16 %v2747_v37, %v2747_v37  ;;  %v2750_v10 = vsel %vm174_vm2, %v2745_v17, %v2683_v23 }
 0x3b7   : > { %v2788_v28 = vpack.c.bf16 %v2752_v3, %v2752_v3  ;;  %v2861_v47 = vpack.c.bf16 %v2825_v48, %v2825_v48  ;;  %v2933_v6 = vunpack.c.l.b16 %v2789_v55  ;;  %v2688_v38 = vrot.slane %v2590_v63, 1 }
 0x3b8   : > { %v3040_v9 = vunpack.c.l.b16 %v2860_v33  ;;  %v2786_v22 = vpack.c.bf16 %v2750_v10, %v2750_v10  ;;  %v2931_v49 = vunpack.c.l.b16 %v2787_v1  ;;  %v2748_v45 = vsel %vm437_vm1, %v2685_v11, %v2686_v26 }
 0x3b9   : > { %v2932_v59 = vunpack.c.l.b16 %v2788_v28  ;;  %v3041_v43 = vunpack.c.l.b16 %v2861_v47  ;;  %v2858_v41 = vpack.c.bf16 %v2745_v17, %v2745_v17  ;;  %v2530_v40 = vunpack.c.l.b16 %v7817_v30  ;;  %v5834_v30 = vld [vmem:[%s9453_s2 + $0x70] sm:$0xff] }
 0x3ba   : > { %v2930_v37 = vunpack.c.l.b16 %v2786_v22  ;;  %v2531_v3 = vunpack.c.l.b16 %v2465_v34  ;;  %v2680_v55 = vsel %vm370_vm0, %v2621_v5, %v2618_v21  ;;  %v2823_v48 = vsel %vm177_vm3, %v2679_v42, %v2748_v45  ;;  %3852 = vmatpush.bf16.msrb.mxu1 %v5834_v30 }
 0x3bb   : > { %v2967_v39 = vpack.c.b16 %v2933_v6, %v2932_v59  ;;  %v7863_v25 = vpack.c.b16 %v3041_v43, %v3040_v9  ;;  %v2744_v26 = vsel %vm437_vm1, %v2685_v11, %v2688_v38  ;;  %v2859_v28 = vpack.c.bf16 %v2823_v48, %v2823_v48 }
 0x3bc   : > { %v2966_v33 = vpack.c.b16 %v2931_v49, %v2930_v37  ;;  %v7873_v47 = vunpack.c.l.b16 %v2858_v41  ;;  %v2402_v34 = vmul.f32 %v7768_v31, %v7580_v62  ;;  %v2754_v21 = vsel %vm174_vm2, %v2745_v17, %v2680_v55 }
 0x3bd   : > { %3359 = vmatmul.bf16.vlgmr.msra.gmra.mxu1 %v2967_v39  ;;  %3537 = vmatmul.bf16.vlgmr.msrb.gmra.mxu3 %v7863_v25  ;;  %v7875_v23 = vunpack.c.l.b16 %v2859_v28  ;;  %v2827_v5 = vsel %vm177_vm3, %v2679_v42, %v2744_v26  ;;  %v2403_v11 = vmul.f32 %v7768_v31, %v7586_v58  ;;  %v7888_v1 = vpack.c.b16 %v2531_v3, %v2530_v40 }
 0x3be   : > { %3770 = vmatmul.bf16.vlgmr.msrb.gmra.mxu0 %v2966_v33  ;;  %v2790_v9 = vpack.c.bf16 %v2754_v21, %v2754_v21  ;;  %v2863_v10 = vpack.c.bf16 %v2827_v5, %v2827_v5  ;;  %v2434_v62 = vmax.f32 %v2402_v34, 0.0  ;;  %v2591_v17 = vunpack.c.h.bf16 %v7819_v56 }
 0x3bf   : > { %9774 = vst [vmem:[#allocation47_spill] sm:$0xff] %v7888_v1  ;;  %v2435_v59 = vmax.f32 %v2403_v11, 0.0  ;;  %v2592_v43 = vunpack.c.l.bf16 %v7888_v1  ;;  %v2622_v58 = vrot.slane %v2590_v63, 7  ;;  %v2404_v34 = vmul.f32 %v7768_v31, %v7592_v53 }
 0x3c0   : > { %3453 = vmatmul.bf16.gmra.mxu2 %v7811_v44  ;;  %v2934_v42 = vunpack.c.l.b16 %v2790_v9  ;;  %v3043_v22 = vunpack.c.l.b16 %v2863_v10  ;;  %v2466_v45 = vpack.c.bf16 %v2434_v62, %v2434_v62  ;;  %v2623_v37 = vrot.slane %v2591_v17, 7 }
 0x3c1   : > { %v2467_v41 = vpack.c.bf16 %v2435_v59, %v2435_v59  ;;  %v2689_v40 = vrot.slane %v2591_v17, 1  ;;  %v2690_v3 = vrot.slane %v2592_v43, 1  ;;  %v2678_v26 = vsel %vm370_vm0, %v7827_v29, %v2622_v58 }
 0x3c2   : > { %v7895_v55 = vpack.c.b16 %v2931_v49, %v2934_v42  ;;  %v7898_v48 = vpack.c.b16 %v3043_v22, %v7873_v47  ;;  %v2532_v33 = vunpack.c.l.b16 %v2466_v45  ;;  %v2677_v63 = vsel %vm370_vm0, %v2622_v58, %v2623_v37 }
 0x3c3   : > { %v2533_v28 = vunpack.c.l.b16 %v2467_v41  ;;  %v2743_v49 = vsel %vm437_vm1, %v2688_v38, %v2689_v40  ;;  %v2742_v30 = vsel %vm437_vm1, %v2689_v40, %v2690_v3  ;;  %v2405_v5 = vmul.f32 %v7768_v31, %v7598_v13 }
 0x3c4   : > { %v2756_v29 = vsel %vm174_vm2, %v2743_v49, %v2678_v26  ;;  %v2829_v21 = vsel %vm177_vm3, %v2677_v63, %v2742_v30  ;;  %v2793_v9 = vpack.c.bf16 %v2677_v63, %v2677_v63  ;;  %v2864_v10 = vpack.c.bf16 %v2743_v49, %v2743_v49 }
 0x3c5   : > { %v7919_v11 = vpack.c.b16 %v2533_v28, %v2532_v33  ;;  %v2792_v38 = vpack.c.bf16 %v2756_v29, %v2756_v29  ;;  %v2436_v62 = vmax.f32 %v2404_v34, 0.0  ;;  %v2437_v59 = vmax.f32 %v2405_v5, 0.0 }
 0x3c6   : > { %v2593_v53 = vunpack.c.h.bf16 %v7888_v1  ;;  %v2937_v22 = vunpack.c.l.b16 %v2793_v9  ;;  %v3044_v45 = vunpack.c.l.b16 %v2864_v10  ;;  %v2624_v13 = vrot.slane %v2592_v43, 7 }
 0x3c7   : > { %9775 = vst [vmem:[#allocation46_spill] sm:$0xff] %v7919_v11  ;;  %v2594_v17 = vunpack.c.l.bf16 %v7919_v11  ;;  %v2936_v42 = vunpack.c.l.b16 %v2792_v38  ;;  %v2468_v41 = vpack.c.bf16 %v2436_v62, %v2436_v62  ;;  %v2469_v40 = vpack.c.bf16 %v2437_v59, %v2437_v59 }
 0x3c8   : > { %v2625_v33 = vrot.slane %v2593_v53, 7  ;;  %v2691_v26 = vrot.slane %v2593_v53, 1  ;;  %v2676_v34 = vsel %vm370_vm0, %v2623_v37, %v2624_v13  ;;  %v5833_v37 = vld [vmem:[%s9453_s2 + $0x68] sm:$0xff]  ;;  %v2406_v38 = vmul.f32 %v7768_v31, %v7604_v51 }
 0x3c9   : > { %v2692_v28 = vrot.slane %v2594_v17, 1  ;;  %v7924_v30 = vpack.c.b16 %v2937_v22, %v2936_v42  ;;  %v2534_v49 = vunpack.c.l.b16 %v2468_v41  ;;  %v2535_v29 = vunpack.c.l.b16 %v2469_v40  ;;  %3853 = vmatpush.bf16.msrb.mxu1 %v5833_v37 }
 0x3ca   : > { %v2675_v43 = vsel %vm370_vm0, %v2624_v13, %v2625_v33  ;;  %v2438_v22 = vmax.f32 %v2406_v38, 0.0  ;;  %v2425_v38 = vmul.f32 %v7768_v31, %v7532_v36 }
 0x3cb   : > { %v2740_v5 = vsel %vm437_vm1, %v2691_v26, %v2692_v28  ;;  %v2795_v59 = vpack.c.bf16 %v2675_v43, %v2675_v43 }
 0x3cc   : > { %v2831_v10 = vsel %vm177_vm3, %v2675_v43, %v2740_v5 }
 0x3cd   : > { %3364 = vmatmul.bf16.gmra.mxu1 %v7895_v55  ;;  %3542 = vmatmul.bf16.gmra.mxu3 %v7898_v48  ;;  %v2867_v42 = vpack.c.bf16 %v2831_v10, %v2831_v10  ;;  %v2939_v13 = vunpack.c.l.b16 %v2795_v59 }
 0x3ce   : > { %3775 = vmatmul.bf16.gmra.mxu0 %v2967_v39  ;;  %v2865_v39 = vpack.c.bf16 %v2829_v21, %v2829_v21  ;;  %v2741_v21 = vsel %vm437_vm1, %v2690_v3, %v2691_v26  ;;  %v2407_v3 = vmul.f32 %v7768_v31, %v7610_v14  ;;  %v2470_v14 = vpack.c.bf16 %v2438_v22, %v2438_v22 }
 0x3cf   : > { %v2758_v9 = vsel %vm174_vm2, %v2741_v21, %v2676_v34  ;;  %v2866_v53 = vpack.c.bf16 %v2741_v21, %v2741_v21  ;;  %v3047_v26 = vunpack.c.l.b16 %v2867_v42  ;;  %v2424_v21 = vmul.f32 %v7768_v31, %v7529_v46 }
 0x3d0   : > { %3458 = vmatmul.bf16.gmra.mxu2 %v7819_v56  ;;  %v3045_v58 = vunpack.c.l.b16 %v2865_v39  ;;  %v7950_v39 = vpack.c.b16 %v2535_v29, %v2534_v49  ;;  %v2794_v62 = vpack.c.bf16 %v2758_v9, %v2758_v9  ;;  %v2439_v51 = vmax.f32 %v2407_v3, 0.0 }
 0x3d1   : > { %v3046_v40 = vunpack.c.l.b16 %v2866_v53  ;;  %v2626_v49 = vrot.slane %v2594_v17, 7  ;;  %v2536_v10 = vunpack.c.l.b16 %v2470_v14  ;;  %v2456_v36 = vmax.f32 %v2424_v21, 0.0 }
 0x3d2   : > { %v7926_v63 = vpack.c.b16 %v3045_v58, %v3044_v45  ;;  %9777 = vst [vmem:[#allocation22_spill] sm:$0xff] %v7950_v39  ;;  %v2595_v45 = vunpack.c.h.bf16 %v7919_v11  ;;  %v2596_v58 = vunpack.c.l.bf16 %v7950_v39  ;;  %v2938_v41 = vunpack.c.l.b16 %v2794_v62 }
 0x3d3   : > { %v2471_v34 = vpack.c.bf16 %v2439_v51, %v2439_v51  ;;  %v7957_v43 = vpack.c.b16 %v3047_v26, %v3046_v40  ;;  %v2674_v3 = vsel %vm370_vm0, %v2625_v33, %v2626_v49  ;;  %v2457_v53 = vmax.f32 %v2425_v38, 0.0 }
 0x3d4   : > { %9776 = vst [vmem:[#allocation32_spill] sm:$0xff] %v7926_v63  ;;  %v2627_v29 = vrot.slane %v2595_v45, 7  ;;  %v2693_v5 = vrot.slane %v2595_v45, 1  ;;  %v2694_v37 = vrot.slane %v2596_v58, 1  ;;  %v7955_v9 = vpack.c.b16 %v2939_v13, %v2938_v41 }
 0x3d5   : > { %9778 = vst [vmem:[#allocation43_spill] sm:$0xff] %v7957_v43  ;;  %v2537_v62 = vunpack.c.l.b16 %v2471_v34  ;;  %v2408_v22 = vmul.f32 %v7768_v31, %v7616_v57  ;;  %v2409_v51 = vmul.f32 %v7768_v31, %v7622_v8  ;;  %v2488_v26 = vpack.c.bf16 %v2456_v36, %v2456_v36 }
 0x3d6   : > { %v2673_v17 = vsel %vm370_vm0, %v2626_v49, %v2627_v29  ;;  %v2739_v59 = vsel %vm437_vm1, %v2692_v28, %v2693_v5  ;;  %v2738_v46 = vsel %vm437_vm1, %v2693_v5, %v2694_v37  ;;  %v2489_v14 = vpack.c.bf16 %v2457_v53, %v2457_v53 }
 0x3d7   : > { %v2760_v33 = vsel %vm174_vm2, %v2739_v59, %v2674_v3  ;;  %v2833_v42 = vsel %vm177_vm3, %v2673_v17, %v2738_v46  ;;  %v7982_v28 = vpack.c.b16 %v2537_v62, %v2536_v10  ;;  %v2797_v41 = vpack.c.bf16 %v2673_v17, %v2673_v17 }
 0x3d8   : > { %v2796_v45 = vpack.c.bf16 %v2760_v33, %v2760_v33  ;;  %v2868_v13 = vpack.c.bf16 %v2739_v59, %v2739_v59  ;;  %v2869_v40 = vpack.c.bf16 %v2833_v42, %v2833_v42  ;;  %v2597_v49 = vunpack.c.h.bf16 %v7950_v39 }
 0x3d9   : > { %9779 = vst [vmem:[#allocation50_spill] sm:$0xff] %v7982_v28  ;;  %v2440_v34 = vmax.f32 %v2408_v22, 0.0  ;;  %v2441_v5 = vmax.f32 %v2409_v51, 0.0  ;;  %v2598_v21 = vunpack.c.l.bf16 %v7982_v28  ;;  %v2941_v38 = vunpack.c.l.b16 %v2797_v41 }
 0x3da   : > { %v2940_v57 = vunpack.c.l.b16 %v2796_v45  ;;  %v3048_v3 = vunpack.c.l.b16 %v2868_v13  ;;  %v3049_v8 = vunpack.c.l.b16 %v2869_v40  ;;  %v2554_v10 = vunpack.c.l.b16 %v2488_v26 }
 0x3db   : > { %v2555_v62 = vunpack.c.l.b16 %v2489_v14  ;;  %v2628_v46 = vrot.slane %v2596_v58, 7  ;;  %v2695_v6 = vrot.slane %v2597_v49, 1  ;;  %v2472_v33 = vpack.c.bf16 %v2440_v34, %v2440_v34 }
 0x3dc   : > { %v2473_v17 = vpack.c.bf16 %v2441_v5, %v2441_v5  ;;  %v7987_v59 = vrot.slane %v2597_v49, 7  ;;  %v7989_v36 = vrot.slane %v2598_v21, 1  ;;  %v7991_v53 = vpack.c.b16 %v2941_v38, %v2940_v57  ;;  %v5832_v49 = vld [vmem:[%s9453_s2 + $0x60] sm:$0xff] }
 0x3dd   : > { %3369 = vmatmul.bf16.gmra.mxu1 %v7924_v30  ;;  %3547 = vmatmul.bf16.gmra.mxu3 %v7926_v63  ;;  %v7993_v42 = vpack.c.b16 %v3049_v8, %v3048_v3  ;;  %v2614_v22 = vunpack.c.l.bf16 %v7813_v15  ;;  %v7996_v51 = vpack.c.b16 %v2555_v62, %v2554_v10  ;;  %v2672_v45 = vsel %vm370_vm0, %v2627_v29, %v2628_v46 }
 0x3de   : > { %3780 = vmatmul.bf16.gmra.mxu0 %v7895_v55  ;;  %9780 = vst [vmem:[#allocation3_spill] sm:$0xff] %v7991_v53  ;;  %v2737_v58 = vsel %vm437_vm1, %v2694_v37, %v2695_v6  ;;  %v2538_v41 = vunpack.c.l.b16 %v2472_v33  ;;  %v2539_v13 = vunpack.c.l.b16 %v2473_v17  ;;  %v2671_v40 = vsel %vm370_vm0, %v2628_v46, %v7987_v59  ;;  %3854 = vmatpush.bf16.msrb.mxu1 %v5832_v49 }
 0x3df   : > { %9781 = vst [vmem:[#allocation4_spill] sm:$0xff] %v7993_v42  ;;  %v2736_v26 = vsel %vm437_vm1, %v2695_v6, %v7989_v36  ;;  %v2410_v29 = vmul.f32 %v7768_v31, %v7628_v32  ;;  %v2411_v37 = vmul.f32 %v7768_v31, %v7634_v50  ;;  %v2762_v14 = vsel %vm174_vm2, %v2737_v58, %v2672_v45 }
 0x3e0   : > { %3463 = vmatmul.bf16.gmra.mxu2 %v7888_v1  ;;  %v8020_v34 = vrot.slane %v2614_v22, 7  ;;  %v2835_v6 = vsel %vm177_vm3, %v2671_v40, %v2736_v26  ;;  %v8024_v5 = vrot.slane %v2614_v22, 1  ;;  %v8028_v32 = vrot.slane %v2615_v52, 1 }
 0x3e1   : > { %v9533_v50 = vunpack.c.h.bf16 %v7996_v51  ;;  %v8031_v57 = vpack.c.b16 %v2539_v13, %v2538_v41  ;;  %v2798_v38 = vpack.c.bf16 %v2762_v14, %v2762_v14  ;;  %v2799_v3 = vpack.c.bf16 %v2671_v40, %v2671_v40 }
 0x3e2   : > { %v2870_v8 = vpack.c.bf16 %v2737_v58, %v2737_v58  ;;  %v2871_v10 = vpack.c.bf16 %v2835_v6, %v2835_v6  ;;  %v8038_v62 = vsel %vm370_vm0, %v8020_v34, %v7833_v20  ;;  %v2442_v46 = vmax.f32 %v2410_v29, 0.0 }
 0x3e3   : > { %9782 = vst [vmem:[#allocation41_spill] sm:$0xff] %v8031_v57  ;;  %v2443_v52 = vmax.f32 %v2411_v37, 0.0  ;;  %v8044_v33 = vsel %vm437_vm1, %v8024_v5, %v8028_v32  ;;  %v8048_v17 = vrot.slane %v9533_v50, 7  ;;  %v2599_v22 = vunpack.c.h.bf16 %v7982_v28 }
 0x3e4   : > { %v2600_v45 = vunpack.c.l.bf16 %v8031_v57  ;;  %v2942_v58 = vunpack.c.l.b16 %v2798_v38  ;;  %v2943_v41 = vunpack.c.l.b16 %v2799_v3  ;;  %v2817_v13 = vpack.c.bf16 %v8038_v62, %v8038_v62 }
 0x3e5   : > { %v2651_v40 = vsel %vm370_vm0, %v8048_v17, %v8020_v34  ;;  %v3050_v26 = vunpack.c.l.b16 %v2870_v8  ;;  %v3051_v29 = vunpack.c.l.b16 %v2871_v10  ;;  %v2888_v37 = vpack.c.bf16 %v8044_v33, %v8044_v33 }
 0x3e6   : > { %v2749_v14 = vsel %vm437_vm1, %v8028_v32, %v7829_v35  ;;  %v2474_v49 = vpack.c.bf16 %v2442_v46, %v2442_v46  ;;  %v2475_v6 = vpack.c.bf16 %v2443_v52, %v2443_v52  ;;  %v2630_v38 = vrot.slane %v2598_v21, 7 }
 0x3e7   : > { %v2631_v3 = vrot.slane %v2599_v22, 7  ;;  %v2697_v50 = vrot.slane %v2599_v22, 1  ;;  %v8067_v8 = vunpack.c.l.b16 %v2817_v13  ;;  %v8074_v35 = vpack.c.b16 %v3051_v29, %v3050_v26 }
 0x3e8   : > { %v8076_v46 = vunpack.c.l.b16 %v2888_v37  ;;  %v2540_v52 = vunpack.c.l.b16 %v2474_v49  ;;  %v2541_v22 = vunpack.c.l.b16 %v2475_v6  ;;  %v2412_v29 = vmul.f32 %v7768_v31, %v7640_v60 }
 0x3e9   : > { %9784 = vst [vmem:[#allocation5_spill] sm:$0xff] %v8074_v35  ;;  %v2601_v60 = vunpack.c.h.bf16 %v8031_v57 }
 0x3ea   : > { %9785 = vst [vmem:[#allocation39_spill] sm:$0xff] %v8076_v46 }
 0x3ed   : > { %3374 = vmatmul.bf16.gmra.mxu1 %v7955_v9  ;;  %3552 = vmatmul.bf16.gmra.mxu3 %v7957_v43  ;;  %v2857_v43 = vsel %vm177_vm3, %v8038_v62, %v2749_v14  ;;  %v8107_v14 = vpack.c.b16 %v2541_v22, %v2540_v52  ;;  %v2633_v22 = vrot.slane %v2601_v60, 7 }
 0x3ee   : > { %3785 = vmatmul.bf16.gmra.mxu0 %v7924_v30  ;;  %v2893_v21 = vpack.c.bf16 %v2857_v43, %v2857_v43 }
 0x3ef   : > { %9788 = vst [vmem:[#allocation6_spill] sm:$0xff] %v8107_v14 }
 0x3f0   : > { %3468 = vmatmul.bf16.gmra.mxu2 %v7919_v11  ;;  %v8072_v11 = vpack.c.b16 %v2943_v41, %v2942_v58  ;;  %v2735_v58 = vsel %vm437_vm1, %v7989_v36, %v2697_v50  ;;  %v8092_v41 = vunpack.c.l.b16 %v2893_v21  ;;  %v2444_v21 = vmax.f32 %v2412_v29, 0.0 }
 0x3f2   : > { %9783 = vst [vmem:[#allocation28_spill] sm:$0xff] %v8072_v11 }
 0x3f3   : > { %9787 = vst [vmem:[#allocation12_spill] sm:$0xff] %v8092_v41 }
 0x3fd   : > { %3379 = vmatmul.bf16.gmra.mxu1 %v7991_v53  ;;  %3557 = vmatmul.bf16.gmra.mxu3 %v7993_v42  ;;  %v2698_v42 = vrot.slane %v2600_v45, 1 }
 0x3fe   : > { %3790 = vmatmul.bf16.gmra.mxu0 %v7955_v9 }
 0x3ff   : > { %v2734_v43 = vsel %vm437_vm1, %v2697_v50, %v2698_v42  ;;  %v2413_v50 = vmul.f32 %v7768_v31, %v7646_v19  ;;  %v2632_v19 = vrot.slane %v2600_v45, 7 }
 0x400   : > { %3473 = vmatmul.bf16.gmra.mxu2 %v7950_v39  ;;  %v2784_v39 = vsel %vm174_vm2, %v8044_v33, %v2651_v40  ;;  %v2670_v40 = vsel %vm370_vm0, %v7987_v59, %v2630_v38 }
 0x401   : > { %v2820_v10 = vpack.c.bf16 %v2784_v39, %v2784_v39  ;;  %v2669_v39 = vsel %vm370_vm0, %v2630_v38, %v2631_v3  ;;  %v2764_v37 = vsel %vm174_vm2, %v2735_v58, %v2670_v40  ;;  %v2872_v38 = vpack.c.bf16 %v2735_v58, %v2735_v58 }
 0x402   : > { %v2837_v36 = vsel %vm177_vm3, %v2669_v39, %v2734_v43  ;;  %v2800_v49 = vpack.c.bf16 %v2764_v37, %v2764_v37  ;;  %v2801_v6 = vpack.c.bf16 %v2669_v39, %v2669_v39  ;;  %v2445_v26 = vmax.f32 %v2413_v50, 0.0 }
 0x403   : > { %v8081_v13 = vunpack.c.l.b16 %v2820_v10  ;;  %v2873_v10 = vpack.c.bf16 %v2837_v36, %v2837_v36  ;;  %v2602_v40 = vunpack.c.l.bf16 %v8107_v14  ;;  %v3052_v43 = vunpack.c.l.b16 %v2872_v38 }
 0x404   : > { %v2944_v59 = vunpack.c.l.b16 %v2800_v49  ;;  %v2945_v41 = vunpack.c.l.b16 %v2801_v6  ;;  %v2477_v52 = vpack.c.bf16 %v2445_v26, %v2445_v26  ;;  %v2668_v29 = vsel %vm370_vm0, %v2631_v3, %v2632_v19  ;;  %v5831_v3 = vld [vmem:[%s9453_s2 + $0x58] sm:$0xff] }
 0x405   : > { %9786 = vst [vmem:[#allocation8_spill] sm:$0xff] %v8081_v13  ;;  %v3053_v13 = vunpack.c.l.b16 %v2873_v10  ;;  %v2667_v45 = vsel %vm370_vm0, %v2632_v19, %v2633_v22  ;;  %3855 = vmatpush.bf16.msrb.mxu1 %v5831_v3 }
 0x406   : > { %v8112_v37 = vpack.c.b16 %v2945_v41, %v2944_v59  ;;  %v2543_v36 = vunpack.c.l.b16 %v2477_v52  ;;  %v2803_v49 = vpack.c.bf16 %v2667_v45, %v2667_v45 }
 0x407   : > { %v8114_v39 = vpack.c.b16 %v3053_v13, %v3052_v43 }
 0x408   : > { %9789 = vst [vmem:[#allocation13_spill] sm:$0xff] %v8112_v37  ;;  %v2947_v19 = vunpack.c.l.b16 %v2803_v49  ;;  %v2416_v49 = vmul.f32 %v7768_v31, %v7664_v4 }
 0x409   : > { %9790 = vst [vmem:[#allocation14_spill] sm:$0xff] %v8114_v39 }
 0x40d   : > { %3384 = vmatmul.bf16.gmra.mxu1 %v8072_v11  ;;  %3562 = vmatmul.bf16.gmra.mxu3 %v8074_v35  ;;  %v2476_v35 = vpack.c.bf16 %v2444_v21, %v2444_v21  ;;  %v2603_v21 = vunpack.c.h.bf16 %v8107_v14 }
 0x40e   : > { %3795 = vmatmul.bf16.gmra.mxu0 %v7991_v53  ;;  %v2699_v53 = vrot.slane %v2601_v60, 1 }
 0x40f   : > { %v2542_v58 = vunpack.c.l.b16 %v2476_v35  ;;  %v2414_v35 = vmul.f32 %v7768_v31, %v7652_v61 }
 0x410   : > { %3478 = vmatmul.bf16.gmra.mxu2 %v7982_v28  ;;  %v2700_v28 = vrot.slane %v2602_v40, 1  ;;  %v2733_v26 = vsel %vm437_vm1, %v2698_v42, %v2699_v53  ;;  %v2415_v42 = vmul.f32 %v7768_v31, %v7658_v24 }
 0x411   : > { %v2766_v13 = vsel %vm174_vm2, %v2733_v26, %v2668_v29  ;;  %v8138_v50 = vpack.c.b16 %v2543_v36, %v2542_v58  ;;  %v2874_v6 = vpack.c.bf16 %v2733_v26, %v2733_v26  ;;  %v2446_v10 = vmax.f32 %v2414_v35, 0.0 }
 0x412   : > { %v2732_v41 = vsel %vm437_vm1, %v2699_v53, %v2700_v28  ;;  %v2802_v53 = vpack.c.bf16 %v2766_v13, %v2766_v13  ;;  %v2447_v61 = vmax.f32 %v2415_v42, 0.0  ;;  %v2634_v58 = vrot.slane %v2602_v40, 7 }
 0x413   : > { %v2839_v59 = vsel %vm177_vm3, %v2667_v45, %v2732_v41  ;;  %9791 = vst [vmem:[#allocation9_spill] sm:$0xff] %v8138_v50  ;;  %v2604_v60 = vunpack.c.l.bf16 %v8138_v50  ;;  %v3054_v52 = vunpack.c.l.b16 %v2874_v6  ;;  %v2478_v24 = vpack.c.bf16 %v2446_v10, %v2446_v10 }
 0x414   : > { %v2875_v38 = vpack.c.bf16 %v2839_v59, %v2839_v59  ;;  %v2946_v43 = vunpack.c.l.b16 %v2802_v53  ;;  %v2479_v36 = vpack.c.bf16 %v2447_v61, %v2447_v61  ;;  %v2635_v41 = vrot.slane %v2603_v21, 7 }
 0x415   : > { %v2702_v3 = vrot.slane %v2604_v60, 1  ;;  %v2544_v26 = vunpack.c.l.b16 %v2478_v24  ;;  %v2666_v35 = vsel %vm370_vm0, %v2633_v22, %v2634_v58  ;;  %v2605_v4 = vunpack.c.h.bf16 %v8138_v50 }
 0x416   : > { %v3055_v29 = vunpack.c.l.b16 %v2875_v38  ;;  %v8143_v13 = vpack.c.b16 %v2947_v19, %v2946_v43  ;;  %v2545_v59 = vunpack.c.l.b16 %v2479_v36  ;;  %v2665_v40 = vsel %vm370_vm0, %v2634_v58, %v2635_v41 }
 0x417   : > { %v2417_v38 = vmul.f32 %v7768_v31, %v7670_v12  ;;  %v2448_v43 = vmax.f32 %v2416_v49, 0.0 }
 0x418   : > { %9792 = vst [vmem:[#allocation11_spill] sm:$0xff] %v8143_v13  ;;  %v8145_v45 = vpack.c.b16 %v3055_v29, %v3054_v52  ;;  %v8166_v10 = vpack.c.b16 %v2545_v59, %v2544_v26  ;;  %v2636_v26 = vrot.slane %v2604_v60, 7  ;;  %v2637_v59 = vrot.slane %v2605_v4, 7 }
 0x419   : > { %v2449_v52 = vmax.f32 %v2417_v38, 0.0  ;;  %v2480_v12 = vpack.c.bf16 %v2448_v43, %v2448_v43 }
 0x41a   : > { %9793 = vst [vmem:[#allocation18_spill] sm:$0xff] %v8145_v45  ;;  %v2606_v29 = vunpack.c.l.bf16 %v8166_v10  ;;  %v2664_v60 = vsel %vm370_vm0, %v2635_v41, %v2636_v26 }
 0x41b   : > { %9794 = vst [vmem:[#allocation10_spill] sm:$0xff] %v8166_v10  ;;  %v2546_v38 = vunpack.c.l.b16 %v2480_v12 }
 0x41d   : > { %3389 = vmatmul.bf16.gmra.mxu1 %v8112_v37  ;;  %3567 = vmatmul.bf16.gmra.mxu3 %v8114_v39  ;;  %v2701_v39 = vrot.slane %v2603_v21, 1 }
 0x41e   : > { %3800 = vmatmul.bf16.gmra.mxu0 %v8072_v11 }
 0x41f   : > { %v2731_v42 = vsel %vm437_vm1, %v2700_v28, %v2701_v39  ;;  %v2730_v53 = vsel %vm437_vm1, %v2701_v39, %v2702_v3  ;;  %v2805_v39 = vpack.c.bf16 %v2665_v40, %v2665_v40 }
 0x420   : > { %3483 = vmatmul.bf16.gmra.mxu2 %v8031_v57  ;;  %v2768_v22 = vsel %vm174_vm2, %v2731_v42, %v2666_v35  ;;  %v2841_v6 = vsel %vm177_vm3, %v2665_v40, %v2730_v53  ;;  %v2876_v61 = vpack.c.bf16 %v2731_v42, %v2731_v42  ;;  %v2481_v53 = vpack.c.bf16 %v2449_v52, %v2449_v52 }
 0x421   : > { %v2804_v28 = vpack.c.bf16 %v2768_v22, %v2768_v22  ;;  %v2877_v21 = vpack.c.bf16 %v2841_v6, %v2841_v6  ;;  %v2949_v58 = vunpack.c.l.b16 %v2805_v39  ;;  %v8171_v22 = vrot.slane %v2606_v29, 1 }
 0x422   : > { %v3056_v36 = vunpack.c.l.b16 %v2876_v61  ;;  %v2663_v39 = vsel %vm370_vm0, %v2636_v26, %v2637_v59  ;;  %v2547_v61 = vunpack.c.l.b16 %v2481_v53  ;;  %v2419_v52 = vmul.f32 %v7768_v31, %v7682_v18 }
 0x423   : > { %v2948_v24 = vunpack.c.l.b16 %v2804_v28  ;;  %v3057_v35 = vunpack.c.l.b16 %v2877_v21 }
 0x425   : > { %v8173_v49 = vpack.c.b16 %v2949_v58, %v2948_v24  ;;  %v8175_v6 = vpack.c.b16 %v3057_v35, %v3056_v36  ;;  %v2807_v35 = vpack.c.bf16 %v2663_v39, %v2663_v39 }
 0x427   : > { %9795 = vst [vmem:[#allocation17_spill] sm:$0xff] %v8173_v49 }
 0x428   : > { %9796 = vst [vmem:[#allocation16_spill] sm:$0xff] %v8175_v6 }
 0x42d   : > { %3394 = vmatmul.bf16.gmra.mxu1 %v8143_v13  ;;  %3572 = vmatmul.bf16.gmra.mxu3 %v8145_v45  ;;  %v2703_v45 = vrot.slane %v2605_v4, 1  ;;  %v2418_v4 = vmul.f32 %v7768_v31, %v7676_v2 }
 0x42e   : > { %3805 = vmatmul.bf16.gmra.mxu0 %v8112_v37 }
 0x42f   : > { %v2729_v21 = vsel %vm437_vm1, %v2702_v3, %v2703_v45  ;;  %v2728_v43 = vsel %vm437_vm1, %v2703_v45, %v8171_v22  ;;  %v8202_v45 = vpack.c.b16 %v2547_v61, %v2546_v38  ;;  %v2450_v53 = vmax.f32 %v2418_v4, 0.0 }
 0x430   : > { %3488 = vmatmul.bf16.gmra.mxu2 %v8107_v14  ;;  %v2770_v3 = vsel %vm174_vm2, %v2729_v21, %v2664_v60  ;;  %v2843_v24 = vsel %vm177_vm3, %v2663_v39, %v2728_v43  ;;  %v2878_v26 = vpack.c.bf16 %v2729_v21, %v2729_v21  ;;  %v2607_v43 = vunpack.c.h.bf16 %v8166_v10 }
 0x431   : > { %9797 = vst [vmem:[#allocation19_spill] sm:$0xff] %v8202_v45  ;;  %v2806_v12 = vpack.c.bf16 %v2770_v3, %v2770_v3  ;;  %v2879_v18 = vpack.c.bf16 %v2843_v24, %v2843_v24  ;;  %v2608_v38 = vunpack.c.l.bf16 %v8202_v45  ;;  %v2951_v61 = vunpack.c.l.b16 %v2807_v35 }
 0x432   : > { %v2639_v21 = vrot.slane %v2607_v43, 7  ;;  %v2705_v4 = vrot.slane %v2607_v43, 1 }
 0x433   : > { %v3449_v19 = vpop.f32.mrf.mxu2 }
 0x43a   : > { %v3360_v40 = vpop.f32.mrf.mxu1 }
 0x43b   : > { %v3450_v42 = vadd.f32 %v3449_v19, %v3360_v40  ;;  %v8177_v14 = vpop.f32.mrf.mxu0  ;;  %v3451_v28 = vpop.f32.mrf.mxu2  ;;  %v5830_v19 = vld [vmem:[%s9453_s2 + $0x50] sm:$0xff]  ;;  %v2451_v40 = vmax.f32 %v2419_v52, 0.0  ;;  %v2706_v52 = vrot.slane %v2608_v38, 1 }
 0x43c   : > { %3856 = vmatpush.bf16.msrb.mxu1 %v5830_v19  ;;  %v2482_v19 = vpack.c.bf16 %v2450_v53, %v2450_v53 }
 0x43d   : > { %3399 = vmatmul.bf16.gmra.mxu1 %v8173_v49  ;;  %3577 = vmatmul.bf16.gmra.mxu3 %v8175_v6  ;;  %v2483_v57 = vpack.c.bf16 %v2451_v40, %v2451_v40 }
 0x43e   : > { %3810 = vmatmul.bf16.gmra.mxu0 %v8143_v13  ;;  %v2548_v11 = vunpack.c.l.b16 %v2482_v19 }
 0x440   : > { %v3538_v41 = vpop.f32.mrf.mxu3  ;;  %3493 = vmatmul.bf16.gmra.mxu2 %v8138_v50  ;;  %v3059_v50 = vunpack.c.l.b16 %v2879_v18  ;;  %v2549_v18 = vunpack.c.l.b16 %v2483_v57  ;;  %v2421_v57 = vmul.f32 %v7768_v31, %v7520_v16 }
 0x441   : > { %v8204_v58 = vadd.f32 %v3538_v41, %v3450_v42  ;;  %v2950_v42 = vunpack.c.l.b16 %v2806_v12  ;;  %v3058_v41 = vunpack.c.l.b16 %v2878_v26 }
 0x442   : > { %v3362_v36 = vpop.f32.mrf.mxu1  ;;  %v8239_v43 = vpack.c.b16 %v2549_v18, %v2548_v11 }
 0x443   : > { %v3452_v2 = vadd.f32 %v3451_v28, %v3362_v36  ;;  %v8207_v6 = vpop.f32.mrf.mxu0  ;;  %v3454_v60 = vpop.f32.mrf.mxu2  ;;  %v2638_v28 = vrot.slane %v2606_v29, 7  ;;  %v8213_v13 = vpack.c.b16 %v2951_v61, %v2950_v42  ;;  %v8215_v37 = vpack.c.b16 %v3059_v50, %v3058_v41 }
 0x444   : > { %v2727_v50 = vsel %vm437_vm1, %v8171_v22, %v2705_v4  ;;  %9800 = vst [vmem:[#allocation7_spill] sm:$0xff] %v8239_v43  ;;  %v2610_v11 = vunpack.c.l.bf16 %v8239_v43 }
 0x445   : > { %9798 = vst [vmem:[#allocation36_spill] sm:$0xff] %v8213_v13  ;;  %v2662_v26 = vsel %vm370_vm0, %v2637_v59, %v2638_v28  ;;  %v2661_v29 = vsel %vm370_vm0, %v2638_v28, %v2639_v21  ;;  %v2420_v59 = vmul.f32 %v7768_v31, %v7517_v0  ;;  %v2880_v19 = vpack.c.bf16 %v2727_v50, %v2727_v50 }
 0x446   : > { %9799 = vst [vmem:[#allocation48_spill] sm:$0xff] %v8215_v37  ;;  %v2772_v40 = vsel %vm174_vm2, %v2727_v50, %v2662_v26  ;;  %v2809_v61 = vpack.c.bf16 %v2661_v29, %v2661_v29  ;;  %v2453_v31 = vmax.f32 %v2421_v57, 0.0  ;;  %v2708_v57 = vrot.slane %v2610_v11, 1 }
 0x447   : > { %v2808_v0 = vpack.c.bf16 %v2772_v40, %v2772_v40  ;;  %v2452_v16 = vmax.f32 %v2420_v59, 0.0  ;;  %v3060_v18 = vunpack.c.l.b16 %v2880_v19 }
 0x448   : > { %v3540_v39 = vpop.f32.mrf.mxu3 }
 0x449   : > { %v8211_v3 = vadd.f32 %v3540_v39, %v3452_v2  ;;  %v2726_v2 = vsel %vm437_vm1, %v2705_v4, %v2706_v52  ;;  %v2952_v26 = vunpack.c.l.b16 %v2808_v0 }
 0x44a   : > { %v3365_v24 = vpop.f32.mrf.mxu1 }
 0x44b   : > { %v3455_v36 = vadd.f32 %v3454_v60, %v3365_v24  ;;  %v8217_v12 = vpop.f32.mrf.mxu0  ;;  %v3456_v35 = vpop.f32.mrf.mxu2  ;;  %v2845_v60 = vsel %vm177_vm3, %v2661_v29, %v2726_v2  ;;  %v2609_v24 = vunpack.c.h.bf16 %v8202_v45 }
 0x44c   : > { %v2881_v39 = vpack.c.bf16 %v2845_v60, %v2845_v60 }
 0x44d   : > { %3404 = vmatmul.bf16.gmra.mxu1 %v8213_v13  ;;  %3582 = vmatmul.bf16.gmra.mxu3 %v8215_v37  ;;  %v2485_v37 = vpack.c.bf16 %v2453_v31, %v2453_v31  ;;  %v2641_v50 = vrot.slane %v2609_v24, 7  ;;  %v2707_v59 = vrot.slane %v2609_v24, 1 }
 0x44e   : > { %3815 = vmatmul.bf16.gmra.mxu0 %v8173_v49  ;;  %v3061_v2 = vunpack.c.l.b16 %v2881_v39 }
 0x44f   : > { %v2551_v39 = vunpack.c.l.b16 %v2485_v37 }
 0x450   : > { %v3543_v53 = vpop.f32.mrf.mxu3  ;;  %3498 = vmatmul.bf16.gmra.mxu2 %v8166_v10  ;;  %v8252_v49 = vpack.c.b16 %v3061_v2, %v3060_v18 }
 0x451   : > { %v8241_v22 = vadd.f32 %v3543_v53, %v3455_v36  ;;  %v2953_v36 = vunpack.c.l.b16 %v2809_v61  ;;  %v2484_v53 = vpack.c.bf16 %v2452_v16, %v2452_v16  ;;  %v2724_v16 = vsel %vm437_vm1, %v2707_v59, %v2708_v57 }
 0x452   : > { %v3367_v42 = vpop.f32.mrf.mxu1  ;;  %9802 = vst [vmem:[#allocation51_spill] sm:$0xff] %v8252_v49 }
 0x453   : > { %v3457_v41 = vadd.f32 %v3456_v35, %v3367_v42  ;;  %v8244_v28 = vpop.f32.mrf.mxu0  ;;  %v3459_v4 = vpop.f32.mrf.mxu2  ;;  %v2640_v35 = vrot.slane %v2608_v38, 7  ;;  %v8250_v10 = vpack.c.b16 %v2953_v36, %v2952_v26  ;;  %v2550_v63 = vunpack.c.l.b16 %v2484_v53 }
 0x455   : > { %9801 = vst [vmem:[#allocation38_spill] sm:$0xff] %v8250_v10  ;;  %v2660_v19 = vsel %vm370_vm0, %v2639_v21, %v2640_v35  ;;  %v2659_v38 = vsel %vm370_vm0, %v2640_v35, %v2641_v50  ;;  %v5829_v21 = vld [vmem:[%s9453_s2 + $0x48] sm:$0xff]  ;;  %v8274_v24 = vpack.c.b16 %v2551_v39, %v2550_v63 }
 0x456   : > { %3857 = vmatpush.bf16.msrb.mxu1 %v5829_v21  ;;  %v2811_v36 = vpack.c.bf16 %v2659_v38, %v2659_v38 }
 0x458   : > { %v3545_v29 = vpop.f32.mrf.mxu3  ;;  %v2955_v39 = vunpack.c.l.b16 %v2811_v36 }
 0x459   : > { %v8248_v40 = vadd.f32 %v3545_v29, %v3457_v41  ;;  %v2725_v41 = vsel %vm437_vm1, %v2706_v52, %v2707_v59 }
 0x45a   : > { %v3370_v60 = vpop.f32.mrf.mxu1  ;;  %v2774_v31 = vsel %vm174_vm2, %v2725_v41, %v2660_v19  ;;  %v2882_v53 = vpack.c.bf16 %v2725_v41, %v2725_v41  ;;  %v2612_v19 = vunpack.c.l.bf16 %v8274_v24 }
 0x45b   : > { %v3460_v42 = vadd.f32 %v3459_v4, %v3370_v60  ;;  %v8254_v0 = vpop.f32.mrf.mxu0  ;;  %v3461_v61 = vpop.f32.mrf.mxu2  ;;  %v2847_v4 = vsel %vm177_vm3, %v2659_v38, %v2724_v16  ;;  %v2810_v2 = vpack.c.bf16 %v2774_v31, %v2774_v31  ;;  %v2611_v60 = vunpack.c.h.bf16 %v8239_v43 }
 0x45c   : > { %v2883_v29 = vpack.c.bf16 %v2847_v4, %v2847_v4  ;;  %v2710_v31 = vrot.slane %v2612_v19, 1 }
 0x45d   : > { %3409 = vmatmul.bf16.gmra.mxu1 %v8250_v10  ;;  %3587 = vmatmul.bf16.gmra.mxu3 %v8252_v49  ;;  %v2954_v63 = vunpack.c.l.b16 %v2810_v2  ;;  %v2642_v49 = vrot.slane %v2610_v11, 7  ;;  %v2643_v38 = vrot.slane %v2611_v60, 7 }
 0x45e   : > { %3820 = vmatmul.bf16.gmra.mxu0 %v8213_v13  ;;  %v3063_v16 = vunpack.c.l.b16 %v2883_v29 }
 0x45f   : > { %v2658_v36 = vsel %vm370_vm0, %v2641_v50, %v2642_v49  ;;  %v2657_v11 = vsel %vm370_vm0, %v2642_v49, %v2643_v38 }
 0x460   : > { %v3548_v37 = vpop.f32.mrf.mxu3  ;;  %3503 = vmatmul.bf16.gmra.mxu2 %v8202_v45 }
 0x461   : > { %v8276_v26 = vadd.f32 %v3548_v37, %v3460_v42  ;;  %v3062_v42 = vunpack.c.l.b16 %v2882_v53 }
 0x462   : > { %v3372_v52 = vpop.f32.mrf.mxu1 }
 0x463   : > { %v3462_v18 = vadd.f32 %v3461_v61, %v3372_v52  ;;  %v8279_v35 = vpop.f32.mrf.mxu0  ;;  %v3464_v59 = vpop.f32.mrf.mxu2  ;;  %v2709_v61 = vrot.slane %v2611_v60, 1  ;;  %v8285_v52 = vpack.c.b16 %v2955_v39, %v2954_v63  ;;  %v8287_v45 = vpack.c.b16 %v3063_v16, %v3062_v42 }
 0x464   : > { %v2813_v60 = vpack.c.bf16 %v2657_v11, %v2657_v11 }
 0x465   : > { %9803 = vst [vmem:[#allocation42_spill] sm:$0xff] %v8287_v45  ;;  %v2722_v2 = vsel %vm437_vm1, %v2709_v61, %v2710_v31 }
 0x466   : > { %v2849_v50 = vsel %vm177_vm3, %v2657_v11, %v2722_v2  ;;  %v2957_v11 = vunpack.c.l.b16 %v2813_v60 }
 0x467   : > { %v2885_v42 = vpack.c.bf16 %v2849_v50, %v2849_v50 }
 0x468   : > { %v3550_v37 = vpop.f32.mrf.mxu3 }
 0x469   : > { %v8283_v21 = vadd.f32 %v3550_v37, %v3462_v18  ;;  %v2723_v18 = vsel %vm437_vm1, %v2708_v57, %v2709_v61  ;;  %v2613_v61 = vunpack.c.h.bf16 %v8274_v24  ;;  %v3065_v2 = vunpack.c.l.b16 %v2885_v42  ;;  %v5828_v42 = vld [vmem:[%s9453_s2 + $0x40] sm:$0xff] }
 0x46a   : > { %v3375_v41 = vpop.f32.mrf.mxu1  ;;  %v2776_v29 = vsel %vm174_vm2, %v2723_v18, %v2658_v36  ;;  %v2884_v39 = vpack.c.bf16 %v2723_v18, %v2723_v18  ;;  %3858 = vmatpush.bf16.msrb.mxu1 %v5828_v42  ;;  %v5873_v42 = vld [vmem:[%s9453_s2 + $0x1a8] sm:$0xff] }
 0x46b   : > { %v3465_v4 = vadd.f32 %v3464_v59, %v3375_v41  ;;  %v8289_v13 = vpop.f32.mrf.mxu0  ;;  %v3466_v1 = vpop.f32.mrf.mxu2  ;;  %v2812_v57 = vpack.c.bf16 %v2776_v29, %v2776_v29  ;;  %v5843_v41 = vld [vmem:[%s9453_s2 + $0xb8] sm:$0xff]  ;;  %v2644_v29 = vrot.slane %v2612_v19, 7  ;;  %v2711_v50 = vrot.slane %v2613_v61, 1 }
 0x46c   : > { %3940 = vmatpush.bf16.msra.mxu2 %v5843_v41  ;;  %v3064_v18 = vunpack.c.l.b16 %v2884_v39 }
 0x46d   : > { %3414 = vmatmul.bf16.gmra.mxu1 %v8285_v52  ;;  %3592 = vmatmul.bf16.gmra.mxu3 %v8287_v45  ;;  %v2956_v36 = vunpack.c.l.b16 %v2812_v57  ;;  %v8324_v45 = vrot.slane %v2613_v61, 7  ;;  %v2656_v60 = vsel %vm370_vm0, %v2643_v38, %v2644_v29  ;;  %v2721_v19 = vsel %vm437_vm1, %v2710_v31, %v2711_v50  ;;  %v5875_v61 = vld [vmem:[%s9453_s2 + $0x1b8] sm:$0xff] }
 0x46e   : > { %3825 = vmatmul.bf16.gmra.mxu0 %v8250_v10  ;;  %v8328_v41 = vpack.c.b16 %v3065_v2, %v3064_v18  ;;  %v2720_v39 = vsel %vm437_vm1, %v2711_v50, %v8024_v5  ;;  %v8349_v38 = vadd.f32 %v8207_v6, %v8211_v3  ;;  %v2778_v31 = vsel %vm174_vm2, %v2721_v19, %v2656_v60 }
 0x46f   : > { %v2814_v18 = vpack.c.bf16 %v2778_v31, %v2778_v31  ;;  %4222 = vmatpush.bf16.msra.mxu3 %v5875_v61  ;;  %v5882_v31 = vld [vmem:[%s9453_s2 + $0x1f0] sm:$0xff] }
 0x470   : > { %v3553_v53 = vpop.f32.mrf.mxu3  ;;  %3508 = vmatmul.bf16.gmra.mxu2 %v8239_v43  ;;  %9804 = vst [vmem:[#allocation44_spill] sm:$0xff] %v8328_v41 }
 0x471   : > { %v8306_v59 = vadd.f32 %v3553_v53, %v3465_v4  ;;  %v8317_v4 = vadd.f32 %v8177_v14, %v8204_v58  ;;  %v8326_v58 = vpack.c.b16 %v2957_v11, %v2956_v36 }
 0x472   : > { %v3377_v49 = vpop.f32.mrf.mxu1 }
 0x473   : > { %v3467_v63 = vadd.f32 %v3466_v1, %v3377_v49  ;;  %v8309_v16 = vpop.f32.mrf.mxu0  ;;  %v3469_v37 = vpop.f32.mrf.mxu2  ;;  %v5842_v1 = vld [vmem:[%s9453_s2 + $0xb0] sm:$0xff]  ;;  %v8517_v27 = vadd.f32 %v8289_v13, %v8306_v59 }
 0x474   : > { %3941 = vmatpush.bf16.msra.mxu2 %v5842_v1  ;;  %v5883_v1 = vld [vmem:[%s9453_s2 + $0x1f8] sm:$0xff] }
 0x475   : > { %4311 = vmatpush.bf16.msra.mxu0 %v5883_v1 }
 0x478   : > { %v3555_v53 = vpop.f32.mrf.mxu3 }
 0x479   : > { %v8322_v49 = vadd.f32 %v3555_v53, %v3467_v63  ;;  %v5841_v63 = vld [vmem:[%s9453_s2 + $0xa8] sm:$0xff]  ;;  %4312 = vmatpush.bf16.msra.mxu0 %v5882_v31  ;;  %v2654_v31 = vsel %vm370_vm0, %v8324_v45, %v8020_v34  ;;  %v5871_v34 = vld [vmem:[%s9453_s2 + $0x198] sm:$0xff] }
 0x47a   : > { %v3380_v43 = vpop.f32.mrf.mxu1  ;;  %3942 = vmatpush.bf16.msra.mxu2 %v5841_v63 }
 0x47b   : > { %v3470_v14 = vadd.f32 %v3469_v37, %v3380_v43  ;;  %v8330_v10 = vpop.f32.mrf.mxu0  ;;  %v3471_v57 = vpop.f32.mrf.mxu2  ;;  %v2655_v43 = vsel %vm370_vm0, %v2644_v29, %v8324_v45  ;;  %v5840_v37 = vld [vmem:[%s9453_s2 + $0xa0] sm:$0xff]  ;;  %v2886_v29 = vpack.c.bf16 %v2721_v19, %v2721_v19  ;;  %v8385_v19 = vadd.f32 %v8217_v12, %v8241_v22  ;;  %v5881_v12 = vld [vmem:[%s9453_s2 + $0x1e8] sm:$0xff] }
 0x47c   : > { %v2851_v3 = vsel %vm177_vm3, %v2655_v43, %v2720_v39  ;;  %v2815_v53 = vpack.c.bf16 %v2655_v43, %v2655_v43  ;;  %v5874_v39 = vld [vmem:[%s9453_s2 + $0x1b0] sm:$0xff]  ;;  %v8531_v13 = vadd.f32 %v8309_v16, %v8322_v49 }
 0x47d   : > { %3419 = vmatmul.bf16.gmra.mxu1 %v8326_v58  ;;  %3597 = vmatmul.bf16.gmra.mxu3 %v8328_v41  ;;  %v2887_v50 = vpack.c.bf16 %v2851_v3, %v2851_v3  ;;  %v5838_v43 = vld [vmem:[%s9453_s2 + $0x90] sm:$0xff] }
 0x47e   : > { %3830 = vmatmul.bf16.gmra.mxu0 %v8285_v52  ;;  %3943 = vmatpush.bf16.msra.mxu2 %v5840_v37  ;;  %v2958_v37 = vunpack.c.l.b16 %v2814_v18  ;;  %v2959_v61 = vunpack.c.l.b16 %v2815_v53 }
 0x47f   : > { %4223 = vmatpush.bf16.msra.mxu3 %v5874_v39  ;;  %v3067_v3 = vunpack.c.l.b16 %v2887_v50  ;;  %4313 = vmatpush.bf16.msra.mxu0 %v5881_v12  ;;  %v5837_v50 = vld [vmem:[%s9453_s2 + $0x88] sm:$0xff] }
 0x480   : > { %v3558_v6 = vpop.f32.mrf.mxu3  ;;  %3513 = vmatmul.bf16.gmra.mxu2 %v8274_v24  ;;  %v8400_v41 = vpack.c.b16 %v2959_v61, %v2958_v37  ;;  %v5836_v37 = vld [vmem:[%s9453_s2 + $0x80] sm:$0xff] }
 0x481   : > { %v8368_v36 = vadd.f32 %v3558_v6, %v3470_v14  ;;  %v5839_v14 = vld [vmem:[%s9453_s2 + $0x98] sm:$0xff]  ;;  %v3066_v6 = vunpack.c.l.b16 %v2886_v29 }
 0x482   : > { %v3382_v11 = vpop.f32.mrf.mxu1  ;;  %3944 = vmatpush.bf16.msra.mxu2 %v5839_v14 }
 0x483   : > { %v3472_v2 = vadd.f32 %v3471_v57, %v3382_v11  ;;  %v8371_v60 = vpop.f32.mrf.mxu0  ;;  %v3474_v63 = vpop.f32.mrf.mxu2  ;;  %v2616_v57 = vunpack.c.l.bf16 %v7996_v51  ;;  %4224 = vmatpush.bf16.msra.mxu3 %v5873_v42  ;;  %v8402_v18 = vpack.c.b16 %v3067_v3, %v3066_v6  ;;  %v8427_v42 = vadd.f32 %v8244_v28, %v8248_v40  ;;  %v5879_v40 = vld [vmem:[%s9453_s2 + $0x1d8] sm:$0xff] }
 0x485   : > { %v8398_v11 = vrot.slane %v2616_v57, 1 }
 0x486   : > { %3945 = vmatpush.bf16.msra.mxu2 %v5838_v43 }
 0x487   : > { %v2719_v43 = vsel %vm437_vm1, %v8028_v32, %v8398_v11  ;;  %v2780_v32 = vsel %vm174_vm2, %v8044_v33, %v2654_v31 }
 0x488   : > { %v3560_v22 = vpop.f32.mrf.mxu3  ;;  %v2853_v28 = vsel %vm177_vm3, %v8038_v62, %v2719_v43  ;;  %v2816_v12 = vpack.c.bf16 %v2780_v32, %v2780_v32  ;;  %v5870_v62 = vld [vmem:[%s9453_s2 + $0x190] sm:$0xff]  ;;  %v2648_v43 = vrot.slane %v2616_v57, 7 }
 0x489   : > { %v8396_v1 = vadd.f32 %v3560_v22, %v3472_v2  ;;  %v5872_v2 = vld [vmem:[%s9453_s2 + $0x1a0] sm:$0xff]  ;;  %v2889_v22 = vpack.c.bf16 %v2853_v28, %v2853_v28 }
 0x48a   : > { %v3385_v14 = vpop.f32.mrf.mxu1  ;;  %3946 = vmatpush.bf16.msra.mxu2 %v5837_v50  ;;  %4225 = vmatpush.bf16.msra.mxu3 %v5872_v2  ;;  %v8458_v50 = vadd.f32 %v8254_v0, %v8276_v26  ;;  %v2960_v2 = vunpack.c.l.b16 %v2816_v12  ;;  %v2653_v12 = vsel %vm370_vm0, %v7833_v20, %v2648_v43 }
 0x48b   : > { %v3475_v39 = vadd.f32 %v3474_v63, %v3385_v14  ;;  %v8404_v53 = vpop.f32.mrf.mxu0  ;;  %v3476_v29 = vpop.f32.mrf.mxu2  ;;  %v5880_v63 = vld [vmem:[%s9453_s2 + $0x1e0] sm:$0xff] }
 0x48c   : > { %4314 = vmatpush.bf16.msra.mxu0 %v5880_v63  ;;  %v3069_v63 = vunpack.c.l.b16 %v2889_v22  ;;  %v8471_v28 = vpack.c.b16 %v8067_v8, %v2960_v2  ;;  %v5868_v22 = vld [vmem:[%s9453_s2 + $0x180] sm:$0xff] }
 0x48d   : > { %3424 = vmatmul.bf16.gmra.mxu1 %v8400_v41  ;;  %3602 = vmatmul.bf16.gmra.mxu3 %v8402_v18 }
 0x48e   : > { %3835 = vmatmul.bf16.gmra.mxu0 %v8326_v58  ;;  %3947 = vmatpush.bf16.msra.mxu2 %v5836_v37  ;;  %v5877_v37 = vld [vmem:[%s9453_s2 + $0x1c8] sm:$0xff] }
 0x48f   : > { %4226 = vmatpush.bf16.msra.mxu3 %v5871_v34 }
 0x490   : > { %v3563_v45 = vpop.f32.mrf.mxu3  ;;  %3518 = vmatmul.bf16.gmra.mxu2 %v7813_v15  ;;  %4315 = vmatpush.bf16.msra.mxu0 %v5879_v40  ;;  %v8474_v40 = vpack.c.b16 %v3069_v63, %v8076_v46 }
 0x491   : > { %v8445_v61 = vadd.f32 %v3563_v45, %v3475_v39  ;;  %v5878_v39 = vld [vmem:[%s9453_s2 + $0x1d0] sm:$0xff]  ;;  %v9805_v45 = vunpack.c.h.bf16 %v7996_v51 }
 0x492   : > { %v3387_v6 = vpop.f32.mrf.mxu1 }
 0x493   : > { %v3477_v3 = vadd.f32 %v3476_v29, %v3387_v6  ;;  %v8448_v33 = vpop.f32.mrf.mxu0  ;;  %v3479_v14 = vpop.f32.mrf.mxu2  ;;  %4227 = vmatpush.bf16.msra.mxu3 %v5870_v62  ;;  %v5869_v29 = vld [vmem:[%s9453_s2 + $0x188] sm:$0xff]  ;;  %v2715_v0 = vrot.slane %v9805_v45, 1  ;;  %v8500_v62 = vadd.f32 %v8279_v35, %v8283_v21 }
 0x494   : > { %4316 = vmatpush.bf16.msra.mxu0 %v5878_v39  ;;  %v5891_v39 = vld [vmem:[%s9453_s2 + $0x238] sm:$0xff] }
 0x495   : > { %v2717_v20 = vsel %vm437_vm1, %v2715_v0, %v8024_v5  ;;  %4400 = vmatpush.bf16.msra.mxu1 %v5891_v39 }
 0x497   : > { %4228 = vmatpush.bf16.msra.mxu3 %v5869_v29 }
 0x498   : > { %v3565_v31 = vpop.f32.mrf.mxu3  ;;  %4317 = vmatpush.bf16.msra.mxu0 %v5877_v37 }
 0x499   : > { %v8466_v34 = vadd.f32 %v3565_v31, %v3477_v3  ;;  %v2652_v3 = vsel %vm370_vm0, %v2648_v43, %v8048_v17  ;;  %v2718_v17 = vsel %vm437_vm1, %v8398_v11, %v2715_v0 }
 0x49a   : > { %v3390_v26 = vpop.f32.mrf.mxu1  ;;  %v2782_v2 = vsel %vm174_vm2, %v2718_v17, %v2653_v12  ;;  %v2855_v11 = vsel %vm177_vm3, %v2652_v3, %v2717_v20  ;;  %v2819_v21 = vpack.c.bf16 %v2652_v3, %v2652_v3  ;;  %v2890_v43 = vpack.c.bf16 %v2718_v17, %v2718_v17 }
 0x49b   : > { %v3480_v32 = vadd.f32 %v3479_v14, %v3390_v26  ;;  %v8476_v57 = vpop.f32.mrf.mxu0  ;;  %v3481_v6 = vpop.f32.mrf.mxu2  ;;  %v5876_v14 = vld [vmem:[%s9453_s2 + $0x1c0] sm:$0xff]  ;;  %4229 = vmatpush.bf16.msra.mxu3 %v5868_v22  ;;  %v2818_v31 = vpack.c.bf16 %v2782_v2, %v2782_v2  ;;  %v2891_v37 = vpack.c.bf16 %v2855_v11, %v2855_v11  ;;  %v9807_v11 = vpack.c.b16 %v7875_v23, %v7873_v47  ;;  %v5890_v23 = vld [vmem:[%s9453_s2 + $0x230] sm:$0xff] }
 0x49c   : > { %4318 = vmatpush.bf16.msra.mxu0 %v5876_v14  ;;  %v2963_v26 = vunpack.c.l.b16 %v2819_v21  ;;  %v8553_v47 = vadd.f32 %v8371_v60, %v8396_v1  ;;  %4401 = vmatpush.bf16.msra.mxu1 %v5890_v23  ;;  %v8566_v60 = vadd.f32 %v8404_v53, %v8445_v61 }
 0x49d   : > { %3429 = vmatmul.bf16.gmra.mxu1 %v8471_v28  ;;  %3607 = vmatmul.bf16.gmra.mxu3 %v8474_v40  ;;  %v2962_v54 = vunpack.c.l.b16 %v2818_v31  ;;  %v3071_v12 = vunpack.c.l.b16 %v2891_v37 }
 0x49e   : > { %3840 = vmatmul.bf16.gmra.mxu0 %v8400_v41 }
 0x4a0   : > { %v3568_v29 = vpop.f32.mrf.mxu3  ;;  %3523 = vmatmul.bf16.gmra.mxu2 %v7996_v51 }
 0x4a1   : > { %v8510_v5 = vadd.f32 %v3568_v29, %v3480_v32  ;;  %v3070_v32 = vunpack.c.l.b16 %v2890_v43  ;;  %v8543_v43 = vadd.f32 %v8330_v10, %v8368_v36 }
 0x4a2   : > { %v3392_v35 = vpop.f32.mrf.mxu1 }
 0x4a3   : > { %v3482_v63 = vadd.f32 %v3481_v6, %v3392_v35  ;;  %v8513_v45 = vpop.f32.mrf.mxu0  ;;  %v3484_v0 = vpop.f32.mrf.mxu2  ;;  %v8521_v6 = vpack.c.b16 %v2963_v26, %v2962_v54  ;;  %v8523_v17 = vpack.c.b16 %v3071_v12, %v3070_v32 }
 0x4a5   : > { %9806 = vst [vmem:[#allocation45_spill] sm:$0xff] %v8523_v17 }
 0x4a8   : > { %v3570_v22 = vpop.f32.mrf.mxu3 }
 0x4a9   : > { %v8519_v14 = vadd.f32 %v3570_v22, %v3482_v63 }
 0x4aa   : > { %v3395_v20 = vpop.f32.mrf.mxu1 }
 0x4ab   : > { %v3485_v3 = vadd.f32 %v3484_v0, %v3395_v20  ;;  %v8525_v39 = vpop.f32.mrf.mxu0  ;;  %v3486_v29 = vpop.f32.mrf.mxu2  ;;  %v8596_v23 = vadd.f32 %v8513_v45, %v8519_v14 }
 0x4ad   : > { %3434 = vmatmul.bf16.gmra.mxu1 %v8521_v6  ;;  %3612 = vmatmul.bf16.gmra.mxu3 %v8523_v17 }
 0x4ae   : > { %3845 = vmatmul.bf16.gmra.mxu0 %v8471_v28 }
 0x4b0   : > { %v3573_v59 = vpop.f32.mrf.mxu3  ;;  %3948 = vmatmul.bf16.vlgmr.msra.gmra.mxu2 %v9807_v11 }
 0x4b1   : > { %v8534_v2 = vadd.f32 %v3573_v59, %v3485_v3 }
 0x4b2   : > { %v3397_v35 = vpop.f32.mrf.mxu1 }
 0x4b3   : > { %v3487_v21 = vadd.f32 %v3486_v29, %v3397_v35  ;;  %v8539_v63 = vpop.f32.mrf.mxu0  ;;  %v3489_v31 = vpop.f32.mrf.mxu2  ;;  %v8609_v45 = vadd.f32 %v8525_v39, %v8534_v2 }
 0x4b8   : > { %v3575_v16 = vpop.f32.mrf.mxu3 }
 0x4b9   : > { %v8545_v49 = vadd.f32 %v3575_v16, %v3487_v21 }
 0x4ba   : > { %v3400_v37 = vpop.f32.mrf.mxu1 }
 0x4bb   : > { %v3490_v0 = vadd.f32 %v3489_v31, %v3400_v37  ;;  %v8547_v54 = vpop.f32.mrf.mxu0  ;;  %v3491_v26 = vpop.f32.mrf.mxu2 }
 0x4bd   : > { %3859 = vmatmul.bf16.vlgmr.msrb.gmra.mxu1 %v7811_v44  ;;  %4230 = vmatmul.bf16.vlgmr.msra.gmra.mxu3 %v7895_v55 }
 0x4be   : > { %4319 = vmatmul.bf16.vlgmr.msra.gmra.mxu0 %v7811_v44 }
 0x4c0   : > { %v3578_v10 = vpop.f32.mrf.mxu3  ;;  %3953 = vmatmul.bf16.gmra.mxu2 %v7863_v25  ;;  %v8576_v25 = vadd.f32 %v8448_v33, %v8466_v34 }
 0x4c1   : > { %v8559_v36 = vadd.f32 %v3578_v10, %v3490_v0  ;;  %v9808_v10 = vld [vmem:[#allocation47_spill] sm:$0xff] }
 0x4c2   : > { %v3402_v32 = vpop.f32.mrf.mxu1 }
 0x4c3   : > { %v3492_v12 = vadd.f32 %v3491_v26, %v3402_v32  ;;  %v8562_v22 = vpop.f32.mrf.mxu0  ;;  %v3494_v55 = vpop.f32.mrf.mxu2 }
 0x4c8   : > { %v3580_v1 = vpop.f32.mrf.mxu3 }
 0x4c9   : > { %v8568_v20 = vadd.f32 %v3580_v1, %v3492_v12  ;;  %v9809_v12 = vld [vmem:[#allocation32_spill] sm:$0xff] }
 0x4ca   : > { %v3405_v3 = vpop.f32.mrf.mxu1 }
 0x4cb   : > { %v3495_v29 = vadd.f32 %v3494_v55, %v3405_v3  ;;  %v8570_v59 = vpop.f32.mrf.mxu0  ;;  %v3496_v11 = vpop.f32.mrf.mxu2 }
 0x4cd   : > { %3864 = vmatmul.bf16.gmra.mxu1 %v7815_v7  ;;  %4235 = vmatmul.bf16.gmra.mxu3 %v7924_v30  ;;  %v8586_v7 = vadd.f32 %v8476_v57, %v8510_v5  ;;  %v5889_v57 = vld [vmem:[%s9453_s2 + $0x228] sm:$0xff] }
 0x4ce   : > { %4324 = vmatmul.bf16.gmra.mxu0 %v7819_v56  ;;  %4402 = vmatpush.bf16.msra.mxu1 %v5889_v57 }
 0x4d0   : > { %v3583_v53 = vpop.f32.mrf.mxu3  ;;  %3958 = vmatmul.bf16.gmra.mxu2 %v7898_v48 }
 0x4d1   : > { %v8579_v61 = vadd.f32 %v3583_v53, %v3495_v29 }
 0x4d2   : > { %v3407_v35 = vpop.f32.mrf.mxu1 }
 0x4d3   : > { %v3497_v21 = vadd.f32 %v3496_v11, %v3407_v35  ;;  %v8582_v31 = vpop.f32.mrf.mxu0  ;;  %v3499_v16 = vpop.f32.mrf.mxu2 }
 0x4d8   : > { %v3585_v30 = vpop.f32.mrf.mxu3 }
 0x4d9   : > { %v8588_v37 = vadd.f32 %v3585_v30, %v3497_v21  ;;  %v9810_v21 = vld [vmem:[#allocation3_spill] sm:$0xff]  ;;  %v9811_v30 = vld [vmem:[#allocation46_spill] sm:$0xff] }
 0x4da   : > { %v3410_v33 = vpop.f32.mrf.mxu1 }
 0x4db   : > { %v3500_v34 = vadd.f32 %v3499_v16, %v3410_v33  ;;  %v8590_v0 = vpop.f32.mrf.mxu0  ;;  %v3501_v26 = vpop.f32.mrf.mxu2  ;;  %v8619_v16 = vadd.f32 %v8539_v63, %v8545_v49  ;;  %v9812_v33 = vld [vmem:[#allocation43_spill] sm:$0xff] }
 0x4dd   : > { %3869 = vmatmul.bf16.gmra.mxu1 %v7811_v44  ;;  %4240 = vmatmul.bf16.gmra.mxu3 %v7955_v9 }
 0x4de   : > { %4329 = vmatmul.bf16.gmra.mxu0 %v9808_v10 }
 0x4e0   : > { %v3588_v5 = vpop.f32.mrf.mxu3  ;;  %3963 = vmatmul.bf16.gmra.mxu2 %v9809_v12 }
 0x4e1   : > { %v8602_v32 = vadd.f32 %v3588_v5, %v3500_v34 }
 0x4e2   : > { %v3412_v55 = vpop.f32.mrf.mxu1 }
 0x4e3   : > { %v3502_v44 = vadd.f32 %v3501_v26, %v3412_v55  ;;  %v8605_v1 = vpop.f32.mrf.mxu0  ;;  %v3504_v9 = vpop.f32.mrf.mxu2 }
 0x4e8   : > { %v3590_v14 = vpop.f32.mrf.mxu3 }
 0x4e9   : > { %v8611_v3 = vadd.f32 %v3590_v14, %v3502_v44 }
 0x4ea   : > { %v3415_v29 = vpop.f32.mrf.mxu1 }
 0x4eb   : > { %v3505_v11 = vadd.f32 %v3504_v9, %v3415_v29  ;;  %v8613_v53 = vpop.f32.mrf.mxu0  ;;  %v3506_v35 = vpop.f32.mrf.mxu2  ;;  %v9813_v29 = vld [vmem:[#allocation28_spill] sm:$0xff] }
 0x4ed   : > { %3874 = vmatmul.bf16.gmra.mxu1 %v7819_v56  ;;  %4245 = vmatmul.bf16.gmra.mxu3 %v9810_v21  ;;  %v8629_v56 = vadd.f32 %v8547_v54, %v8559_v36  ;;  %v5888_v54 = vld [vmem:[%s9453_s2 + $0x220] sm:$0xff] }
 0x4ee   : > { %4334 = vmatmul.bf16.gmra.mxu0 %v9811_v30  ;;  %4403 = vmatpush.bf16.msra.mxu1 %v5888_v54  ;;  %v9816_v54 = vld [vmem:[#allocation13_spill] sm:$0xff] }
 0x4f0   : > { %v3593_v39 = vpop.f32.mrf.mxu3  ;;  %3968 = vmatmul.bf16.gmra.mxu2 %v9812_v33 }
 0x4f1   : > { %v8622_v2 = vadd.f32 %v3593_v39, %v3505_v11  ;;  %v8639_v11 = vadd.f32 %v8562_v22, %v8568_v20  ;;  %v9815_v39 = vld [vmem:[#allocation4_spill] sm:$0xff]  ;;  %v8652_v22 = vadd.f32 %v8570_v59, %v8579_v61 }
 0x4f2   : > { %v3417_v34 = vpop.f32.mrf.mxu1 }
 0x4f3   : > { %v3507_v26 = vadd.f32 %v3506_v35, %v3417_v34  ;;  %v8625_v57 = vpop.f32.mrf.mxu0  ;;  %v3509_v5 = vpop.f32.mrf.mxu2  ;;  %v9814_v35 = vld [vmem:[#allocation22_spill] sm:$0xff] }
 0x4f8   : > { %v3595_v55 = vpop.f32.mrf.mxu3 }
 0x4f9   : > { %v8631_v44 = vadd.f32 %v3595_v55, %v3507_v26 }
 0x4fa   : > { %v3420_v63 = vpop.f32.mrf.mxu1 }
 0x4fb   : > { %v3510_v49 = vadd.f32 %v3509_v5, %v3420_v63  ;;  %v8633_v9 = vpop.f32.mrf.mxu0  ;;  %v3511_v14 = vpop.f32.mrf.mxu2 }
 0x4fd   : > { %3879 = vmatmul.bf16.gmra.mxu1 %v9808_v10  ;;  %4250 = vmatmul.bf16.gmra.mxu3 %v9813_v29 }
 0x4fe   : > { %4339 = vmatmul.bf16.gmra.mxu0 %v9814_v35 }
 0x500   : > { %v3598_v36 = vpop.f32.mrf.mxu3  ;;  %3973 = vmatmul.bf16.gmra.mxu2 %v9815_v39 }
 0x501   : > { %v8645_v21 = vadd.f32 %v3598_v36, %v3510_v49  ;;  %v9817_v36 = vld [vmem:[#allocation50_spill] sm:$0xff] }
 0x502   : > { %v3422_v34 = vpop.f32.mrf.mxu1 }
 0x503   : > { %v3512_v10 = vadd.f32 %v3511_v14, %v3422_v34  ;;  %v8648_v26 = vpop.f32.mrf.mxu0  ;;  %v3514_v5 = vpop.f32.mrf.mxu2  ;;  %v8662_v14 = vadd.f32 %v8582_v31, %v8588_v37  ;;  %v9818_v34 = vld [vmem:[#allocation5_spill] sm:$0xff] }
 0x508   : > { %v3600_v20 = vpop.f32.mrf.mxu3 }
 0x509   : > { %v8654_v55 = vadd.f32 %v3600_v20, %v3512_v10 }
 0x50a   : > { %v3425_v63 = vpop.f32.mrf.mxu1 }
 0x50b   : > { %v3515_v29 = vadd.f32 %v3514_v5, %v3425_v63  ;;  %v8656_v46 = vpop.f32.mrf.mxu0  ;;  %v3516_v49 = vpop.f32.mrf.mxu2 }
 0x50d   : > { %3884 = vmatmul.bf16.gmra.mxu1 %v9811_v30  ;;  %4255 = vmatmul.bf16.gmra.mxu3 %v9816_v54  ;;  %v8672_v30 = vadd.f32 %v8590_v0, %v8602_v32  ;;  %v5887_v0 = vld [vmem:[%s9453_s2 + $0x218] sm:$0xff] }
 0x50e   : > { %4344 = vmatmul.bf16.gmra.mxu0 %v9817_v36  ;;  %4404 = vmatpush.bf16.msra.mxu1 %v5887_v0  ;;  %v9824_v0 = vld [vmem:[#allocation17_spill] sm:$0xff] }
 0x50f   : > { %9819 = vst [vmem:[#allocation15_spill] sm:$0xff] %v8672_v30 }
 0x510   : > { %v3603_v59 = vpop.f32.mrf.mxu3  ;;  %3978 = vmatmul.bf16.gmra.mxu2 %v9818_v34 }
 0x511   : > { %v8665_v61 = vadd.f32 %v3603_v59, %v3515_v29  ;;  %v9820_v59 = vld [vmem:[#allocation11_spill] sm:$0xff] }
 0x512   : > { %v3427_v10 = vpop.f32.mrf.mxu1 }
 0x513   : > { %v3517_v5 = vadd.f32 %v3516_v49, %v3427_v10  ;;  %v8668_v20 = vpop.f32.mrf.mxu0  ;;  %v3519_v63 = vpop.f32.mrf.mxu2  ;;  %v8682_v49 = vadd.f32 %v8605_v1, %v8611_v3  ;;  %v9822_v10 = vld [vmem:[#allocation41_spill] sm:$0xff]  ;;  %v8695_v1 = vadd.f32 %v8613_v53, %v8622_v2 }
 0x515   : > { %9821 = vst [vmem:[#allocation24_spill] sm:$0xff] %v8682_v49 }
 0x518   : > { %v3605_v54 = vpop.f32.mrf.mxu3 }
 0x519   : > { %v8674_v17 = vadd.f32 %v3605_v54, %v3517_v5 }
 0x51a   : > { %v3430_v31 = vpop.f32.mrf.mxu1 }
 0x51b   : > { %v3520_v37 = vadd.f32 %v3519_v63, %v3430_v31  ;;  %v8676_v39 = vpop.f32.mrf.mxu0  ;;  %v3521_v29 = vpop.f32.mrf.mxu2  ;;  %v9823_v63 = vld [vmem:[#allocation14_spill] sm:$0xff] }
 0x51d   : > { %3889 = vmatmul.bf16.gmra.mxu1 %v9814_v35  ;;  %4260 = vmatmul.bf16.gmra.mxu3 %v9820_v59 }
 0x51e   : > { %4349 = vmatmul.bf16.gmra.mxu0 %v9822_v10 }
 0x520   : > { %v3608_v32 = vpop.f32.mrf.mxu3  ;;  %3983 = vmatmul.bf16.gmra.mxu2 %v9823_v63 }
 0x521   : > { %v8688_v5 = vadd.f32 %v3608_v32, %v3520_v37  ;;  %v9826_v32 = vld [vmem:[#allocation6_spill] sm:$0xff] }
 0x522   : > { %v3432_v54 = vpop.f32.mrf.mxu1 }
 0x523   : > { %v3522_v35 = vadd.f32 %v3521_v29, %v3432_v54  ;;  %v8691_v31 = vpop.f32.mrf.mxu0  ;;  %v3524_v59 = vpop.f32.mrf.mxu2  ;;  %v8705_v29 = vadd.f32 %v8625_v57, %v8631_v44  ;;  %v9827_v54 = vld [vmem:[#allocation18_spill] sm:$0xff] }
 0x525   : > { %9825 = vst [vmem:[#allocation21_spill] sm:$0xff] %v8705_v29 }
 0x528   : > { %v3610_v3 = vpop.f32.mrf.mxu3 }
 0x529   : > { %v8697_v34 = vadd.f32 %v3610_v3, %v3522_v35 }
 0x52a   : > { %v3435_v49 = vpop.f32.mrf.mxu1 }
 0x52b   : > { %v3525_v33 = vadd.f32 %v3524_v59, %v3435_v49  ;;  %v8699_v30 = vpop.f32.mrf.mxu0  ;;  %v3526_v37 = vpop.f32.mrf.mxu2 }
 0x52d   : > { %3894 = vmatmul.bf16.gmra.mxu1 %v9817_v36  ;;  %4265 = vmatmul.bf16.gmra.mxu3 %v9824_v0  ;;  %v8715_v36 = vadd.f32 %v8633_v9, %v8645_v21  ;;  %v9830_v9 = vld [vmem:[#allocation9_spill] sm:$0xff]  ;;  %v5886_v21 = vld [vmem:[%s9453_s2 + $0x210] sm:$0xff] }
 0x52e   : > { %4354 = vmatmul.bf16.gmra.mxu0 %v9826_v32  ;;  %4405 = vmatpush.bf16.msra.mxu1 %v5886_v21 }
 0x530   : > { %v3613_v53 = vpop.f32.mrf.mxu3  ;;  %3988 = vmatmul.bf16.gmra.mxu2 %v9827_v54 }
 0x531   : > { %v8708_v2 = vadd.f32 %v3613_v53, %v3525_v33 }
 0x532   : > { %v3437_v35 = vpop.f32.mrf.mxu1 }
 0x533   : > { %v3527_v49 = vadd.f32 %v3526_v37, %v3437_v35  ;;  %v8711_v59 = vpop.f32.mrf.mxu0  ;;  %v3949_v3 = vpop.f32.mrf.mxu2  ;;  %v9829_v37 = vld [vmem:[#allocation36_spill] sm:$0xff]  ;;  %v8726_v35 = vadd.f32 %v8648_v26, %v8654_v55  ;;  %v8740_v26 = vadd.f32 %v8656_v46, %v8665_v61  ;;  %v9835_v46 = vld [vmem:[#allocation10_spill] sm:$0xff] }
 0x538   : > { %v3615_v0 = vpop.f32.mrf.mxu3 }
 0x539   : > { %v8717_v63 = vadd.f32 %v3615_v0, %v3527_v49  ;;  %v9832_v0 = vld [vmem:[#allocation16_spill] sm:$0xff] }
 0x53a   : > { %v3860_v57 = vpop.f32.mrf.mxu1 }
 0x53b   : > { %v3861_v44 = vadd.f32 %v3860_v57, %v8317_v4  ;;  %v4320_v29 = vpop.f32.mrf.mxu0  ;;  %v3951_v33 = vpop.f32.mrf.mxu2 }
 0x53d   : > { %v8720_v53 = vadd.f32 %v3949_v3, %v3861_v44  ;;  %3899 = vmatmul.bf16.gmra.mxu1 %v9822_v10  ;;  %4270 = vmatmul.bf16.gmra.mxu3 %v9829_v37 }
 0x53e   : > { %4359 = vmatmul.bf16.gmra.mxu0 %v9830_v9 }
 0x53f   : > { %9828 = vst [vmem:[#allocation23_spill] sm:$0xff] %v8720_v53 }
 0x540   : > { %v4231_v49 = vpop.f32.mrf.mxu3  ;;  %3993 = vmatmul.bf16.gmra.mxu2 %v9832_v0 }
 0x541   : > { %v8732_v4 = vadd.f32 %v4320_v29, %v4231_v49 }
 0x542   : > { %v3862_v3 = vpop.f32.mrf.mxu1 }
 0x543   : > { %9831 = vst [vmem:[#allocation30_spill] sm:$0xff] %v8732_v4  ;;  %v3863_v10 = vadd.f32 %v3862_v3, %v8349_v38  ;;  %v4322_v57 = vpop.f32.mrf.mxu0  ;;  %v3954_v44 = vpop.f32.mrf.mxu2  ;;  %v9834_v38 = vld [vmem:[#allocation38_spill] sm:$0xff] }
 0x545   : > { %v8736_v37 = vadd.f32 %v3951_v33, %v3863_v10  ;;  %v8751_v33 = vadd.f32 %v8668_v20, %v8674_v17  ;;  %v9836_v10 = vld [vmem:[#allocation48_spill] sm:$0xff] }
 0x548   : > { %v4233_v55 = vpop.f32.mrf.mxu3 }
 0x549   : > { %v8742_v53 = vadd.f32 %v4322_v57, %v4233_v55 }
 0x54a   : > { %v3865_v54 = vpop.f32.mrf.mxu1 }
 0x54b   : > { %v3866_v29 = vadd.f32 %v3865_v54, %v8385_v19  ;;  %v4325_v49 = vpop.f32.mrf.mxu0  ;;  %v3956_v4 = vpop.f32.mrf.mxu2 }
 0x54d   : > { %v8745_v21 = vadd.f32 %v3954_v44, %v3866_v29  ;;  %3904 = vmatmul.bf16.gmra.mxu1 %v9826_v32  ;;  %4275 = vmatmul.bf16.gmra.mxu3 %v9834_v38  ;;  %v8762_v32 = vadd.f32 %v8676_v39, %v8688_v5  ;;  %v9837_v39 = vld [vmem:[#allocation19_spill] sm:$0xff] }
 0x54e   : > { %4364 = vmatmul.bf16.gmra.mxu0 %v9835_v46  ;;  %v5885_v5 = vld [vmem:[%s9453_s2 + $0x208] sm:$0xff] }
 0x54f   : > { %9833 = vst [vmem:[#allocation25_spill] sm:$0xff] %v8745_v21  ;;  %4406 = vmatpush.bf16.msra.mxu1 %v5885_v5 }
 0x550   : > { %v4236_v61 = vpop.f32.mrf.mxu3  ;;  %3998 = vmatmul.bf16.gmra.mxu2 %v9836_v10 }
 0x551   : > { %v8754_v3 = vadd.f32 %v4325_v49, %v4236_v61 }
 0x552   : > { %v3867_v19 = vpop.f32.mrf.mxu1 }
 0x553   : > { %v3868_v54 = vadd.f32 %v3867_v19, %v8427_v42  ;;  %v4327_v57 = vpop.f32.mrf.mxu0  ;;  %v3959_v44 = vpop.f32.mrf.mxu2  ;;  %v8773_v42 = vadd.f32 %v8691_v31, %v8697_v34  ;;  %v9838_v19 = vld [vmem:[#allocation51_spill] sm:$0xff]  ;;  %v8787_v34 = vadd.f32 %v8699_v30, %v8708_v2 }
 0x554   : > { %v9840_v30 = vld [vmem:[#allocation7_spill] sm:$0xff] }
 0x555   : > { %v8758_v55 = vadd.f32 %v3956_v4, %v3868_v54 }
 0x558   : > { %v4238_v17 = vpop.f32.mrf.mxu3 }
 0x559   : > { %v8764_v20 = vadd.f32 %v4327_v57, %v4238_v17 }
 0x55a   : > { %v3870_v29 = vpop.f32.mrf.mxu1 }
 0x55b   : > { %v3871_v49 = vadd.f32 %v3870_v29, %v8458_v50  ;;  %v4330_v38 = vpop.f32.mrf.mxu0  ;;  %v3961_v61 = vpop.f32.mrf.mxu2 }
 0x55d   : > { %v8767_v21 = vadd.f32 %v3959_v44, %v3871_v49  ;;  %3909 = vmatmul.bf16.gmra.mxu1 %v9830_v9  ;;  %4280 = vmatmul.bf16.gmra.mxu3 %v8285_v52 }
 0x55e   : > { %4369 = vmatmul.bf16.gmra.mxu0 %v9837_v39 }
 0x560   : > { %v4241_v4 = vpop.f32.mrf.mxu3  ;;  %4003 = vmatmul.bf16.gmra.mxu2 %v9838_v19 }
 0x561   : > { %v8779_v50 = vadd.f32 %v4330_v38, %v4241_v4 }
 0x562   : > { %v3872_v54 = vpop.f32.mrf.mxu1 }
 0x563   : > { %v3873_v9 = vadd.f32 %v3872_v54, %v8500_v62  ;;  %v4332_v52 = vpop.f32.mrf.mxu0  ;;  %v3964_v57 = vpop.f32.mrf.mxu2  ;;  %v8798_v62 = vadd.f32 %v8711_v59, %v8717_v63  ;;  %v9841_v54 = vld [vmem:[#allocation42_spill] sm:$0xff] }
 0x565   : > { %v8783_v44 = vadd.f32 %v3961_v61, %v3873_v9 }
 0x568   : > { %v4243_v31 = vpop.f32.mrf.mxu3 }
 0x569   : > { %v8789_v17 = vadd.f32 %v4332_v52, %v4243_v31 }
 0x56a   : > { %v3875_v29 = vpop.f32.mrf.mxu1 }
 0x56b   : > { %v3876_v49 = vadd.f32 %v3875_v29, %v8517_v27  ;;  %v4335_v38 = vpop.f32.mrf.mxu0  ;;  %v3966_v4 = vpop.f32.mrf.mxu2 }
 0x56d   : > { %v8792_v5 = vadd.f32 %v3964_v57, %v3876_v49  ;;  %3914 = vmatmul.bf16.gmra.mxu1 %v9835_v46  ;;  %4285 = vmatmul.bf16.gmra.mxu3 %v8326_v58 }
 0x56e   : > { %4374 = vmatmul.bf16.gmra.mxu0 %v9840_v30 }
 0x56f   : > { %9839 = vst [vmem:[#allocation20_spill] sm:$0xff] %v8792_v5 }
 0x570   : > { %v4246_v2 = vpop.f32.mrf.mxu3  ;;  %4008 = vmatmul.bf16.gmra.mxu2 %v9841_v54 }
 0x571   : > { %v8801_v61 = vadd.f32 %v4335_v38, %v4246_v2  ;;  %v9843_v2 = vld [vmem:[#allocation44_spill] sm:$0xff] }
 0x572   : > { %v3877_v27 = vpop.f32.mrf.mxu1 }
 0x573   : > { %v3878_v9 = vadd.f32 %v3877_v27, %v8531_v13  ;;  %v4337_v52 = vpop.f32.mrf.mxu0  ;;  %v3969_v57 = vpop.f32.mrf.mxu2  ;;  %v5884_v13 = vld [vmem:[%s9453_s2 + $0x200] sm:$0xff] }
 0x574   : > { %4407 = vmatpush.bf16.msra.mxu1 %v5884_v13 }
 0x575   : > { %v8805_v31 = vadd.f32 %v3966_v4, %v3878_v9 }
 0x578   : > { %v4248_v46 = vpop.f32.mrf.mxu3 }
 0x579   : > { %v8807_v58 = vadd.f32 %v4337_v52, %v4248_v46 }
 0x57a   : > { %v3880_v29 = vpop.f32.mrf.mxu1 }
 0x57b   : > { %v3881_v63 = vadd.f32 %v3880_v29, %v8543_v43  ;;  %v4340_v59 = vpop.f32.mrf.mxu0  ;;  %v3971_v49 = vpop.f32.mrf.mxu2 }
 0x57d   : > { %v8810_v5 = vadd.f32 %v3969_v57, %v3881_v63  ;;  %3919 = vmatmul.bf16.gmra.mxu1 %v9837_v39  ;;  %4290 = vmatmul.bf16.gmra.mxu3 %v8400_v41 }
 0x57e   : > { %4379 = vmatmul.bf16.gmra.mxu0 %v8274_v24 }
 0x57f   : > { %9842 = vst [vmem:[#allocation29_spill] sm:$0xff] %v8810_v5 }
 0x580   : > { %v4251_v38 = vpop.f32.mrf.mxu3  ;;  %4013 = vmatmul.bf16.gmra.mxu2 %v9843_v2 }
 0x581   : > { %v8818_v4 = vadd.f32 %v4340_v59, %v4251_v38 }
 0x582   : > { %v3882_v43 = vpop.f32.mrf.mxu1 }
 0x583   : > { %v3883_v27 = vadd.f32 %v3882_v43, %v8553_v47  ;;  %v4342_v9 = vpop.f32.mrf.mxu0  ;;  %v3974_v52 = vpop.f32.mrf.mxu2 }
 0x585   : > { %v8822_v39 = vadd.f32 %v3971_v49, %v3883_v27 }
 0x588   : > { %v4253_v41 = vpop.f32.mrf.mxu3 }
 0x589   : > { %v8824_v57 = vadd.f32 %v4342_v9, %v4253_v41 }
 0x58a   : > { %v3885_v46 = vpop.f32.mrf.mxu1 }
 0x58b   : > { %v3886_v29 = vadd.f32 %v3885_v46, %v8566_v60  ;;  %v4345_v63 = vpop.f32.mrf.mxu0  ;;  %v3976_v5 = vpop.f32.mrf.mxu2 }
 0x58d   : > { %v8827_v59 = vadd.f32 %v3974_v52, %v3886_v29  ;;  %3924 = vmatmul.bf16.gmra.mxu1 %v9840_v30  ;;  %4295 = vmatmul.bf16.gmra.mxu3 %v8471_v28 }
 0x58e   : > { %4384 = vmatmul.bf16.gmra.mxu0 %v7813_v15 }
 0x590   : > { %v4256_v47 = vpop.f32.mrf.mxu3  ;;  %4018 = vmatmul.bf16.gmra.mxu2 %v8402_v18 }
 0x591   : > { %v8832_v13 = vadd.f32 %v4345_v63, %v4256_v47 }
 0x592   : > { %v3887_v49 = vpop.f32.mrf.mxu1 }
 0x593   : > { %v3888_v38 = vadd.f32 %v3887_v49, %v8576_v25  ;;  %v4347_v43 = vpop.f32.mrf.mxu0  ;;  %v3979_v60 = vpop.f32.mrf.mxu2 }
 0x595   : > { %v8836_v27 = vadd.f32 %v3976_v5, %v3888_v38 }
 0x598   : > { %v4258_v9 = vpop.f32.mrf.mxu3 }
 0x599   : > { %v8838_v52 = vadd.f32 %v4347_v43, %v4258_v9 }
 0x59a   : > { %v3890_v30 = vpop.f32.mrf.mxu1 }
 0x59b   : > { %v3891_v28 = vadd.f32 %v3890_v30, %v8586_v7  ;;  %v4350_v41 = vpop.f32.mrf.mxu0  ;;  %v3981_v46 = vpop.f32.mrf.mxu2 }
 0x59d   : > { %v8841_v29 = vadd.f32 %v3979_v60, %v3891_v28  ;;  %3929 = vmatmul.bf16.gmra.mxu1 %v8274_v24  ;;  %4300 = vmatmul.bf16.gmra.mxu3 %v8521_v6  ;;  %v9844_v28 = vld [vmem:[#allocation8_spill] sm:$0xff] }
 0x59e   : > { %4389 = vmatmul.bf16.gmra.mxu0 %v7996_v51 }
 0x5a0   : > { %v4261_v25 = vpop.f32.mrf.mxu3  ;;  %4023 = vmatmul.bf16.gmra.mxu2 %v8474_v40 }
 0x5a1   : > { %v8846_v63 = vadd.f32 %v4350_v41, %v4261_v25  ;;  %v9845_v41 = vpack.c.b16 %v8067_v8, %v9844_v28 }
 0x5a2   : > { %v3892_v5 = vpop.f32.mrf.mxu1 }
 0x5a3   : > { %v3893_v47 = vadd.f32 %v3892_v5, %v8596_v23  ;;  %v4352_v49 = vpop.f32.mrf.mxu0  ;;  %v3984_v7 = vpop.f32.mrf.mxu2 }
 0x5a5   : > { %v8850_v38 = vadd.f32 %v3981_v46, %v3893_v47 }
 0x5a8   : > { %v4263_v43 = vpop.f32.mrf.mxu3 }
 0x5a9   : > { %v8852_v60 = vadd.f32 %v4352_v49, %v4263_v43 }
 0x5aa   : > { %v3895_v24 = vpop.f32.mrf.mxu1 }
 0x5ab   : > { %v3896_v6 = vadd.f32 %v3895_v24, %v8609_v45  ;;  %v4355_v9 = vpop.f32.mrf.mxu0  ;;  %v3986_v51 = vpop.f32.mrf.mxu2 }
 0x5ad   : > { %v8855_v30 = vadd.f32 %v3984_v7, %v3896_v6  ;;  %3934 = vmatmul.bf16.gmra.mxu1 %v7813_v15  ;;  %4305 = vmatmul.bf16.gmra.mxu3 %v9845_v41 }
 0x5ae   : > { %4394 = vmatmul.bf16.gmra.mxu0 %v7813_v15 }
 0x5b0   : > { %v4266_v23 = vpop.f32.mrf.mxu3 }
 0x5b1   : > { %v8862_v46 = vadd.f32 %v4355_v9, %v4266_v23 }
 0x5b2   : > { %v3897_v25 = vpop.f32.mrf.mxu1 }
 0x5b3   : > { %v3898_v5 = vadd.f32 %v3897_v25, %v8619_v16  ;;  %v4357_v47 = vpop.f32.mrf.mxu0  ;;  %v3989_v45 = vpop.f32.mrf.mxu2 }
 0x5b5   : > { %v8865_v49 = vadd.f32 %v3986_v51, %v3898_v5 }
 0x5b8   : > { %v4268_v7 = vpop.f32.mrf.mxu3 }
 0x5b9   : > { %v8867_v43 = vadd.f32 %v4357_v47, %v4268_v7 }
 0x5ba   : > { %v3900_v24 = vpop.f32.mrf.mxu1 }
 0x5bb   : > { %v3901_v6 = vadd.f32 %v3900_v24, %v8629_v56  ;;  %v4360_v8 = vpop.f32.mrf.mxu0  ;;  %v3991_v15 = vpop.f32.mrf.mxu2 }
 0x5bd   : > { %v8870_v28 = vadd.f32 %v3989_v45, %v3901_v6  ;;  %4408 = vmatmul.bf16.vlgmr.msra.gmra.mxu1 %v7898_v48 }
 0x5c0   : > { %v4271_v9 = vpop.f32.mrf.mxu3 }
 0x5c1   : > { %v8873_v41 = vadd.f32 %v4360_v8, %v4271_v9 }
 0x5c2   : > { %v3902_v16 = vpop.f32.mrf.mxu1 }
 0x5c3   : > { %v3903_v23 = vadd.f32 %v3902_v16, %v8639_v11  ;;  %v4362_v51 = vpop.f32.mrf.mxu0  ;;  %v3994_v5 = vpop.f32.mrf.mxu2 }
 0x5c5   : > { %v8876_v25 = vadd.f32 %v3991_v15, %v3903_v23 }
 0x5c7   : > { %9846 = vst [vmem:[#allocation27_spill] sm:$0xff] %v8876_v25 }
 0x5c8   : > { %v4273_v47 = vpop.f32.mrf.mxu3 }
 0x5c9   : > { %v8878_v7 = vadd.f32 %v4362_v51, %v4273_v47 }
 0x5ca   : > { %v3905_v56 = vpop.f32.mrf.mxu1 }
 0x5cb   : > { %v3906_v45 = vadd.f32 %v3905_v56, %v8652_v22  ;;  %v4365_v24 = vpop.f32.mrf.mxu0  ;;  %v3996_v9 = vpop.f32.mrf.mxu2  ;;  %v9849_v22 = vld [vmem:[#allocation15_spill] sm:$0xff] }
 0x5cd   : > { %v8881_v6 = vadd.f32 %v3994_v5, %v3906_v45  ;;  %4413 = vmatmul.bf16.gmra.mxu1 %v9809_v12  ;;  %v9850_v12 = vld [vmem:[#allocation43_spill] sm:$0xff] }
 0x5cf   : > { %9847 = vst [vmem:[#allocation37_spill] sm:$0xff] %v8881_v6 }
 0x5d0   : > { %v4276_v48 = vpop.f32.mrf.mxu3 }
 0x5d1   : > { %v8884_v8 = vadd.f32 %v4365_v24, %v4276_v48 }
 0x5d2   : > { %v3907_v11 = vpop.f32.mrf.mxu1 }
 0x5d3   : > { %9848 = vst [vmem:[#allocation31_spill] sm:$0xff] %v8884_v8  ;;  %v3908_v15 = vadd.f32 %v3907_v11, %v8662_v14  ;;  %v4367_v23 = vpop.f32.mrf.mxu0  ;;  %v3999_v5 = vpop.f32.mrf.mxu2  ;;  %v9851_v14 = vld [vmem:[#allocation24_spill] sm:$0xff] }
 0x5d5   : > { %v8887_v16 = vadd.f32 %v3996_v9, %v3908_v15 }
 0x5d8   : > { %v4278_v51 = vpop.f32.mrf.mxu3 }
 0x5d9   : > { %v8889_v47 = vadd.f32 %v4367_v23, %v4278_v51  ;;  %v9852_v23 = vld [vmem:[#allocation4_spill] sm:$0xff]  ;;  %v9853_v51 = vld [vmem:[#allocation21_spill] sm:$0xff] }
 0x5da   : > { %v3910_v25 = vpop.f32.mrf.mxu1 }
 0x5db   : > { %v3911_v56 = vadd.f32 %v3910_v25, %v9849_v22  ;;  %v4370_v24 = vpop.f32.mrf.mxu0 }
 0x5dd   : > { %v8892_v45 = vadd.f32 %v3999_v5, %v3911_v56  ;;  %4418 = vmatmul.bf16.gmra.mxu1 %v9850_v12  ;;  %v9854_v12 = vld [vmem:[#allocation5_spill] sm:$0xff] }
 0x5e0   : > { %v4281_v48 = vpop.f32.mrf.mxu3 }
 0x5e1   : > { %v8895_v6 = vadd.f32 %v4370_v24, %v4281_v48 }
 0x5e2   : > { %v3912_v8 = vpop.f32.mrf.mxu1 }
 0x5e3   : > { %v8898_v9 = vadd.f32 %v3912_v8, %v9851_v14  ;;  %v9855_v14 = vld [vmem:[#allocation14_spill] sm:$0xff] }
 0x5ea   : > { %v3915_v11 = vpop.f32.mrf.mxu1 }
 0x5eb   : > { %v8901_v15 = vadd.f32 %v3915_v11, %v8695_v1 }
 0x5ed   : > { %4423 = vmatmul.bf16.gmra.mxu1 %v9852_v23 }
 0x5f2   : > { %v3917_v25 = vpop.f32.mrf.mxu1 }
 0x5f3   : > { %v8905_v22 = vadd.f32 %v3917_v25, %v9853_v51  ;;  %v9856_v51 = vld [vmem:[#allocation18_spill] sm:$0xff] }
 0x5fa   : > { %v3920_v56 = vpop.f32.mrf.mxu1 }
 0x5fb   : > { %v8908_v5 = vadd.f32 %v3920_v56, %v8715_v36 }
 0x5fd   : > { %4428 = vmatmul.bf16.gmra.mxu1 %v9854_v12 }
 0x602   : > { %v3922_v24 = vpop.f32.mrf.mxu1 }
 0x603   : > { %v8912_v8 = vadd.f32 %v3922_v24, %v8726_v35 }
 0x60a   : > { %v3925_v48 = vpop.f32.mrf.mxu1 }
 0x60b   : > { %v8915_v1 = vadd.f32 %v3925_v48, %v8740_v26 }
 0x60d   : > { %4433 = vmatmul.bf16.gmra.mxu1 %v9855_v14  ;;  %v9857_v14 = vld [vmem:[#allocation30_spill] sm:$0xff] }
 0x612   : > { %v3927_v11 = vpop.f32.mrf.mxu1 }
 0x613   : > { %v8919_v23 = vadd.f32 %v3927_v11, %v8751_v33  ;;  %v9858_v11 = vld [vmem:[#allocation23_spill] sm:$0xff] }
 0x61a   : > { %v3930_v25 = vpop.f32.mrf.mxu1 }
 0x61b   : > { %v8922_v36 = vadd.f32 %v3930_v25, %v8762_v32 }
 0x61d   : > { %4438 = vmatmul.bf16.gmra.mxu1 %v9856_v51 }
 0x622   : > { %v3932_v56 = vpop.f32.mrf.mxu1 }
 0x623   : > { %v8926_v35 = vadd.f32 %v3932_v56, %v8773_v42 }
 0x62a   : > { %v3935_v12 = vpop.f32.mrf.mxu1 }
 0x62b   : > { %v8929_v26 = vadd.f32 %v3935_v12, %v8787_v34  ;;  %v9859_v12 = vld [vmem:[#allocation25_spill] sm:$0xff] }
 0x62d   : > { %4443 = vmatmul.bf16.gmra.mxu1 %v9832_v0 }
 0x632   : > { %v3937_v24 = vpop.f32.mrf.mxu1 }
 0x633   : > { %v8933_v33 = vadd.f32 %v3937_v24, %v8798_v62 }
 0x63a   : > { %v4409_v48 = vpop.f32.mrf.mxu1 }
 0x63b   : > { %v4410_v32 = vadd.f32 %v4409_v48, %v9857_v14 }
 0x63d   : > { %v8937_v25 = vadd.f32 %v4410_v32, %v9858_v11  ;;  %4448 = vmatmul.bf16.gmra.mxu1 %v9836_v10 }
 0x642   : > { %v4411_v42 = vpop.f32.mrf.mxu1 }
 0x643   : > { %v4412_v51 = vadd.f32 %v4411_v42, %v8742_v53  ;;  %v9860_v42 = vld [vmem:[#allocation20_spill] sm:$0xff] }
 0x645   : > { %v8942_v34 = vadd.f32 %v4412_v51, %v8736_v37 }
 0x64a   : > { %v4414_v56 = vpop.f32.mrf.mxu1 }
 0x64b   : > { %v4415_v0 = vadd.f32 %v4414_v56, %v8754_v3  ;;  %v9861_v56 = vld [vmem:[#allocation29_spill] sm:$0xff] }
 0x64d   : > { %v8946_v62 = vadd.f32 %v4415_v0, %v9859_v12  ;;  %4453 = vmatmul.bf16.gmra.mxu1 %v9838_v19 }
 0x652   : > { %v4416_v24 = vpop.f32.mrf.mxu1 }
 0x653   : > { %v4417_v48 = vadd.f32 %v4416_v24, %v8764_v20 }
 0x655   : > { %v8951_v14 = vadd.f32 %v4417_v48, %v8758_v55 }
 0x65a   : > { %v4419_v10 = vpop.f32.mrf.mxu1 }
 0x65b   : > { %v4420_v53 = vadd.f32 %v4419_v10, %v8779_v50  ;;  %v9865_v10 = vld [vmem:[#allocation45_spill] sm:$0xff] }
 0x65d   : > { %v8955_v37 = vadd.f32 %v4420_v53, %v8767_v21  ;;  %4458 = vmatmul.bf16.gmra.mxu1 %v9841_v54 }
 0x662   : > { %v4421_v3 = vpop.f32.mrf.mxu1 }
 0x663   : > { %v4422_v32 = vadd.f32 %v4421_v3, %v8789_v17  ;;  %v9868_v3 = vld [vmem:[#allocation12_spill] sm:$0xff] }
 0x665   : > { %v8960_v11 = vadd.f32 %v4422_v32, %v8783_v44  ;;  %v9869_v32 = vld [vmem:[#allocation39_spill] sm:$0xff] }
 0x66a   : > { %v4424_v19 = vpop.f32.mrf.mxu1 }
 0x66b   : > { %v4425_v20 = vadd.f32 %v4424_v19, %v8801_v61 }
 0x66d   : > { %v8964_v55 = vadd.f32 %v4425_v20, %v9860_v42  ;;  %4463 = vmatmul.bf16.gmra.mxu1 %v9843_v2 }
 0x672   : > { %v4426_v50 = vpop.f32.mrf.mxu1 }
 0x673   : > { %v4427_v21 = vadd.f32 %v4426_v50, %v8807_v58  ;;  %v9871_v50 = vld [vmem:[#allocation27_spill] sm:$0xff] }
 0x675   : > { %v8969_v51 = vadd.f32 %v4427_v21, %v8805_v31 }
 0x67a   : > { %v4429_v54 = vpop.f32.mrf.mxu1 }
 0x67b   : > { %v4430_v17 = vadd.f32 %v4429_v54, %v8818_v4  ;;  %v4283_v54 = vpop.f32.mrf.mxu3 }
 0x67d   : > { %v8973_v44 = vadd.f32 %v4430_v17, %v9861_v56  ;;  %4468 = vmatmul.bf16.gmra.mxu1 %v8402_v18  ;;  %v9872_v56 = vld [vmem:[#allocation31_spill] sm:$0xff] }
 0x682   : > { %v4431_v61 = vpop.f32.mrf.mxu1 }
 0x683   : > { %v4432_v0 = vadd.f32 %v4431_v61, %v8824_v57 }
 0x685   : > { %v8978_v12 = vadd.f32 %v4432_v0, %v8822_v39  ;;  %v9873_v0 = vld [vmem:[#allocation37_spill] sm:$0xff] }
 0x68a   : > { %v4434_v2 = vpop.f32.mrf.mxu1 }
 0x68b   : > { %v4435_v58 = vadd.f32 %v4434_v2, %v8832_v13  ;;  %v4001_v2 = vpop.f32.mrf.mxu2 }
 0x68d   : > { %v8982_v31 = vadd.f32 %v4435_v58, %v8827_v59  ;;  %4473 = vmatmul.bf16.gmra.mxu1 %v8474_v40 }
 0x68f   : > { %9862 = vst [vmem:[#allocation26_spill] sm:$0xff] %v8982_v31 }
 0x692   : > { %v4436_v4 = vpop.f32.mrf.mxu1 }
 0x693   : > { %v4437_v24 = vadd.f32 %v4436_v4, %v8838_v52 }
 0x695   : > { %v8987_v48 = vadd.f32 %v4437_v24, %v8836_v27  ;;  %v4004_v24 = vpop.f32.mrf.mxu2 }
 0x697   : > { %9863 = vst [vmem:[#allocation35_spill] sm:$0xff] %v8987_v48 }
 0x69a   : > { %v4439_v18 = vpop.f32.mrf.mxu1 }
 0x69b   : > { %v4440_v57 = vadd.f32 %v4439_v18, %v8846_v63  ;;  %v9870_v63 = vpack.c.b16 %v9868_v3, %v9869_v32  ;;  %v4521_v3 = vadd.f32 %v8942_v34, %v8937_v25 }
 0x69d   : > { %v8991_v39 = vadd.f32 %v4440_v57, %v8841_v29  ;;  %4478 = vmatmul.bf16.gmra.mxu1 %v9865_v10 }
 0x69f   : > { %9864 = vst [vmem:[#allocation34_spill] sm:$0xff] %v8991_v39 }
 0x6a2   : > { %v4441_v13 = vpop.f32.mrf.mxu1 }
 0x6a3   : > { %v4442_v59 = vadd.f32 %v4441_v13, %v8852_v60 }
 0x6a5   : > { %v8996_v53 = vadd.f32 %v4442_v59, %v8850_v38 }
 0x6a7   : > { %9866 = vst [vmem:[#allocation33_spill] sm:$0xff] %v8996_v53 }
 0x6aa   : > { %v4444_v40 = vpop.f32.mrf.mxu1 }
 0x6ab   : > { %v4445_v52 = vadd.f32 %v4444_v40, %v8862_v46  ;;  %v4006_v40 = vpop.f32.mrf.mxu2 }
 0x6ad   : > { %v9000_v27 = vadd.f32 %v4445_v52, %v8855_v30  ;;  %4483 = vmatmul.bf16.gmra.mxu1 %v9870_v63 }
 0x6af   : > { %9867 = vst [vmem:[#allocation40_spill] sm:$0xff] %v9000_v27 }
 0x6b2   : > { %v4446_v29 = vpop.f32.mrf.mxu1 }
 0x6b3   : > { %v4447_v19 = vadd.f32 %v4446_v29, %v8867_v43  ;;  %v4372_v43 = vpop.f32.mrf.mxu0 }
 0x6b5   : > { %v9007_v20 = vadd.f32 %v4447_v19, %v8865_v49 }
 0x6ba   : > { %v4449_v60 = vpop.f32.mrf.mxu1 }
 0x6bb   : > { %v4450_v38 = vadd.f32 %v4449_v60, %v8873_v41 }
 0x6bd   : > { %v9011_v42 = vadd.f32 %v4450_v38, %v8870_v28  ;;  %v4286_v28 = vpop.f32.mrf.mxu3 }
 0x6c2   : > { %v4451_v46 = vpop.f32.mrf.mxu1 }
 0x6c3   : > { %v4452_v30 = vadd.f32 %v4451_v46, %v8878_v7  ;;  %v4375_v7 = vpop.f32.mrf.mxu0 }
 0x6c5   : > { %v9015_v21 = vadd.f32 %v4452_v30, %v9871_v50  ;;  %v4288_v13 = vpop.f32.mrf.mxu3 }
 0x6ca   : > { %v4454_v17 = vpop.f32.mrf.mxu1 }
 0x6cb   : > { %v4455_v61 = vadd.f32 %v4454_v17, %v9872_v56  ;;  %v4377_v59 = vpop.f32.mrf.mxu0 }
 0x6cd   : > { %v9019_v49 = vadd.f32 %v4455_v61, %v9873_v0  ;;  %v4291_v32 = vpop.f32.mrf.mxu3 }
 0x6d2   : > { %v4456_v58 = vpop.f32.mrf.mxu1 }
 0x6d3   : > { %v4457_v41 = vadd.f32 %v4456_v58, %v8889_v47  ;;  %v4522_v47 = vadd.f32 %v4521_v3, %v8946_v62  ;;  %v4380_v29 = vpop.f32.mrf.mxu0 }
 0x6d5   : > { %v9023_v4 = vadd.f32 %v4457_v41, %v8887_v16  ;;  %v4523_v16 = vadd.f32 %v4522_v47, %v8951_v14  ;;  %v4293_v30 = vpop.f32.mrf.mxu3 }
 0x6d7   : > { %v4524_v63 = vadd.f32 %v4523_v16, %v8955_v37 }
 0x6da   : > { %v4459_v18 = vpop.f32.mrf.mxu1 }
 0x6db   : > { %v4460_v57 = vadd.f32 %v4459_v18, %v8895_v6  ;;  %v4525_v6 = vadd.f32 %v4524_v63, %v8960_v11  ;;  %v4382_v56 = vpop.f32.mrf.mxu0 }
 0x6dd   : > { %v9027_v10 = vadd.f32 %v4460_v57, %v8892_v45  ;;  %v4009_v45 = vpop.f32.mrf.mxu2  ;;  %v4526_v60 = vadd.f32 %v4525_v6, %v8964_v55  ;;  %v4296_v3 = vpop.f32.mrf.mxu3 }
 0x6df   : > { %v4527_v38 = vadd.f32 %v4526_v60, %v8969_v51  ;;  %v4373_v60 = vadd.f32 %v4372_v43, %v4283_v54 }
 0x6e1   : > { %v4528_v46 = vadd.f32 %v4527_v38, %v8973_v44 }
 0x6e2   : > { %v4461_v52 = vpop.f32.mrf.mxu1 }
 0x6e3   : > { %v4529_v17 = vadd.f32 %v4528_v46, %v8978_v12  ;;  %v4385_v16 = vpop.f32.mrf.mxu0 }
 0x6e5   : > { %v4530_v61 = vadd.f32 %v4529_v17, %v8982_v31  ;;  %v4011_v0 = vpop.f32.mrf.mxu2  ;;  %v4376_v17 = vadd.f32 %v4375_v7, %v4286_v28  ;;  %v4007_v28 = vadd.f32 %v4006_v40, %v8905_v22 }
 0x6e7   : > { %v4531_v58 = vadd.f32 %v4530_v61, %v8987_v48  ;;  %v4462_v61 = vadd.f32 %v4461_v52, %v4373_v60  ;;  %v4381_v48 = vadd.f32 %v4380_v29, %v4291_v32 }
 0x6e9   : > { %v4532_v41 = vadd.f32 %v4531_v58, %v8991_v39  ;;  %v4002_v58 = vadd.f32 %v4001_v2, %v8898_v9  ;;  %v4378_v39 = vadd.f32 %v4377_v59, %v4288_v13 }
 0x6ea   : > { %v4464_v19 = vpop.f32.mrf.mxu1 }
 0x6eb   : > { %v4533_v57 = vadd.f32 %v4532_v41, %v8996_v53  ;;  %v4465_v53 = vadd.f32 %v4464_v19, %v4376_v17  ;;  %v9051_v54 = vadd.f32 %v4462_v61, %v4002_v58  ;;  %v4387_v7 = vpop.f32.mrf.mxu0 }
 0x6ed   : > { %v4534_v47 = vadd.f32 %v4533_v57, %v9000_v27  ;;  %v4014_v6 = vpop.f32.mrf.mxu2  ;;  %v4005_v57 = vadd.f32 %v4004_v24, %v8901_v15  ;;  %v4298_v27 = vpop.f32.mrf.mxu3  ;;  %v4386_v24 = vadd.f32 %v4385_v16, %v4296_v3 }
 0x6ef   : > { %v4535_v63 = vadd.f32 %v4534_v47, %v9007_v20  ;;  %v9055_v9 = vadd.f32 %v4465_v53, %v4005_v57  ;;  %v4015_v53 = vadd.f32 %v4014_v6, %v8915_v1 }
 0x6f1   : > { %v4536_v38 = vadd.f32 %v4535_v63, %v9011_v42  ;;  %v4383_v63 = vadd.f32 %v4382_v56, %v4293_v30  ;;  %v4388_v30 = vadd.f32 %v4387_v7, %v4298_v27 }
 0x6f2   : > { %v4466_v50 = vpop.f32.mrf.mxu1 }
 0x6f3   : > { %v4537_v31 = vadd.f32 %v4536_v38, %v9015_v21  ;;  %v4467_v43 = vadd.f32 %v4466_v50, %v4378_v39  ;;  %v4012_v39 = vadd.f32 %v4011_v0, %v8912_v8 }
 0x6f5   : > { %v4538_v41 = vadd.f32 %v4537_v31, %v9019_v49  ;;  %v4010_v31 = vadd.f32 %v4009_v45, %v8908_v5  ;;  %v4016_v13 = vpop.f32.mrf.mxu2  ;;  %v9059_v32 = vadd.f32 %v4467_v43, %v4007_v28  ;;  %v4301_v45 = vpop.f32.mrf.mxu3 }
 0x6f6   : > { %v4017_v8 = vadd.f32 %v4016_v13, %v8919_v23 }
 0x6f7   : > { %v4539_v47 = vadd.f32 %v4538_v41, %v9023_v4 }
 0x6f9   : > { %v4540_v52 = vadd.f32 %v4539_v47, %v9027_v10 }
 0x6fa   : > { %v4469_v18 = vpop.f32.mrf.mxu1 }
 0x6fb   : > { %v4470_v2 = vadd.f32 %v4469_v18, %v4381_v48  ;;  %v4541_v59 = vadd.f32 %v4540_v52, %v9051_v54  ;;  %v4390_v18 = vpop.f32.mrf.mxu0 }
 0x6fc   : > { %v4391_v6 = vadd.f32 %v4390_v18, %v4301_v45 }
 0x6fd   : > { %v4542_v22 = vadd.f32 %v4541_v59, %v9055_v9  ;;  %v9063_v40 = vadd.f32 %v4470_v2, %v4010_v31  ;;  %v4019_v60 = vpop.f32.mrf.mxu2  ;;  %v4303_v17 = vpop.f32.mrf.mxu3 }
 0x6fe   : > { %v4020_v58 = vadd.f32 %v4019_v60, %v8922_v36 }
 0x6ff   : > { %v4543_v48 = vadd.f32 %v4542_v22, %v9059_v32 }
 0x701   : > { %v4544_v50 = vadd.f32 %v4543_v48, %v9063_v40 }
 0x702   : > { %v4471_v46 = vpop.f32.mrf.mxu1 }
 0x703   : > { %v4472_v29 = vadd.f32 %v4471_v46, %v4383_v63  ;;  %v4392_v41 = vpop.f32.mrf.mxu0 }
 0x704   : > { %v4393_v28 = vadd.f32 %v4392_v41, %v4303_v17 }
 0x705   : > { %v9067_v5 = vadd.f32 %v4472_v29, %v4012_v39  ;;  %v4021_v47 = vpop.f32.mrf.mxu2  ;;  %v4306_v52 = vpop.f32.mrf.mxu3 }
 0x706   : > { %v4022_v23 = vadd.f32 %v4021_v47, %v8926_v35 }
 0x707   : > { %v4545_v0 = vadd.f32 %v4544_v50, %v9067_v5 }
 0x70a   : > { %v4474_v15 = vpop.f32.mrf.mxu1 }
 0x70b   : > { %v4475_v19 = vadd.f32 %v4474_v15, %v4386_v24  ;;  %v4395_v31 = vpop.f32.mrf.mxu0 }
 0x70c   : > { %v4396_v24 = vadd.f32 %v4395_v31, %v4306_v52 }
 0x70d   : > { %v4515_v56 = vadd.f32 %v4475_v19, %v4015_v53  ;;  %v4024_v15 = vpop.f32.mrf.mxu2  ;;  %v4308_v22 = vpop.f32.mrf.mxu3 }
 0x70e   : > { %v4025_v29 = vadd.f32 %v4024_v15, %v8929_v26 }
 0x70f   : > { %v4546_v38 = vadd.f32 %v4545_v0, %v4515_v56 }
 0x712   : > { %v4476_v3 = vpop.f32.mrf.mxu1 }
 0x713   : > { %v4477_v16 = vadd.f32 %v4476_v3, %v4388_v30  ;;  %v4397_v53 = vpop.f32.mrf.mxu0 }
 0x714   : > { %v4398_v48 = vadd.f32 %v4397_v53, %v4308_v22  ;;  %v9876_v53 = vld [vmem:[#allocation34_spill] sm:$0xff] }
 0x715   : > { %v4516_v46 = vadd.f32 %v4477_v16, %v4017_v8  ;;  %v4026_v45 = vpop.f32.mrf.mxu2 }
 0x716   : > { %v4027_v35 = vadd.f32 %v4026_v45, %v8933_v33 }
 0x717   : > { %v4547_v1 = vadd.f32 %v4546_v38, %v4516_v46 }
 0x71a   : > { %v4479_v61 = vpop.f32.mrf.mxu1 }
 0x71b   : > { %v4480_v27 = vadd.f32 %v4479_v61, %v4391_v6 }
 0x71d   : > { %v4517_v57 = vadd.f32 %v4480_v27, %v4020_v58 }
 0x71f   : > { %v4548_v43 = vadd.f32 %v4547_v1, %v4517_v57 }
 0x722   : > { %v4481_v7 = vpop.f32.mrf.mxu1 }
 0x723   : > { %v4482_v63 = vadd.f32 %v4481_v7, %v4393_v28 }
 0x725   : > { %v4518_v2 = vadd.f32 %v4482_v63, %v4022_v23 }
 0x727   : > { %v4549_v13 = vadd.f32 %v4548_v43, %v4518_v2 }
 0x72a   : > { %v4484_v59 = vpop.f32.mrf.mxu1 }
 0x72b   : > { %v4485_v36 = vadd.f32 %v4484_v59, %v4396_v24  ;;  %v9874_v59 = vld [vmem:[#allocation26_spill] sm:$0xff] }
 0x72d   : > { %v4519_v39 = vadd.f32 %v4485_v36, %v4025_v29 }
 0x72f   : > { %v4550_v19 = vadd.f32 %v4549_v13, %v4519_v39 }
 0x732   : > { %v4486_v30 = vpop.f32.mrf.mxu1 }
 0x733   : > { %v4487_v50 = vadd.f32 %v4486_v30, %v4398_v48 }
 0x735   : > { %v4520_v18 = vadd.f32 %v4487_v50, %v4027_v35  ;;  %v9877_v35 = vld [vmem:[#allocation33_spill] sm:$0xff] }
 0x737   : > { %v4551_v3 = vadd.f32 %v4550_v19, %v4520_v18 }
 0x739   : > { %v4552_v8 = vrot.slane %v4551_v3, 4 }
 0x73b   : > { %v4553_v0 = vadd.f32 %v4552_v8, %v4551_v3  ;;  %v9878_v8 = vld [vmem:[#allocation40_spill] sm:$0xff] }
 0x73d   : > { %v4554_v16 = vrot.slane %v4553_v0, 2 }
 0x73f   : > { %v4555_v60 = vadd.f32 %v4554_v16, %v4553_v0 }
 0x741   : > { %v4556_v38 = vrot.slane %v4555_v60, 1 }
 0x743   : > { %v4557_v1 = vadd.f32 %v4556_v38, %v4555_v60 }
 0x745   : > { %v9076_v26 = vmul.f32 0.00390625, %v4557_v1 }
 0x747   : > { %v9079_v6 = vsub.f32 %v4515_v56, %v9076_v26  ;;  %v9082_v17 = vsub.f32 %v4516_v46, %v9076_v26  ;;  %v9085_v61 = vsub.f32 %v4517_v57, %v9076_v26  ;;  %v9088_v33 = vsub.f32 %v4518_v2, %v9076_v26 }
 0x748   : > { %v9091_v58 = vsub.f32 %v4519_v39, %v9076_v26  ;;  %v9094_v27 = vsub.f32 %v4520_v18, %v9076_v26  ;;  %v9098_v41 = vsub.f32 %v8937_v25, %v9076_v26  ;;  %v9102_v56 = vsub.f32 %v8942_v34, %v9076_v26  ;;  %v9875_v39 = vld [vmem:[#allocation35_spill] sm:$0xff] }
 0x749   : > { %v9106_v46 = vsub.f32 %v8946_v62, %v9076_v26  ;;  %v9114_v43 = vsub.f32 %v8951_v14, %v9076_v26  ;;  %v9118_v25 = vsub.f32 %v8955_v37, %v9076_v26  ;;  %v9124_v62 = vsub.f32 %v8960_v11, %v9076_v26 }
 0x74a   : > { %v4591_v57 = vmul.f32 %v9098_v41, %v9098_v41  ;;  %v4592_v47 = vmul.f32 %v9102_v56, %v9102_v56  ;;  %v9130_v14 = vsub.f32 %v8964_v55, %v9076_v26  ;;  %v9136_v52 = vsub.f32 %v8969_v51, %v9076_v26 }
 0x74b   : > { %v4593_v34 = vmul.f32 %v9106_v46, %v9106_v46  ;;  %v4594_v7 = vmul.f32 %v9114_v43, %v9114_v43  ;;  %v4595_v37 = vmul.f32 %v9118_v25, %v9118_v25  ;;  %v4596_v11 = vmul.f32 %v9124_v62, %v9124_v62 }
 0x74c   : > { %v4623_v28 = vadd.f32 %v4592_v47, %v4591_v57  ;;  %v9142_v31 = vsub.f32 %v8973_v44, %v9076_v26  ;;  %v4597_v55 = vmul.f32 %v9130_v14, %v9130_v14  ;;  %v9148_v15 = vsub.f32 %v8978_v12, %v9076_v26 }
 0x74d   : > { %v4598_v51 = vmul.f32 %v9136_v52, %v9136_v52  ;;  %v9154_v29 = vsub.f32 %v9874_v59, %v9076_v26  ;;  %v9160_v22 = vsub.f32 %v9875_v39, %v9076_v26  ;;  %v9166_v48 = vsub.f32 %v9876_v53, %v9076_v26 }
 0x74e   : > { %v4624_v23 = vadd.f32 %v4623_v28, %v4593_v34  ;;  %v4599_v44 = vmul.f32 %v9142_v31, %v9142_v31  ;;  %v4600_v12 = vmul.f32 %v9148_v15, %v9148_v15  ;;  %v9172_v50 = vsub.f32 %v9877_v35, %v9076_v26 }
 0x74f   : > { %v4601_v45 = vmul.f32 %v9154_v29, %v9154_v29  ;;  %v4602_v18 = vmul.f32 %v9160_v22, %v9160_v22  ;;  %v9178_v0 = vsub.f32 %v9878_v8, %v9076_v26  ;;  %v4603_v16 = vmul.f32 %v9166_v48, %v9166_v48 }
 0x750   : > { %v4625_v63 = vadd.f32 %v4624_v23, %v4594_v7  ;;  %v9184_v38 = vsub.f32 %v9007_v20, %v9076_v26  ;;  %v4604_v1 = vmul.f32 %v9172_v50, %v9172_v50  ;;  %v9190_v47 = vsub.f32 %v9011_v42, %v9076_v26 }
 0x751   : > { %v4605_v34 = vmul.f32 %v9178_v0, %v9178_v0  ;;  %v9196_v7 = vsub.f32 %v9015_v21, %v9076_v26  ;;  %v9226_v59 = vsub.f32 %v9055_v9, %v9076_v26  ;;  %v9244_v53 = vsub.f32 %v9067_v5, %v9076_v26 }
 0x752   : > { %v4626_v2 = vadd.f32 %v4625_v63, %v4595_v37  ;;  %v4606_v20 = vmul.f32 %v9184_v38, %v9184_v38  ;;  %v9202_v37 = vsub.f32 %v9019_v49, %v9076_v26  ;;  %v4607_v42 = vmul.f32 %v9190_v47, %v9190_v47 }
 0x753   : > { %v4608_v21 = vmul.f32 %v9196_v7, %v9196_v7  ;;  %v4613_v9 = vmul.f32 %v9226_v59, %v9226_v59  ;;  %v4618_v5 = vmul.f32 %v9082_v17, %v9082_v17 }
 0x754   : > { %v4627_v13 = vadd.f32 %v4626_v2, %v4596_v11  ;;  %v9208_v11 = vsub.f32 %v9023_v4, %v9076_v26  ;;  %v4609_v49 = vmul.f32 %v9202_v37, %v9202_v37 }
 0x756   : > { %v4628_v24 = vadd.f32 %v4627_v13, %v4597_v55  ;;  %v9214_v55 = vsub.f32 %v9027_v10, %v9076_v26  ;;  %v4610_v4 = vmul.f32 %v9208_v11, %v9208_v11 }
 0x758   : > { %v4629_v36 = vadd.f32 %v4628_v24, %v4598_v51  ;;  %v9220_v51 = vsub.f32 %v9051_v54, %v9076_v26  ;;  %v4611_v10 = vmul.f32 %v9214_v55, %v9214_v55 }
 0x75a   : > { %v4630_v19 = vadd.f32 %v4629_v36, %v4599_v44  ;;  %v9232_v36 = vsub.f32 %v9059_v32, %v9076_v26  ;;  %v4612_v54 = vmul.f32 %v9220_v51, %v9220_v51 }
 0x75c   : > { %v4631_v30 = vadd.f32 %v4630_v19, %v4600_v12  ;;  %v9238_v12 = vsub.f32 %v9063_v40, %v9076_v26  ;;  %v4614_v32 = vmul.f32 %v9232_v36, %v9232_v36  ;;  %v4616_v40 = vmul.f32 %v9244_v53, %v9244_v53 }
 0x75e   : > { %v4632_v3 = vadd.f32 %v4631_v30, %v4601_v45  ;;  %v4615_v30 = vmul.f32 %v9238_v12, %v9238_v12 }
 0x760   : > { %v4633_v60 = vadd.f32 %v4632_v3, %v4602_v18  ;;  %v4617_v3 = vmul.f32 %v9079_v6, %v9079_v6 }
 0x762   : > { %v4634_v57 = vadd.f32 %v4633_v60, %v4603_v16  ;;  %v4619_v16 = vmul.f32 %v9085_v61, %v9085_v61 }
 0x764   : > { %v4635_v28 = vadd.f32 %v4634_v57, %v4604_v1  ;;  %v4620_v1 = vmul.f32 %v9088_v33, %v9088_v33 }
 0x766   : > { %v4636_v23 = vadd.f32 %v4635_v28, %v4605_v34  ;;  %v4621_v34 = vmul.f32 %v9091_v58, %v9091_v58 }
 0x768   : > { %v4637_v63 = vadd.f32 %v4636_v23, %v4606_v20  ;;  %v4622_v20 = vmul.f32 %v9094_v27, %v9094_v27 }
 0x76a   : > { %v4638_v2 = vadd.f32 %v4637_v63, %v4607_v42 }
 0x76c   : > { %v4639_v13 = vadd.f32 %v4638_v2, %v4608_v21 }
 0x76e   : > { %v4640_v24 = vadd.f32 %v4639_v13, %v4609_v49 }
 0x770   : > { %v4641_v44 = vadd.f32 %v4640_v24, %v4610_v4 }
 0x772   : > { %v4642_v39 = vadd.f32 %v4641_v44, %v4611_v10 }
 0x774   : > { %v4643_v19 = vadd.f32 %v4642_v39, %v4612_v54  ;;  %v9265_v39 = vld [vmem:[%s6089_s27] sm:$0xff]  }
 0x776   : > { %v4644_v45 = vadd.f32 %v4643_v19, %v4613_v9  ;;  %v9268_v9 = vld [vmem:[%s6089_s27 + $0x8] sm:$0xff]   ;;  %v9271_v19 = vld [vmem:[%s6089_s27 + $0x10] sm:$0xff]  }
 0x778   : > { %v4645_v35 = vadd.f32 %v4644_v45, %v4614_v32  ;;  %v9274_v32 = vld [vmem:[%s6089_s27 + $0x18] sm:$0xff]  }
 0x77a   : > { %v4646_v18 = vadd.f32 %v4645_v35, %v4615_v30  ;;  %v9277_v30 = vld [vmem:[%s6089_s27 + $0x20] sm:$0xff]   ;;  %v9280_v35 = vld [vmem:[%s6089_s27 + $0x28] sm:$0xff]  }
 0x77c   : > { %v4647_v8 = vadd.f32 %v4646_v18, %v4616_v40  ;;  %v9283_v40 = vld [vmem:[%s6089_s27 + $0x30] sm:$0xff]  }
 0x77e   : > { %v4648_v26 = vadd.f32 %v4647_v8, %v4617_v3  ;;  %v4704_v3 = vunpack.c.l.bf16 %v9265_v39 }
 0x780   : > { %v4649_v60 = vadd.f32 %v4648_v26, %v4618_v5  ;;  %v9289_v26 = vld [vmem:[%s6089_s27 + $0x38] sm:$0xff]  }
 0x782   : > { %v4650_v57 = vadd.f32 %v4649_v60, %v4619_v16 }
 0x784   : > { %v4651_v28 = vadd.f32 %v4650_v57, %v4620_v1 }
 0x786   : > { %v4652_v23 = vadd.f32 %v4651_v28, %v4621_v34  ;;  %v9296_v34 = vld [vmem:[%s6089_s27 + $0x40] sm:$0xff]   ;;  %v9299_v28 = vld [vmem:[%s6089_s27 + $0x48] sm:$0xff]  }
 0x788   : > { %v4653_v42 = vadd.f32 %v4652_v23, %v4622_v20 }
 0x78a   : > { %v4654_v63 = vrot.slane %v4653_v42, 4 }
 0x78c   : > { %v4655_v21 = vadd.f32 %v4654_v63, %v4653_v42  ;;  %v9304_v63 = vld [vmem:[%s6089_s27 + $0x50] sm:$0xff]   ;;  %v9319_v42 = vld [vmem:[%s6089_s27 + $0x68] sm:$0xff]  }
 0x78d   : > { %9879 = vst [vmem:[#allocation2_spill] sm:$0xff] %v9304_v63  ;;  %v4731_v23 = vunpack.c.h.bf16 %v9319_v42 }
 0x78e   : > { %v4656_v2 = vrot.slane %v4655_v21, 2 }
 0x790   : > { %v4657_v49 = vadd.f32 %v4656_v2, %v4655_v21  ;;  %v9322_v21 = vld [vmem:[%s6089_s27 + $0x70] sm:$0xff]   ;;  %v4730_v2 = vunpack.c.l.bf16 %v9319_v42 }
 0x792   : > { %v4658_v13 = vrot.slane %v4657_v49, 1 }
 0x794   : > { %v4659_v4 = vadd.f32 %v4658_v13, %v4657_v49 }
 0x796   : > { %v4660_v24 = vmul.f32 0.00390625, %v4659_v4  ;;  %v9311_v4 = vld [vmem:[%s6089_s27 + $0x58] sm:$0xff]  }
 0x797   : > { %9880 = vst [vmem:[#allocation49_spill] sm:$0xff] %v9311_v4 }
 0x798   : > { %v4661_v10 = vadd.f32 1e-05, %v4660_v24  ;;  %v9314_v24 = vld [vmem:[%s6089_s27 + $0x60] sm:$0xff]  }
 0x799   : > { %v4728_v49 = vunpack.c.l.bf16 %v9314_v24  ;;  %v4729_v13 = vunpack.c.h.bf16 %v9314_v24 }
 0x79a   : > { %6013 = vrsqrt.f32 %v4661_v10  ;;  %vm4668_vm8 = vweird.f32 %v4661_v10 }
 0x7a0   : > { %v6014_v44 = vpop.eup %6013 }
 0x7a1   : > { %v4663_v54 = vmul.f32 %v6014_v44, %v4661_v10  ;;  %vm4669_vm7 = vweird.f32 %v6014_v44 }
 0x7a2   : > { %vm4670_vm9 = vmor %vm4668_vm8, %vm4669_vm7 }
 0x7a3   : > { %v4664_v45 = vmul.f32 %v6014_v44, %v4663_v54 }
 0x7a5   : > { %v4665_v18 = vmul.f32 0.5, %v4664_v45 }
 0x7a7   : > { %v4666_v20 = vsub.f32 1.5, %v4665_v18 }
 0x7a9   : > { %v4667_v54 = vmul.f32 %v6014_v44, %v4666_v20  ;;  %v9330_v20 = vld [vmem:[%s6089_s27 + $0x78] sm:$0xff]  }
 0x7aa   : > { %v4734_v1 = vunpack.c.l.bf16 %v9330_v20  ;;  %v4735_v60 = vunpack.c.h.bf16 %v9330_v20 }
 0x7ab   : > { %v4671_v10 = vsel %vm4670_vm9, %v6014_v44, %v4667_v54  ;;  %v4732_v44 = vunpack.c.l.bf16 %v9322_v21  ;;  %v4733_v54 = vunpack.c.h.bf16 %v9322_v21 }
 0x7ac   : > { %v4672_v18 = vmul.f32 %v4671_v10, %v9098_v41  ;;  %v4673_v57 = vmul.f32 %v4671_v10, %v9102_v56  ;;  %v4674_v45 = vmul.f32 %v4671_v10, %v9106_v46  ;;  %v4675_v24 = vmul.f32 %v4671_v10, %v9114_v43 }
 0x7ad   : > { %v4676_v16 = vmul.f32 %v4671_v10, %v9118_v25  ;;  %v4677_v42 = vmul.f32 %v4671_v10, %v9124_v62  ;;  %v4678_v5 = vmul.f32 %v4671_v10, %v9130_v14  ;;  %v4679_v21 = vmul.f32 %v4671_v10, %v9136_v52 }
 0x7ae   : > { %v4680_v41 = vmul.f32 %v4671_v10, %v9142_v31  ;;  %v4681_v56 = vmul.f32 %v4671_v10, %v9148_v15  ;;  %v4682_v8 = vmul.f32 %v4671_v10, %v9154_v29  ;;  %v4683_v20 = vmul.f32 %v4671_v10, %v9160_v22 }
 0x7af   : > { %v4684_v46 = vmul.f32 %v4671_v10, %v9166_v48  ;;  %v4685_v43 = vmul.f32 %v4671_v10, %v9172_v50  ;;  %v4696_v25 = vmul.f32 %v4671_v10, %v9238_v12  ;;  %v4697_v62 = vmul.f32 %v4671_v10, %v9244_v53 }
 0x7b0   : > { %v4698_v14 = vmul.f32 %v4671_v10, %v9079_v6  ;;  %v4699_v52 = vmul.f32 %v4671_v10, %v9082_v17  ;;  %v4700_v31 = vmul.f32 %v4671_v10, %v9085_v61  ;;  %v4701_v15 = vmul.f32 %v4671_v10, %v9088_v33 }
 0x7b1   : > { %v4702_v29 = vmul.f32 %v4671_v10, %v9091_v58  ;;  %v4703_v22 = vmul.f32 %v4671_v10, %v9094_v27  ;;  %v4686_v48 = vmul.f32 %v4671_v10, %v9178_v0  ;;  %v4687_v50 = vmul.f32 %v4671_v10, %v9184_v38 }
 0x7b2   : > { %v4688_v12 = vmul.f32 %v4671_v10, %v9190_v47  ;;  %v4689_v53 = vmul.f32 %v4671_v10, %v9196_v7  ;;  %v4690_v6 = vmul.f32 %v4671_v10, %v9202_v37  ;;  %v4691_v17 = vmul.f32 %v4671_v10, %v9208_v11 }
 0x7b3   : > { %v4692_v61 = vmul.f32 %v4671_v10, %v9214_v55  ;;  %v4693_v33 = vmul.f32 %v4671_v10, %v9220_v51  ;;  %v4694_v58 = vmul.f32 %v4671_v10, %v9226_v59  ;;  %v4695_v27 = vmul.f32 %v4671_v10, %v9232_v36 }
 0x7b4   : > { %v4736_v0 = vadd.f32 %v4704_v3, %v4672_v18  ;;  %v9881_v38 = vunpack.c.h.bf16 %v9265_v39  ;;  %v9882_v7 = vunpack.c.l.bf16 %v9268_v9  ;;  %v9883_v37 = vunpack.c.h.bf16 %v9268_v9 }
 0x7b5   : > { %v9884_v55 = vunpack.c.l.bf16 %v9271_v19  ;;  %v9885_v59 = vunpack.c.h.bf16 %v9271_v19  ;;  %v9886_v36 = vunpack.c.l.bf16 %v9274_v32  ;;  %v9887_v3 = vunpack.c.h.bf16 %v9274_v32 }
 0x7b6   : > { %v4737_v47 = vadd.f32 %v9881_v38, %v4673_v57  ;;  %v4738_v4 = vadd.f32 %v9882_v7, %v4674_v45  ;;  %v4739_v11 = vadd.f32 %v9883_v37, %v4675_v24  ;;  %v9888_v57 = vunpack.c.l.bf16 %v9277_v30 }
 0x7b7   : > { %v4740_v51 = vadd.f32 %v9884_v55, %v4676_v16  ;;  %v4741_v63 = vadd.f32 %v9885_v59, %v4677_v42  ;;  %v4742_v10 = vadd.f32 %v9886_v36, %v4678_v5  ;;  %v4743_v39 = vadd.f32 %v9887_v3, %v4679_v21 }
 0x7b8   : > { %v4744_v18 = vadd.f32 %v9888_v57, %v4680_v41  ;;  %v9889_v45 = vunpack.c.h.bf16 %v9277_v30  ;;  %v9890_v24 = vunpack.c.l.bf16 %v9280_v35  ;;  %v9891_v16 = vunpack.c.h.bf16 %v9280_v35 }
 0x7b9   : > { %v9892_v19 = vunpack.c.l.bf16 %v9283_v40  ;;  %v9893_v5 = vunpack.c.h.bf16 %v9283_v40  ;;  %v4760_v32 = vadd.f32 %v4728_v49, %v4696_v25  ;;  %v4761_v21 = vadd.f32 %v4729_v13, %v4697_v62 }
 0x7ba   : > { %v4745_v9 = vadd.f32 %v9889_v45, %v4681_v56  ;;  %v4746_v38 = vadd.f32 %v9890_v24, %v4682_v8  ;;  %v4747_v7 = vadd.f32 %v9891_v16, %v4683_v20  ;;  %v4762_v55 = vadd.f32 %v4730_v2, %v4698_v14 }
 0x7bb   : > { %v4748_v42 = vadd.f32 %v9892_v19, %v4684_v46  ;;  %v4749_v37 = vadd.f32 %v9893_v5, %v4685_v43  ;;  %v4763_v59 = vadd.f32 %v4731_v23, %v4699_v52  ;;  %v4764_v30 = vadd.f32 %v4732_v44, %v4700_v31 }
 0x7bc   : > { %v4765_v35 = vadd.f32 %v4733_v54, %v4701_v15  ;;  %v4766_v8 = vadd.f32 %v4734_v1, %v4702_v29  ;;  %v4767_v41 = vadd.f32 %v4735_v60, %v4703_v22  ;;  %v9894_v56 = vunpack.c.l.bf16 %v9289_v26  ;;  %v9900_v15 = vld [vmem:[#allocation2_spill] sm:$0xff] }
 0x7bd   : > { %v5895_v20 = vpack.c.bf16 %v4737_v47, %v4736_v0  ;;  %v5900_v49 = vpack.c.bf16 %v4739_v11, %v4738_v4  ;;  %v5905_v13 = vpack.c.bf16 %v4741_v63, %v4740_v51  ;;  %v9895_v23 = vunpack.c.h.bf16 %v9289_v26 }
 0x7be   : > { %v4750_v40 = vadd.f32 %v9894_v56, %v4686_v48  ;;  %v9896_v46 = vunpack.c.l.bf16 %v9296_v34  ;;  %v9897_v25 = vunpack.c.h.bf16 %v9296_v34  ;;  %v5910_v54 = vpack.c.bf16 %v4743_v39, %v4742_v10 }
 0x7bf   : > { %v4751_v2 = vadd.f32 %v9895_v23, %v4687_v50  ;;  %v9898_v1 = vunpack.c.l.bf16 %v9299_v28  ;;  %v9899_v62 = vunpack.c.h.bf16 %v9299_v28  ;;  %5896 = vst [vmem:[%s9410_s4] sm:$0xff] %v5895_v20   ;;  %v5915_v63 = vpack.c.bf16 %v4745_v9, %v4744_v18 }
 0x7c0   : > { %v4752_v43 = vadd.f32 %v9896_v46, %v4688_v12  ;;  %v4753_v44 = vadd.f32 %v9897_v25, %v4689_v53  ;;  %v5920_v26 = vpack.c.bf16 %v4747_v7, %v4746_v38  ;;  %5972 = vst [vmem:[%s9410_s4 + $0x8] sm:$0xff] %v5900_v49   ;;  %v5955_v4 = vpack.c.bf16 %v4761_v21, %v4760_v32  ;;  %v9903_v12 = vld [vmem:[#allocation49_spill] sm:$0xff] }
 0x7c1   : > { %v4754_v60 = vadd.f32 %v9898_v1, %v4690_v6  ;;  %v4755_v14 = vadd.f32 %v9899_v62, %v4691_v17  ;;  %v5960_v52 = vpack.c.bf16 %v4763_v59, %v4762_v55  ;;  %v5965_v31 = vpack.c.bf16 %v4765_v35, %v4764_v30  ;;  %5973 = vst [vmem:[%s9410_s4 + $0x10] sm:$0xff] %v5905_v13  }
 0x7c2   : > { %v5970_v34 = vpack.c.bf16 %v4767_v41, %v4766_v8  ;;  %v9901_v29 = vunpack.c.l.bf16 %v9900_v15  ;;  %v9902_v48 = vunpack.c.h.bf16 %v9900_v15  ;;  %v5925_v50 = vpack.c.bf16 %v4749_v37, %v4748_v42  ;;  %5974 = vst [vmem:[%s9410_s4 + $0x18] sm:$0xff] %v5910_v54  }
 0x7c3   : > { %v9904_v53 = vunpack.c.l.bf16 %v9903_v12  ;;  %v9905_v17 = vunpack.c.h.bf16 %v9903_v12  ;;  %5975 = vst [vmem:[%s9410_s4 + $0x20] sm:$0xff] %v5915_v63   ;;  %v5935_v47 = vpack.c.bf16 %v4753_v44, %v4752_v43 }
 0x7c4   : > { %v4756_v22 = vadd.f32 %v9901_v29, %v4692_v61  ;;  %v4757_v28 = vadd.f32 %v9902_v48, %v4693_v33  ;;  %v5930_v61 = vpack.c.bf16 %v4751_v2, %v4750_v40  ;;  %5976 = vst [vmem:[%s9410_s4 + $0x28] sm:$0xff] %v5920_v26   ;;  %v5940_v33 = vpack.c.bf16 %v4755_v14, %v4754_v60 }
 0x7c5   : > { %v4758_v6 = vadd.f32 %v9904_v53, %v4694_v58  ;;  %v4759_v0 = vadd.f32 %v9905_v17, %v4695_v27  ;;  %5977 = vst [vmem:[%s9410_s4 + $0x30] sm:$0xff] %v5925_v50  }
 0x7c6   : > { %v5945_v11 = vpack.c.bf16 %v4757_v28, %v4756_v22  ;;  %5978 = vst [vmem:[%s9410_s4 + $0x38] sm:$0xff] %v5930_v61  }
 0x7c7   : > { %v5950_v51 = vpack.c.bf16 %v4759_v0, %v4758_v6  ;;  %5979 = vst [vmem:[%s9410_s4 + $0x40] sm:$0xff] %v5935_v47  }
 0x7c8   : > { %5980 = vst [vmem:[%s9410_s4 + $0x48] sm:$0xff] %v5940_v33  }
 0x7c9   : > { %5981 = vst [vmem:[%s9410_s4 + $0x50] sm:$0xff] %v5945_v11  }
 0x7ca   : > { %5982 = vst [vmem:[%s9410_s4 + $0x58] sm:$0xff] %v5950_v51  }
 0x7cb   : > { %5983 = vst [vmem:[%s9410_s4 + $0x60] sm:$0xff] %v5955_v4  }
 0x7cc   : > { %5984 = vst [vmem:[%s9410_s4 + $0x68] sm:$0xff] %v5960_v52  }
 0x7cd   : > { %5985 = vst [vmem:[%s9410_s4 + $0x70] sm:$0xff] %v5965_v31  }
 0x7ce   : > { %5986 = vst [vmem:[%s9410_s4 + $0x78] sm:$0xff] %v5970_v34  }
 0x7cf PF: > { %s13_s12 = sadd.s32 1, %s6036_s12  }
 0x7d0   : > { %p10_p4 = scmp.ge.s32.totalorder %s13_s12, 4  }
 0x7d2   :  { %12 = sbr.rel (!%p10_p4) target bundleno = 1 (0x1), region = 66 }

</bundles_post_ra>
